<compile_context>
chip_gen: v7x
topology: tpu7x:2x2x1
jax: 0.10.0
libtpu: 0.0.40
codegen_flags: <defaults>
</compile_context>

<pallas_src>
import jax
import jax.numpy as jnp
import numpy as np
from jax.experimental import pallas as pl
from jax.experimental.pallas import tpu as pltpu

LEAK = 0.1


def _leaky(x):
    return jnp.where(x > 0, x, LEAK * x)


# ------------------------------ fused kernel ------------------------------- #
# One grid step processes a tile of TB batch elements end-to-end:
#   conv_resblock (1x1 Conv1d, channel-first, per element)
#   -> torch .view(-1, C*L) fused into the first MLP matmul (per element)
#   -> rows gathered into a (TB, Mc) scratch tile
#   -> mlp_resblock batched over the tile -> padded lane-dense store.

def fused_kernel(x_ref,
                 cwinT, cbinC, cbw1T, cbb1C, cbw2T, cbb2C, cwoutT, cboutC,
                 mwb, mbin, mbw1, mbb1, mbw2, mbb2, mwo1, mbo1, mwo2, mbo2,
                 o_ref, h_tile):
    f32 = jnp.float32
    TB = x_ref.shape[0]          # static batch-tile size
    Cc = cwoutT.shape[0]         # conv channels

    # ---- conv_resblock + fused flatten, per batch element (TB static, small) ----
    for b in range(TB):
        x = x_ref[b]                                              # (Cin, L)  NCL slice
        h = _leaky(jnp.dot(cwinT[...], x, preferred_element_type=f32) + cbinC[...])
        for i in range(cbw1T.shape[0]):                           # 3 residual blocks
            t = _leaky(jnp.dot(cbw1T[i], h, preferred_element_type=f32) + cbb1C[i])
            t = jnp.dot(cbw2T[i], t, preferred_element_type=f32) + cbb2C[i]
            h = _leaky(h + t)
        y = jnp.dot(cwoutT[...], h, preferred_element_type=f32) + cboutC[...]
        y = jnp.maximum(y, 0.0)                                   # (Cc, L), ReLU

        # torch `x.view(-1, Cc*L)` fused into the first MLP matmul:
        # flat feature f = c*L + l ; mwb[c] holds mB_win rows c*L .. c*L+L-1,
        # so  row_b = bin + sum_c y[c, :] @ mwb[c]   (no reshape / transpose).
        acc = mbin[...]                                           # (1, Mc)
        for c in range(Cc):
            acc = acc + jnp.dot(y[c:c + 1, :], mwb[c], preferred_element_type=f32)
        h_tile[pl.ds(b, 1), :] = acc                              # assemble tile row b

    # ---- mlp_resblock, batched over the whole (TB, Mc) tile ----
    h = _leaky(h_tile[...])                                       # (TB, Mc)
    for i in range(mbw1.shape[0]):                                # 3 residual blocks
        t = _leaky(jnp.dot(h, mbw1[i], preferred_element_type=f32) + mbb1[i])
        t = jnp.dot(t, mbw2[i], preferred_element_type=f32) + mbb2[i]
        h = _leaky(h + t)
    t = _leaky(jnp.dot(h, mwo1[...], preferred_element_type=f32) + mbo1[...])
    # final weight/bias zero-padded to 128 lanes -> unmasked lane-dense store
    o_ref[...] = jnp.dot(t, mwo2[...], preferred_element_type=f32) + mbo2[...]


# ------------------------------- wrapper ----------------------------------- #

def conv_mlp_forward(obs, kp, out_ch, batch_tile=8):
    N, Cin, L = obs.shape
    out_pad = kp['mB_wo2p'].shape[1]
    Mc = kp['mB_bin'].shape[1]

    # batch tile: whole batch if small, else 8-row tiles (keeps (8,128) blocks legal)
    TB = int(min(batch_tile, N))
    N_pad = ((N + TB - 1) // TB) * TB
    if N_pad != N:
        obs = jnp.concatenate(
            [obs, jnp.zeros((N_pad - N, Cin, L), obs.dtype)], axis=0)

    weight_args = (kp['cA_winT'], kp['cA_binC'], kp['cA_bw1T'], kp['cA_bb1C'],
                   kp['cA_bw2T'], kp['cA_bb2C'], kp['cA_woutT'], kp['cA_boutC'],
                   kp['mB_wb'], kp['mB_bin'], kp['mB_bw1'], kp['mB_bb1'],
                   kp['mB_bw2'], kp['mB_bb2'], kp['mB_wo1'], kp['mB_bo1'],
                   kp['mB_wo2p'], kp['mB_bo2p'])

    def resident(a):
        # full-array block, constant index map -> DMA'd once, stays in VMEM
        return pl.BlockSpec(a.shape, lambda n, nd=a.ndim: (0,) * nd)

    in_specs = ([pl.BlockSpec((TB, Cin, L), lambda n: (n, 0, 0))]
                + [resident(a) for a in weight_args])
    out_specs = pl.BlockSpec((TB, out_pad), lambda n: (n, 0))

    out = pl.pallas_call(
        fused_kernel,
        grid=(N_pad // TB,),
        out_shape=jax.ShapeDtypeStruct((N_pad, out_pad), jnp.float32),
        in_specs=in_specs,
        out_specs=out_specs,
        scratch_shapes=[pltpu.VMEM((TB, Mc), jnp.float32)],
        compiler_params=pltpu.CompilerParams(
            dimension_semantics=("parallel",),          # shards batch over v7x's 2 TCs
            vmem_limit_bytes=32 * 1024 * 1024),         # v7x scoped-VMEM friendly
    )(obs, *weight_args)
    return out[:N, :out_ch]


# ---------------- one-time weight re-layout for the fused kernel ----------- #

def pack_kernel_params(p, L, out_pad=128):
    Cc = p['cA_wout'].shape[1]
    Mc = p['mB_bin'].shape[1]
    out_ch = p['mB_wo2'].shape[1]
    assert p['mB_win'].shape[0] == Cc * L

    kp = {}
    # conv stage: (out, in) weights + column biases -> kernel eats NCL directly
    kp['cA_winT'] = p['cA_win'].T
    kp['cA_binC'] = p['cA_bin'].T
    kp['cA_bw1T'] = jnp.transpose(p['cA_bw1'], (0, 2, 1))
    kp['cA_bb1C'] = jnp.transpose(p['cA_bb1'], (0, 2, 1))
    kp['cA_bw2T'] = jnp.transpose(p['cA_bw2'], (0, 2, 1))
    kp['cA_bb2C'] = jnp.transpose(p['cA_bb2'], (0, 2, 1))
    kp['cA_woutT'] = p['cA_wout'].T
    kp['cA_boutC'] = p['cA_bout'].T
    # torch .view(-1, Cc*L) folded into the first MLP weight: wb[c][l, :] = win[c*L+l, :]
    kp['mB_wb'] = p['mB_win'].reshape(Cc, L, Mc)
    kp['mB_bin'] = p['mB_bin']
    kp['mB_bw1'] = p['mB_bw1']; kp['mB_bb1'] = p['mB_bb1']
    kp['mB_bw2'] = p['mB_bw2']; kp['mB_bb2'] = p['mB_bb2']
    kp['mB_wo1'] = p['mB_wo1']; kp['mB_bo1'] = p['mB_bo1']
    # pad the final Linear to a multiple of 128 lanes for an unmasked store
    pad = max(out_pad, ((out_ch + 127) // 128) * 128)
    kp['mB_wo2p'] = jnp.zeros((Mc, pad), jnp.float32).at[:, :out_ch].set(p['mB_wo2'])
    kp['mB_bo2p'] = jnp.zeros((1, pad), jnp.float32).at[:, :out_ch].set(p['mB_bo2'])
    return kp


# ----------------------- deterministic parameter init ---------------------- #

def init_params(key, conv_in, conv_ch, mlp_in, mlp_ch, out_ch, block_num=3):
    """Canonical layout: weights (in, out); biases (1, out); blocks stacked."""
    ks = iter(jax.random.split(key, 64))

    def w(shape, fan_in):
        bound = 1.0 / np.sqrt(fan_in)
        return jax.random.uniform(next(ks), shape, jnp.float32, -bound, bound)

    p = {}
    p['cA_win'] = w((conv_in, conv_ch), conv_in)
    p['cA_bin'] = w((1, conv_ch), conv_in)
    p['cA_bw1'] = jnp.stack([w((conv_ch, conv_ch), conv_ch) for _ in range(block_num)])
    p['cA_bb1'] = jnp.stack([w((1, conv_ch), conv_ch) for _ in range(block_num)])
    p['cA_bw2'] = jnp.stack([w((conv_ch, conv_ch), conv_ch) for _ in range(block_num)])
    p['cA_bb2'] = jnp.stack([w((1, conv_ch), conv_ch) for _ in range(block_num)])
    p['cA_wout'] = w((conv_ch, conv_ch), conv_ch)
    p['cA_bout'] = w((1, conv_ch), conv_ch)
    p['mB_win'] = w((mlp_in, mlp_ch), mlp_in)
    p['mB_bin'] = w((1, mlp_ch), mlp_in)
    p['mB_bw1'] = jnp.stack([w((mlp_ch, mlp_ch), mlp_ch) for _ in range(block_num)])
    p['mB_bb1'] = jnp.stack([w((1, mlp_ch), mlp_ch) for _ in range(block_num)])
    p['mB_bw2'] = jnp.stack([w((mlp_ch, mlp_ch), mlp_ch) for _ in range(block_num)])
    p['mB_bb2'] = jnp.stack([w((1, mlp_ch), mlp_ch) for _ in range(block_num)])
    p['mB_wo1'] = w((mlp_ch, mlp_ch), mlp_ch)
    p['mB_bo1'] = w((1, mlp_ch), mlp_ch)
    p['mB_wo2'] = w((mlp_ch, out_ch), mlp_ch)
    p['mB_bo2'] = w((1, out_ch), mlp_ch)
    return p


# ------------------------- pure-JAX reference (NCL) ------------------------ #

def ref_forward(obs, p, mlp_in):
    def conv1x1(x, w_io, b):  # x: (N, Cin, L), w_io: (Cin, Cout), b: (1, Cout)
        return jnp.einsum('ncl,co->nol', x, w_io) + b[0][None, :, None]

    h = _leaky(conv1x1(obs, p['cA_win'], p['cA_bin']))
    for i in range(p['cA_bw1'].shape[0]):
        t = _leaky(conv1x1(h, p['cA_bw1'][i], p['cA_bb1'][i]))
        t = conv1x1(t, p['cA_bw2'][i], p['cA_bb2'][i])
        h = _leaky(h + t)
    h = jnp.maximum(conv1x1(h, p['cA_wout'], p['cA_bout']), 0.0)

    x = h.reshape(-1, mlp_in)                       # torch .view(-1, mlp_in)
    h = _leaky(x @ p['mB_win'] + p['mB_bin'])
    for i in range(p['mB_bw1'].shape[0]):
        t = _leaky(h @ p['mB_bw1'][i] + p['mB_bb1'][i])
        t = t @ p['mB_bw2'][i] + p['mB_bb2'][i]
        h = _leaky(h + t)
    t = _leaky(h @ p['mB_wo1'] + p['mB_bo1'])
    return t @ p['mB_wo2'] + p['mB_bo2']


# --------------------------------- main ------------------------------------ #

if __name__ == "__main__":
    # small shapes: batch=2, conv_in=4, seq L=8, conv_ch=32, mlp_in=conv_ch*L=256,
    # mlp_ch=32, out_ch=8, block_num=3
    N, conv_in, L = 2, 4, 8
    conv_ch, mlp_ch, out_ch, block_num = 32, 32, 8, 3
    mlp_in = conv_ch * L

    key = jax.random.PRNGKey(0)
    k_obs, k_par = jax.random.split(key)
    obs = jax.random.normal(k_obs, (N, conv_in, L), jnp.float32)   # NCL like torch
    params = init_params(k_par, conv_in, conv_ch, mlp_in, mlp_ch, out_ch, block_num)
    kparams = pack_kernel_params(params, L)                        # one-time re-layout

    out = jax.block_until_ready(conv_mlp_forward(obs, kparams, out_ch))
    ref = jax.block_until_ready(ref_forward(obs, params, mlp_in))

    assert out.shape == (N, out_ch), out.shape
    np.testing.assert_allclose(np.asarray(out), np.asarray(ref), rtol=5e-5, atol=5e-5)
    print("KERNEL_OK")
</pallas_src>

<mosaic_0001>
module attributes {stable_mosaic.version = 11 : i64} {
  func.func @fused_kernel(%arg0: i32, %arg1: memref<2x4x8xf32, #tpu.memory_space<vmem>>, %arg2: memref<32x4xf32, #tpu.memory_space<vmem>>, %arg3: memref<32x1xf32, #tpu.memory_space<vmem>>, %arg4: memref<3x32x32xf32, #tpu.memory_space<vmem>>, %arg5: memref<3x32x1xf32, #tpu.memory_space<vmem>>, %arg6: memref<3x32x32xf32, #tpu.memory_space<vmem>>, %arg7: memref<3x32x1xf32, #tpu.memory_space<vmem>>, %arg8: memref<32x32xf32, #tpu.memory_space<vmem>>, %arg9: memref<32x1xf32, #tpu.memory_space<vmem>>, %arg10: memref<32x8x32xf32, #tpu.memory_space<vmem>>, %arg11: memref<1x32xf32, #tpu.memory_space<vmem>>, %arg12: memref<3x32x32xf32, #tpu.memory_space<vmem>>, %arg13: memref<3x1x32xf32, #tpu.memory_space<vmem>>, %arg14: memref<3x32x32xf32, #tpu.memory_space<vmem>>, %arg15: memref<3x1x32xf32, #tpu.memory_space<vmem>>, %arg16: memref<32x32xf32, #tpu.memory_space<vmem>>, %arg17: memref<1x32xf32, #tpu.memory_space<vmem>>, %arg18: memref<32x128xf32, #tpu.memory_space<vmem>>, %arg19: memref<1x128xf32, #tpu.memory_space<vmem>>, %arg20: memref<2x128xf32, #tpu.memory_space<vmem>>, %arg21: memref<2x32xf32, #tpu.memory_space<vmem>>) attributes {dimension_semantics = [#tpu.dimension_semantics<parallel>], iteration_bounds = array<i64: 1>, scalar_prefetch = 0 : i64, scratch_operands = 1 : i64, tpu.core_type = #tpu.core_type<tc>, window_params = [{transform_indices = @transform_0, window_bounds = array<i64: 2, 4, 8>}, {pipeline_mode = #tpu.pipeline_mode<synchronous>, transform_indices = @transform_1, window_bounds = array<i64: 32, 4>}, {pipeline_mode = #tpu.pipeline_mode<synchronous>, transform_indices = @transform_2, window_bounds = array<i64: 32, 1>}, {pipeline_mode = #tpu.pipeline_mode<synchronous>, transform_indices = @transform_3, window_bounds = array<i64: 3, 32, 32>}, {pipeline_mode = #tpu.pipeline_mode<synchronous>, transform_indices = @transform_4, window_bounds = array<i64: 3, 32, 1>}, {pipeline_mode = #tpu.pipeline_mode<synchronous>, transform_indices = @transform_5, window_bounds = array<i64: 3, 32, 32>}, {pipeline_mode = #tpu.pipeline_mode<synchronous>, transform_indices = @transform_6, window_bounds = array<i64: 3, 32, 1>}, {pipeline_mode = #tpu.pipeline_mode<synchronous>, transform_indices = @transform_7, window_bounds = array<i64: 32, 32>}, {pipeline_mode = #tpu.pipeline_mode<synchronous>, transform_indices = @transform_8, window_bounds = array<i64: 32, 1>}, {pipeline_mode = #tpu.pipeline_mode<synchronous>, transform_indices = @transform_9, window_bounds = array<i64: 32, 8, 32>}, {pipeline_mode = #tpu.pipeline_mode<synchronous>, transform_indices = @transform_10, window_bounds = array<i64: 1, 32>}, {pipeline_mode = #tpu.pipeline_mode<synchronous>, transform_indices = @transform_11, window_bounds = array<i64: 3, 32, 32>}, {pipeline_mode = #tpu.pipeline_mode<synchronous>, transform_indices = @transform_12, window_bounds = array<i64: 3, 1, 32>}, {pipeline_mode = #tpu.pipeline_mode<synchronous>, transform_indices = @transform_13, window_bounds = array<i64: 3, 32, 32>}, {pipeline_mode = #tpu.pipeline_mode<synchronous>, transform_indices = @transform_14, window_bounds = array<i64: 3, 1, 32>}, {pipeline_mode = #tpu.pipeline_mode<synchronous>, transform_indices = @transform_15, window_bounds = array<i64: 32, 32>}, {pipeline_mode = #tpu.pipeline_mode<synchronous>, transform_indices = @transform_16, window_bounds = array<i64: 1, 32>}, {pipeline_mode = #tpu.pipeline_mode<synchronous>, transform_indices = @transform_17, window_bounds = array<i64: 32, 128>}, {pipeline_mode = #tpu.pipeline_mode<synchronous>, transform_indices = @transform_18, window_bounds = array<i64: 1, 128>}, {transform_indices = @transform_19, window_bounds = array<i64: 2, 128>}]} {
    %c0 = arith.constant 0 : index
    %c0_0 = arith.constant 0 : index
    %c0_1 = arith.constant 0 : index
    %0 = vector.load %arg1[%c0, %c0_0, %c0_1] : memref<2x4x8xf32, #tpu.memory_space<vmem>>, vector<1x4x8xf32>
    %1 = vector.shape_cast %0 : vector<1x4x8xf32> to vector<4x8xf32>
    %c0_2 = arith.constant 0 : index
    %c0_3 = arith.constant 0 : index
    %2 = vector.load %arg2[%c0_2, %c0_3] : memref<32x4xf32, #tpu.memory_space<vmem>>, vector<32x4xf32>
    %cst = arith.constant dense<0.000000e+00> : vector<32x8xf32>
    %3 = tpu.matmul %2, %1, %cst {dimension_numbers = #tpu.dot_dimension_numbers<[1], [0], [0], [1], [0, 0, 1, 1], [], []>} : vector<32x4xf32>, vector<4x8xf32>, vector<32x8xf32> -> vector<32x8xf32>
    %c0_4 = arith.constant 0 : index
    %c0_5 = arith.constant 0 : index
    %4 = vector.load %arg3[%c0_4, %c0_5] : memref<32x1xf32, #tpu.memory_space<vmem>>, vector<32x1xf32>
    %5 = vector.broadcast %4 : vector<32x1xf32> to vector<32x8xf32>
    %6 = arith.addf %3, %5 : vector<32x8xf32>
    %cst_6 = arith.constant 0.000000e+00 : f32
    %7 = vector.broadcast %cst_6 : f32 to vector<32x8xf32>
    %8 = arith.cmpf ogt, %6, %7 : vector<32x8xf32>
    %cst_7 = arith.constant 1.000000e-01 : f32
    %9 = vector.broadcast %cst_7 : f32 to vector<32x8xf32>
    %10 = arith.mulf %9, %6 : vector<32x8xf32>
    %11 = arith.select %8, %6, %10 : vector<32x8xi1>, vector<32x8xf32>
    %c0_8 = arith.constant 0 : index
    %c0_9 = arith.constant 0 : index
    %c0_10 = arith.constant 0 : index
    %12 = vector.load %arg4[%c0_8, %c0_9, %c0_10] : memref<3x32x32xf32, #tpu.memory_space<vmem>>, vector<1x32x32xf32>
    %13 = vector.shape_cast %12 : vector<1x32x32xf32> to vector<32x32xf32>
    %cst_11 = arith.constant dense<0.000000e+00> : vector<32x8xf32>
    %14 = tpu.matmul %13, %11, %cst_11 {dimension_numbers = #tpu.dot_dimension_numbers<[1], [0], [0], [1], [0, 0, 1, 1], [], []>} : vector<32x32xf32>, vector<32x8xf32>, vector<32x8xf32> -> vector<32x8xf32>
    %c0_12 = arith.constant 0 : index
    %c0_13 = arith.constant 0 : index
    %c0_14 = arith.constant 0 : index
    %15 = vector.load %arg5[%c0_12, %c0_13, %c0_14] : memref<3x32x1xf32, #tpu.memory_space<vmem>>, vector<1x32x1xf32>
    %16 = vector.shape_cast %15 : vector<1x32x1xf32> to vector<32x1xf32>
    %17 = vector.broadcast %16 : vector<32x1xf32> to vector<32x8xf32>
    %18 = arith.addf %14, %17 : vector<32x8xf32>
    %cst_15 = arith.constant 0.000000e+00 : f32
    %19 = vector.broadcast %cst_15 : f32 to vector<32x8xf32>
    %20 = arith.cmpf ogt, %18, %19 : vector<32x8xf32>
    %cst_16 = arith.constant 1.000000e-01 : f32
    %21 = vector.broadcast %cst_16 : f32 to vector<32x8xf32>
    %22 = arith.mulf %21, %18 : vector<32x8xf32>
    %23 = arith.select %20, %18, %22 : vector<32x8xi1>, vector<32x8xf32>
    %c0_17 = arith.constant 0 : index
    %c0_18 = arith.constant 0 : index
    %c0_19 = arith.constant 0 : index
    %24 = vector.load %arg6[%c0_17, %c0_18, %c0_19] : memref<3x32x32xf32, #tpu.memory_space<vmem>>, vector<1x32x32xf32>
    %25 = vector.shape_cast %24 : vector<1x32x32xf32> to vector<32x32xf32>
    %cst_20 = arith.constant dense<0.000000e+00> : vector<32x8xf32>
    %26 = tpu.matmul %25, %23, %cst_20 {dimension_numbers = #tpu.dot_dimension_numbers<[1], [0], [0], [1], [0, 0, 1, 1], [], []>} : vector<32x32xf32>, vector<32x8xf32>, vector<32x8xf32> -> vector<32x8xf32>
    %c0_21 = arith.constant 0 : index
    %c0_22 = arith.constant 0 : index
    %c0_23 = arith.constant 0 : index
    %27 = vector.load %arg7[%c0_21, %c0_22, %c0_23] : memref<3x32x1xf32, #tpu.memory_space<vmem>>, vector<1x32x1xf32>
    %28 = vector.shape_cast %27 : vector<1x32x1xf32> to vector<32x1xf32>
    %29 = vector.broadcast %28 : vector<32x1xf32> to vector<32x8xf32>
    %30 = arith.addf %26, %29 : vector<32x8xf32>
    %31 = arith.addf %11, %30 : vector<32x8xf32>
    %cst_24 = arith.constant 0.000000e+00 : f32
    %32 = vector.broadcast %cst_24 : f32 to vector<32x8xf32>
    %33 = arith.cmpf ogt, %31, %32 : vector<32x8xf32>
    %cst_25 = arith.constant 1.000000e-01 : f32
    %34 = vector.broadcast %cst_25 : f32 to vector<32x8xf32>
    %35 = arith.mulf %34, %31 : vector<32x8xf32>
    %36 = arith.select %33, %31, %35 : vector<32x8xi1>, vector<32x8xf32>
    %c1 = arith.constant 1 : index
    %c0_26 = arith.constant 0 : index
    %c0_27 = arith.constant 0 : index
    %37 = vector.load %arg4[%c1, %c0_26, %c0_27] : memref<3x32x32xf32, #tpu.memory_space<vmem>>, vector<1x32x32xf32>
    %38 = vector.shape_cast %37 : vector<1x32x32xf32> to vector<32x32xf32>
    %cst_28 = arith.constant dense<0.000000e+00> : vector<32x8xf32>
    %39 = tpu.matmul %38, %36, %cst_28 {dimension_numbers = #tpu.dot_dimension_numbers<[1], [0], [0], [1], [0, 0, 1, 1], [], []>} : vector<32x32xf32>, vector<32x8xf32>, vector<32x8xf32> -> vector<32x8xf32>
    %c1_29 = arith.constant 1 : index
    %c0_30 = arith.constant 0 : index
    %c0_31 = arith.constant 0 : index
    %40 = vector.load %arg5[%c1_29, %c0_30, %c0_31] : memref<3x32x1xf32, #tpu.memory_space<vmem>>, vector<1x32x1xf32>
    %41 = vector.shape_cast %40 : vector<1x32x1xf32> to vector<32x1xf32>
    %42 = vector.broadcast %41 : vector<32x1xf32> to vector<32x8xf32>
    %43 = arith.addf %39, %42 : vector<32x8xf32>
    %cst_32 = arith.constant 0.000000e+00 : f32
    %44 = vector.broadcast %cst_32 : f32 to vector<32x8xf32>
    %45 = arith.cmpf ogt, %43, %44 : vector<32x8xf32>
    %cst_33 = arith.constant 1.000000e-01 : f32
    %46 = vector.broadcast %cst_33 : f32 to vector<32x8xf32>
    %47 = arith.mulf %46, %43 : vector<32x8xf32>
    %48 = arith.select %45, %43, %47 : vector<32x8xi1>, vector<32x8xf32>
    %c1_34 = arith.constant 1 : index
    %c0_35 = arith.constant 0 : index
    %c0_36 = arith.constant 0 : index
    %49 = vector.load %arg6[%c1_34, %c0_35, %c0_36] : memref<3x32x32xf32, #tpu.memory_space<vmem>>, vector<1x32x32xf32>
    %50 = vector.shape_cast %49 : vector<1x32x32xf32> to vector<32x32xf32>
    %cst_37 = arith.constant dense<0.000000e+00> : vector<32x8xf32>
    %51 = tpu.matmul %50, %48, %cst_37 {dimension_numbers = #tpu.dot_dimension_numbers<[1], [0], [0], [1], [0, 0, 1, 1], [], []>} : vector<32x32xf32>, vector<32x8xf32>, vector<32x8xf32> -> vector<32x8xf32>
    %c1_38 = arith.constant 1 : index
    %c0_39 = arith.constant 0 : index
    %c0_40 = arith.constant 0 : index
    %52 = vector.load %arg7[%c1_38, %c0_39, %c0_40] : memref<3x32x1xf32, #tpu.memory_space<vmem>>, vector<1x32x1xf32>
    %53 = vector.shape_cast %52 : vector<1x32x1xf32> to vector<32x1xf32>
    %54 = vector.broadcast %53 : vector<32x1xf32> to vector<32x8xf32>
    %55 = arith.addf %51, %54 : vector<32x8xf32>
    %56 = arith.addf %36, %55 : vector<32x8xf32>
    %cst_41 = arith.constant 0.000000e+00 : f32
    %57 = vector.broadcast %cst_41 : f32 to vector<32x8xf32>
    %58 = arith.cmpf ogt, %56, %57 : vector<32x8xf32>
    %cst_42 = arith.constant 1.000000e-01 : f32
    %59 = vector.broadcast %cst_42 : f32 to vector<32x8xf32>
    %60 = arith.mulf %59, %56 : vector<32x8xf32>
    %61 = arith.select %58, %56, %60 : vector<32x8xi1>, vector<32x8xf32>
    %c2 = arith.constant 2 : index
    %c0_43 = arith.constant 0 : index
    %c0_44 = arith.constant 0 : index
    %62 = vector.load %arg4[%c2, %c0_43, %c0_44] : memref<3x32x32xf32, #tpu.memory_space<vmem>>, vector<1x32x32xf32>
    %63 = vector.shape_cast %62 : vector<1x32x32xf32> to vector<32x32xf32>
    %cst_45 = arith.constant dense<0.000000e+00> : vector<32x8xf32>
    %64 = tpu.matmul %63, %61, %cst_45 {dimension_numbers = #tpu.dot_dimension_numbers<[1], [0], [0], [1], [0, 0, 1, 1], [], []>} : vector<32x32xf32>, vector<32x8xf32>, vector<32x8xf32> -> vector<32x8xf32>
    %c2_46 = arith.constant 2 : index
    %c0_47 = arith.constant 0 : index
    %c0_48 = arith.constant 0 : index
    %65 = vector.load %arg5[%c2_46, %c0_47, %c0_48] : memref<3x32x1xf32, #tpu.memory_space<vmem>>, vector<1x32x1xf32>
    %66 = vector.shape_cast %65 : vector<1x32x1xf32> to vector<32x1xf32>
    %67 = vector.broadcast %66 : vector<32x1xf32> to vector<32x8xf32>
    %68 = arith.addf %64, %67 : vector<32x8xf32>
    %cst_49 = arith.constant 0.000000e+00 : f32
    %69 = vector.broadcast %cst_49 : f32 to vector<32x8xf32>
    %70 = arith.cmpf ogt, %68, %69 : vector<32x8xf32>
    %cst_50 = arith.constant 1.000000e-01 : f32
    %71 = vector.broadcast %cst_50 : f32 to vector<32x8xf32>
    %72 = arith.mulf %71, %68 : vector<32x8xf32>
    %73 = arith.select %70, %68, %72 : vector<32x8xi1>, vector<32x8xf32>
    %c2_51 = arith.constant 2 : index
    %c0_52 = arith.constant 0 : index
    %c0_53 = arith.constant 0 : index
    %74 = vector.load %arg6[%c2_51, %c0_52, %c0_53] : memref<3x32x32xf32, #tpu.memory_space<vmem>>, vector<1x32x32xf32>
    %75 = vector.shape_cast %74 : vector<1x32x32xf32> to vector<32x32xf32>
    %cst_54 = arith.constant dense<0.000000e+00> : vector<32x8xf32>
    %76 = tpu.matmul %75, %73, %cst_54 {dimension_numbers = #tpu.dot_dimension_numbers<[1], [0], [0], [1], [0, 0, 1, 1], [], []>} : vector<32x32xf32>, vector<32x8xf32>, vector<32x8xf32> -> vector<32x8xf32>
    %c2_55 = arith.constant 2 : index
    %c0_56 = arith.constant 0 : index
    %c0_57 = arith.constant 0 : index
    %77 = vector.load %arg7[%c2_55, %c0_56, %c0_57] : memref<3x32x1xf32, #tpu.memory_space<vmem>>, vector<1x32x1xf32>
    %78 = vector.shape_cast %77 : vector<1x32x1xf32> to vector<32x1xf32>
    %79 = vector.broadcast %78 : vector<32x1xf32> to vector<32x8xf32>
    %80 = arith.addf %76, %79 : vector<32x8xf32>
    %81 = arith.addf %61, %80 : vector<32x8xf32>
    %cst_58 = arith.constant 0.000000e+00 : f32
    %82 = vector.broadcast %cst_58 : f32 to vector<32x8xf32>
    %83 = arith.cmpf ogt, %81, %82 : vector<32x8xf32>
    %cst_59 = arith.constant 1.000000e-01 : f32
    %84 = vector.broadcast %cst_59 : f32 to vector<32x8xf32>
    %85 = arith.mulf %84, %81 : vector<32x8xf32>
    %86 = arith.select %83, %81, %85 : vector<32x8xi1>, vector<32x8xf32>
    %c0_60 = arith.constant 0 : index
    %c0_61 = arith.constant 0 : index
    %87 = vector.load %arg8[%c0_60, %c0_61] : memref<32x32xf32, #tpu.memory_space<vmem>>, vector<32x32xf32>
    %cst_62 = arith.constant dense<0.000000e+00> : vector<32x8xf32>
    %88 = tpu.matmul %87, %86, %cst_62 {dimension_numbers = #tpu.dot_dimension_numbers<[1], [0], [0], [1], [0, 0, 1, 1], [], []>} : vector<32x32xf32>, vector<32x8xf32>, vector<32x8xf32> -> vector<32x8xf32>
    %c0_63 = arith.constant 0 : index
    %c0_64 = arith.constant 0 : index
    %89 = vector.load %arg9[%c0_63, %c0_64] : memref<32x1xf32, #tpu.memory_space<vmem>>, vector<32x1xf32>
    %90 = vector.broadcast %89 : vector<32x1xf32> to vector<32x8xf32>
    %91 = arith.addf %88, %90 : vector<32x8xf32>
    %cst_65 = arith.constant 0.000000e+00 : f32
    %92 = vector.broadcast %cst_65 : f32 to vector<32x8xf32>
    %93 = arith.maximumf %91, %92 : vector<32x8xf32>
    %c0_66 = arith.constant 0 : index
    %c0_67 = arith.constant 0 : index
    %94 = vector.load %arg11[%c0_66, %c0_67] : memref<1x32xf32, #tpu.memory_space<vmem>>, vector<1x32xf32>
    %95 = vector.extract_strided_slice %93 {offsets = [0, 0], sizes = [1, 8], strides = [1, 1]} : vector<32x8xf32> to vector<1x8xf32>
    %c0_68 = arith.constant 0 : index
    %c0_69 = arith.constant 0 : index
    %c0_70 = arith.constant 0 : index
    %96 = vector.load %arg10[%c0_68, %c0_69, %c0_70] : memref<32x8x32xf32, #tpu.memory_space<vmem>>, vector<1x8x32xf32>
    %97 = vector.shape_cast %96 : vector<1x8x32xf32> to vector<8x32xf32>
    %cst_71 = arith.constant dense<0.000000e+00> : vector<1x32xf32>
    %98 = tpu.matmul %95, %97, %cst_71 {dimension_numbers = #tpu.dot_dimension_numbers<[1], [0], [0], [1], [0, 0, 1, 1], [], []>} : vector<1x8xf32>, vector<8x32xf32>, vector<1x32xf32> -> vector<1x32xf32>
    %99 = arith.addf %94, %98 : vector<1x32xf32>
    %100 = vector.extract_strided_slice %93 {offsets = [1, 0], sizes = [1, 8], strides = [1, 1]} : vector<32x8xf32> to vector<1x8xf32>
    %c1_72 = arith.constant 1 : index
    %c0_73 = arith.constant 0 : index
    %c0_74 = arith.constant 0 : index
    %101 = vector.load %arg10[%c1_72, %c0_73, %c0_74] : memref<32x8x32xf32, #tpu.memory_space<vmem>>, vector<1x8x32xf32>
    %102 = vector.shape_cast %101 : vector<1x8x32xf32> to vector<8x32xf32>
    %cst_75 = arith.constant dense<0.000000e+00> : vector<1x32xf32>
    %103 = tpu.matmul %100, %102, %cst_75 {dimension_numbers = #tpu.dot_dimension_numbers<[1], [0], [0], [1], [0, 0, 1, 1], [], []>} : vector<1x8xf32>, vector<8x32xf32>, vector<1x32xf32> -> vector<1x32xf32>
    %104 = arith.addf %99, %103 : vector<1x32xf32>
    %105 = vector.extract_strided_slice %93 {offsets = [2, 0], sizes = [1, 8], strides = [1, 1]} : vector<32x8xf32> to vector<1x8xf32>
    %c2_76 = arith.constant 2 : index
    %c0_77 = arith.constant 0 : index
    %c0_78 = arith.constant 0 : index
    %106 = vector.load %arg10[%c2_76, %c0_77, %c0_78] : memref<32x8x32xf32, #tpu.memory_space<vmem>>, vector<1x8x32xf32>
    %107 = vector.shape_cast %106 : vector<1x8x32xf32> to vector<8x32xf32>
    %cst_79 = arith.constant dense<0.000000e+00> : vector<1x32xf32>
    %108 = tpu.matmul %105, %107, %cst_79 {dimension_numbers = #tpu.dot_dimension_numbers<[1], [0], [0], [1], [0, 0, 1, 1], [], []>} : vector<1x8xf32>, vector<8x32xf32>, vector<1x32xf32> -> vector<1x32xf32>
    %109 = arith.addf %104, %108 : vector<1x32xf32>
    %110 = vector.extract_strided_slice %93 {offsets = [3, 0], sizes = [1, 8], strides = [1, 1]} : vector<32x8xf32> to vector<1x8xf32>
    %c3 = arith.constant 3 : index
    %c0_80 = arith.constant 0 : index
    %c0_81 = arith.constant 0 : index
    %111 = vector.load %arg10[%c3, %c0_80, %c0_81] : memref<32x8x32xf32, #tpu.memory_space<vmem>>, vector<1x8x32xf32>
    %112 = vector.shape_cast %111 : vector<1x8x32xf32> to vector<8x32xf32>
    %cst_82 = arith.constant dense<0.000000e+00> : vector<1x32xf32>
    %113 = tpu.matmul %110, %112, %cst_82 {dimension_numbers = #tpu.dot_dimension_numbers<[1], [0], [0], [1], [0, 0, 1, 1], [], []>} : vector<1x8xf32>, vector<8x32xf32>, vector<1x32xf32> -> vector<1x32xf32>
    %114 = arith.addf %109, %113 : vector<1x32xf32>
    %115 = vector.extract_strided_slice %93 {offsets = [4, 0], sizes = [1, 8], strides = [1, 1]} : vector<32x8xf32> to vector<1x8xf32>
    %c4 = arith.constant 4 : index
    %c0_83 = arith.constant 0 : index
    %c0_84 = arith.constant 0 : index
    %116 = vector.load %arg10[%c4, %c0_83, %c0_84] : memref<32x8x32xf32, #tpu.memory_space<vmem>>, vector<1x8x32xf32>
    %117 = vector.shape_cast %116 : vector<1x8x32xf32> to vector<8x32xf32>
    %cst_85 = arith.constant dense<0.000000e+00> : vector<1x32xf32>
    %118 = tpu.matmul %115, %117, %cst_85 {dimension_numbers = #tpu.dot_dimension_numbers<[1], [0], [0], [1], [0, 0, 1, 1], [], []>} : vector<1x8xf32>, vector<8x32xf32>, vector<1x32xf32> -> vector<1x32xf32>
    %119 = arith.addf %114, %118 : vector<1x32xf32>
    %120 = vector.extract_strided_slice %93 {offsets = [5, 0], sizes = [1, 8], strides = [1, 1]} : vector<32x8xf32> to vector<1x8xf32>
    %c5 = arith.constant 5 : index
    %c0_86 = arith.constant 0 : index
    %c0_87 = arith.constant 0 : index
    %121 = vector.load %arg10[%c5, %c0_86, %c0_87] : memref<32x8x32xf32, #tpu.memory_space<vmem>>, vector<1x8x32xf32>
    %122 = vector.shape_cast %121 : vector<1x8x32xf32> to vector<8x32xf32>
    %cst_88 = arith.constant dense<0.000000e+00> : vector<1x32xf32>
    %123 = tpu.matmul %120, %122, %cst_88 {dimension_numbers = #tpu.dot_dimension_numbers<[1], [0], [0], [1], [0, 0, 1, 1], [], []>} : vector<1x8xf32>, vector<8x32xf32>, vector<1x32xf32> -> vector<1x32xf32>
    %124 = arith.addf %119, %123 : vector<1x32xf32>
    %125 = vector.extract_strided_slice %93 {offsets = [6, 0], sizes = [1, 8], strides = [1, 1]} : vector<32x8xf32> to vector<1x8xf32>
    %c6 = arith.constant 6 : index
    %c0_89 = arith.constant 0 : index
    %c0_90 = arith.constant 0 : index
    %126 = vector.load %arg10[%c6, %c0_89, %c0_90] : memref<32x8x32xf32, #tpu.memory_space<vmem>>, vector<1x8x32xf32>
    %127 = vector.shape_cast %126 : vector<1x8x32xf32> to vector<8x32xf32>
    %cst_91 = arith.constant dense<0.000000e+00> : vector<1x32xf32>
    %128 = tpu.matmul %125, %127, %cst_91 {dimension_numbers = #tpu.dot_dimension_numbers<[1], [0], [0], [1], [0, 0, 1, 1], [], []>} : vector<1x8xf32>, vector<8x32xf32>, vector<1x32xf32> -> vector<1x32xf32>
    %129 = arith.addf %124, %128 : vector<1x32xf32>
    %130 = vector.extract_strided_slice %93 {offsets = [7, 0], sizes = [1, 8], strides = [1, 1]} : vector<32x8xf32> to vector<1x8xf32>
    %c7 = arith.constant 7 : index
    %c0_92 = arith.constant 0 : index
    %c0_93 = arith.constant 0 : index
    %131 = vector.load %arg10[%c7, %c0_92, %c0_93] : memref<32x8x32xf32, #tpu.memory_space<vmem>>, vector<1x8x32xf32>
    %132 = vector.shape_cast %131 : vector<1x8x32xf32> to vector<8x32xf32>
    %cst_94 = arith.constant dense<0.000000e+00> : vector<1x32xf32>
    %133 = tpu.matmul %130, %132, %cst_94 {dimension_numbers = #tpu.dot_dimension_numbers<[1], [0], [0], [1], [0, 0, 1, 1], [], []>} : vector<1x8xf32>, vector<8x32xf32>, vector<1x32xf32> -> vector<1x32xf32>
    %134 = arith.addf %129, %133 : vector<1x32xf32>
    %135 = vector.extract_strided_slice %93 {offsets = [8, 0], sizes = [1, 8], strides = [1, 1]} : vector<32x8xf32> to vector<1x8xf32>
    %c8 = arith.constant 8 : index
    %c0_95 = arith.constant 0 : index
    %c0_96 = arith.constant 0 : index
    %136 = vector.load %arg10[%c8, %c0_95, %c0_96] : memref<32x8x32xf32, #tpu.memory_space<vmem>>, vector<1x8x32xf32>
    %137 = vector.shape_cast %136 : vector<1x8x32xf32> to vector<8x32xf32>
    %cst_97 = arith.constant dense<0.000000e+00> : vector<1x32xf32>
    %138 = tpu.matmul %135, %137, %cst_97 {dimension_numbers = #tpu.dot_dimension_numbers<[1], [0], [0], [1], [0, 0, 1, 1], [], []>} : vector<1x8xf32>, vector<8x32xf32>, vector<1x32xf32> -> vector<1x32xf32>
    %139 = arith.addf %134, %138 : vector<1x32xf32>
    %140 = vector.extract_strided_slice %93 {offsets = [9, 0], sizes = [1, 8], strides = [1, 1]} : vector<32x8xf32> to vector<1x8xf32>
    %c9 = arith.constant 9 : index
    %c0_98 = arith.constant 0 : index
    %c0_99 = arith.constant 0 : index
    %141 = vector.load %arg10[%c9, %c0_98, %c0_99] : memref<32x8x32xf32, #tpu.memory_space<vmem>>, vector<1x8x32xf32>
    %142 = vector.shape_cast %141 : vector<1x8x32xf32> to vector<8x32xf32>
    %cst_100 = arith.constant dense<0.000000e+00> : vector<1x32xf32>
    %143 = tpu.matmul %140, %142, %cst_100 {dimension_numbers = #tpu.dot_dimension_numbers<[1], [0], [0], [1], [0, 0, 1, 1], [], []>} : vector<1x8xf32>, vector<8x32xf32>, vector<1x32xf32> -> vector<1x32xf32>
    %144 = arith.addf %139, %143 : vector<1x32xf32>
    %145 = vector.extract_strided_slice %93 {offsets = [10, 0], sizes = [1, 8], strides = [1, 1]} : vector<32x8xf32> to vector<1x8xf32>
    %c10 = arith.constant 10 : index
    %c0_101 = arith.constant 0 : index
    %c0_102 = arith.constant 0 : index
    %146 = vector.load %arg10[%c10, %c0_101, %c0_102] : memref<32x8x32xf32, #tpu.memory_space<vmem>>, vector<1x8x32xf32>
    %147 = vector.shape_cast %146 : vector<1x8x32xf32> to vector<8x32xf32>
    %cst_103 = arith.constant dense<0.000000e+00> : vector<1x32xf32>
    %148 = tpu.matmul %145, %147, %cst_103 {dimension_numbers = #tpu.dot_dimension_numbers<[1], [0], [0], [1], [0, 0, 1, 1], [], []>} : vector<1x8xf32>, vector<8x32xf32>, vector<1x32xf32> -> vector<1x32xf32>
    %149 = arith.addf %144, %148 : vector<1x32xf32>
    %150 = vector.extract_strided_slice %93 {offsets = [11, 0], sizes = [1, 8], strides = [1, 1]} : vector<32x8xf32> to vector<1x8xf32>
    %c11 = arith.constant 11 : index
    %c0_104 = arith.constant 0 : index
    %c0_105 = arith.constant 0 : index
    %151 = vector.load %arg10[%c11, %c0_104, %c0_105] : memref<32x8x32xf32, #tpu.memory_space<vmem>>, vector<1x8x32xf32>
    %152 = vector.shape_cast %151 : vector<1x8x32xf32> to vector<8x32xf32>
    %cst_106 = arith.constant dense<0.000000e+00> : vector<1x32xf32>
    %153 = tpu.matmul %150, %152, %cst_106 {dimension_numbers = #tpu.dot_dimension_numbers<[1], [0], [0], [1], [0, 0, 1, 1], [], []>} : vector<1x8xf32>, vector<8x32xf32>, vector<1x32xf32> -> vector<1x32xf32>
    %154 = arith.addf %149, %153 : vector<1x32xf32>
    %155 = vector.extract_strided_slice %93 {offsets = [12, 0], sizes = [1, 8], strides = [1, 1]} : vector<32x8xf32> to vector<1x8xf32>
    %c12 = arith.constant 12 : index
    %c0_107 = arith.constant 0 : index
    %c0_108 = arith.constant 0 : index
    %156 = vector.load %arg10[%c12, %c0_107, %c0_108] : memref<32x8x32xf32, #tpu.memory_space<vmem>>, vector<1x8x32xf32>
    %157 = vector.shape_cast %156 : vector<1x8x32xf32> to vector<8x32xf32>
    %cst_109 = arith.constant dense<0.000000e+00> : vector<1x32xf32>
    %158 = tpu.matmul %155, %157, %cst_109 {dimension_numbers = #tpu.dot_dimension_numbers<[1], [0], [0], [1], [0, 0, 1, 1], [], []>} : vector<1x8xf32>, vector<8x32xf32>, vector<1x32xf32> -> vector<1x32xf32>
    %159 = arith.addf %154, %158 : vector<1x32xf32>
    %160 = vector.extract_strided_slice %93 {offsets = [13, 0], sizes = [1, 8], strides = [1, 1]} : vector<32x8xf32> to vector<1x8xf32>
    %c13 = arith.constant 13 : index
    %c0_110 = arith.constant 0 : index
    %c0_111 = arith.constant 0 : index
    %161 = vector.load %arg10[%c13, %c0_110, %c0_111] : memref<32x8x32xf32, #tpu.memory_space<vmem>>, vector<1x8x32xf32>
    %162 = vector.shape_cast %161 : vector<1x8x32xf32> to vector<8x32xf32>
    %cst_112 = arith.constant dense<0.000000e+00> : vector<1x32xf32>
    %163 = tpu.matmul %160, %162, %cst_112 {dimension_numbers = #tpu.dot_dimension_numbers<[1], [0], [0], [1], [0, 0, 1, 1], [], []>} : vector<1x8xf32>, vector<8x32xf32>, vector<1x32xf32> -> vector<1x32xf32>
    %164 = arith.addf %159, %163 : vector<1x32xf32>
    %165 = vector.extract_strided_slice %93 {offsets = [14, 0], sizes = [1, 8], strides = [1, 1]} : vector<32x8xf32> to vector<1x8xf32>
    %c14 = arith.constant 14 : index
    %c0_113 = arith.constant 0 : index
    %c0_114 = arith.constant 0 : index
    %166 = vector.load %arg10[%c14, %c0_113, %c0_114] : memref<32x8x32xf32, #tpu.memory_space<vmem>>, vector<1x8x32xf32>
    %167 = vector.shape_cast %166 : vector<1x8x32xf32> to vector<8x32xf32>
    %cst_115 = arith.constant dense<0.000000e+00> : vector<1x32xf32>
    %168 = tpu.matmul %165, %167, %cst_115 {dimension_numbers = #tpu.dot_dimension_numbers<[1], [0], [0], [1], [0, 0, 1, 1], [], []>} : vector<1x8xf32>, vector<8x32xf32>, vector<1x32xf32> -> vector<1x32xf32>
    %169 = arith.addf %164, %168 : vector<1x32xf32>
    %170 = vector.extract_strided_slice %93 {offsets = [15, 0], sizes = [1, 8], strides = [1, 1]} : vector<32x8xf32> to vector<1x8xf32>
    %c15 = arith.constant 15 : index
    %c0_116 = arith.constant 0 : index
    %c0_117 = arith.constant 0 : index
    %171 = vector.load %arg10[%c15, %c0_116, %c0_117] : memref<32x8x32xf32, #tpu.memory_space<vmem>>, vector<1x8x32xf32>
    %172 = vector.shape_cast %171 : vector<1x8x32xf32> to vector<8x32xf32>
    %cst_118 = arith.constant dense<0.000000e+00> : vector<1x32xf32>
    %173 = tpu.matmul %170, %172, %cst_118 {dimension_numbers = #tpu.dot_dimension_numbers<[1], [0], [0], [1], [0, 0, 1, 1], [], []>} : vector<1x8xf32>, vector<8x32xf32>, vector<1x32xf32> -> vector<1x32xf32>
    %174 = arith.addf %169, %173 : vector<1x32xf32>
    %175 = vector.extract_strided_slice %93 {offsets = [16, 0], sizes = [1, 8], strides = [1, 1]} : vector<32x8xf32> to vector<1x8xf32>
    %c16 = arith.constant 16 : index
    %c0_119 = arith.constant 0 : index
    %c0_120 = arith.constant 0 : index
    %176 = vector.load %arg10[%c16, %c0_119, %c0_120] : memref<32x8x32xf32, #tpu.memory_space<vmem>>, vector<1x8x32xf32>
    %177 = vector.shape_cast %176 : vector<1x8x32xf32> to vector<8x32xf32>
    %cst_121 = arith.constant dense<0.000000e+00> : vector<1x32xf32>
    %178 = tpu.matmul %175, %177, %cst_121 {dimension_numbers = #tpu.dot_dimension_numbers<[1], [0], [0], [1], [0, 0, 1, 1], [], []>} : vector<1x8xf32>, vector<8x32xf32>, vector<1x32xf32> -> vector<1x32xf32>
    %179 = arith.addf %174, %178 : vector<1x32xf32>
    %180 = vector.extract_strided_slice %93 {offsets = [17, 0], sizes = [1, 8], strides = [1, 1]} : vector<32x8xf32> to vector<1x8xf32>
    %c17 = arith.constant 17 : index
    %c0_122 = arith.constant 0 : index
    %c0_123 = arith.constant 0 : index
    %181 = vector.load %arg10[%c17, %c0_122, %c0_123] : memref<32x8x32xf32, #tpu.memory_space<vmem>>, vector<1x8x32xf32>
    %182 = vector.shape_cast %181 : vector<1x8x32xf32> to vector<8x32xf32>
    %cst_124 = arith.constant dense<0.000000e+00> : vector<1x32xf32>
    %183 = tpu.matmul %180, %182, %cst_124 {dimension_numbers = #tpu.dot_dimension_numbers<[1], [0], [0], [1], [0, 0, 1, 1], [], []>} : vector<1x8xf32>, vector<8x32xf32>, vector<1x32xf32> -> vector<1x32xf32>
    %184 = arith.addf %179, %183 : vector<1x32xf32>
    %185 = vector.extract_strided_slice %93 {offsets = [18, 0], sizes = [1, 8], strides = [1, 1]} : vector<32x8xf32> to vector<1x8xf32>
    %c18 = arith.constant 18 : index
    %c0_125 = arith.constant 0 : index
    %c0_126 = arith.constant 0 : index
    %186 = vector.load %arg10[%c18, %c0_125, %c0_126] : memref<32x8x32xf32, #tpu.memory_space<vmem>>, vector<1x8x32xf32>
    %187 = vector.shape_cast %186 : vector<1x8x32xf32> to vector<8x32xf32>
    %cst_127 = arith.constant dense<0.000000e+00> : vector<1x32xf32>
    %188 = tpu.matmul %185, %187, %cst_127 {dimension_numbers = #tpu.dot_dimension_numbers<[1], [0], [0], [1], [0, 0, 1, 1], [], []>} : vector<1x8xf32>, vector<8x32xf32>, vector<1x32xf32> -> vector<1x32xf32>
    %189 = arith.addf %184, %188 : vector<1x32xf32>
    %190 = vector.extract_strided_slice %93 {offsets = [19, 0], sizes = [1, 8], strides = [1, 1]} : vector<32x8xf32> to vector<1x8xf32>
    %c19 = arith.constant 19 : index
    %c0_128 = arith.constant 0 : index
    %c0_129 = arith.constant 0 : index
    %191 = vector.load %arg10[%c19, %c0_128, %c0_129] : memref<32x8x32xf32, #tpu.memory_space<vmem>>, vector<1x8x32xf32>
    %192 = vector.shape_cast %191 : vector<1x8x32xf32> to vector<8x32xf32>
    %cst_130 = arith.constant dense<0.000000e+00> : vector<1x32xf32>
    %193 = tpu.matmul %190, %192, %cst_130 {dimension_numbers = #tpu.dot_dimension_numbers<[1], [0], [0], [1], [0, 0, 1, 1], [], []>} : vector<1x8xf32>, vector<8x32xf32>, vector<1x32xf32> -> vector<1x32xf32>
    %194 = arith.addf %189, %193 : vector<1x32xf32>
    %195 = vector.extract_strided_slice %93 {offsets = [20, 0], sizes = [1, 8], strides = [1, 1]} : vector<32x8xf32> to vector<1x8xf32>
    %c20 = arith.constant 20 : index
    %c0_131 = arith.constant 0 : index
    %c0_132 = arith.constant 0 : index
    %196 = vector.load %arg10[%c20, %c0_131, %c0_132] : memref<32x8x32xf32, #tpu.memory_space<vmem>>, vector<1x8x32xf32>
    %197 = vector.shape_cast %196 : vector<1x8x32xf32> to vector<8x32xf32>
    %cst_133 = arith.constant dense<0.000000e+00> : vector<1x32xf32>
    %198 = tpu.matmul %195, %197, %cst_133 {dimension_numbers = #tpu.dot_dimension_numbers<[1], [0], [0], [1], [0, 0, 1, 1], [], []>} : vector<1x8xf32>, vector<8x32xf32>, vector<1x32xf32> -> vector<1x32xf32>
    %199 = arith.addf %194, %198 : vector<1x32xf32>
    %200 = vector.extract_strided_slice %93 {offsets = [21, 0], sizes = [1, 8], strides = [1, 1]} : vector<32x8xf32> to vector<1x8xf32>
    %c21 = arith.constant 21 : index
    %c0_134 = arith.constant 0 : index
    %c0_135 = arith.constant 0 : index
    %201 = vector.load %arg10[%c21, %c0_134, %c0_135] : memref<32x8x32xf32, #tpu.memory_space<vmem>>, vector<1x8x32xf32>
    %202 = vector.shape_cast %201 : vector<1x8x32xf32> to vector<8x32xf32>
    %cst_136 = arith.constant dense<0.000000e+00> : vector<1x32xf32>
    %203 = tpu.matmul %200, %202, %cst_136 {dimension_numbers = #tpu.dot_dimension_numbers<[1], [0], [0], [1], [0, 0, 1, 1], [], []>} : vector<1x8xf32>, vector<8x32xf32>, vector<1x32xf32> -> vector<1x32xf32>
    %204 = arith.addf %199, %203 : vector<1x32xf32>
    %205 = vector.extract_strided_slice %93 {offsets = [22, 0], sizes = [1, 8], strides = [1, 1]} : vector<32x8xf32> to vector<1x8xf32>
    %c22 = arith.constant 22 : index
    %c0_137 = arith.constant 0 : index
    %c0_138 = arith.constant 0 : index
    %206 = vector.load %arg10[%c22, %c0_137, %c0_138] : memref<32x8x32xf32, #tpu.memory_space<vmem>>, vector<1x8x32xf32>
    %207 = vector.shape_cast %206 : vector<1x8x32xf32> to vector<8x32xf32>
    %cst_139 = arith.constant dense<0.000000e+00> : vector<1x32xf32>
    %208 = tpu.matmul %205, %207, %cst_139 {dimension_numbers = #tpu.dot_dimension_numbers<[1], [0], [0], [1], [0, 0, 1, 1], [], []>} : vector<1x8xf32>, vector<8x32xf32>, vector<1x32xf32> -> vector<1x32xf32>
    %209 = arith.addf %204, %208 : vector<1x32xf32>
    %210 = vector.extract_strided_slice %93 {offsets = [23, 0], sizes = [1, 8], strides = [1, 1]} : vector<32x8xf32> to vector<1x8xf32>
    %c23 = arith.constant 23 : index
    %c0_140 = arith.constant 0 : index
    %c0_141 = arith.constant 0 : index
    %211 = vector.load %arg10[%c23, %c0_140, %c0_141] : memref<32x8x32xf32, #tpu.memory_space<vmem>>, vector<1x8x32xf32>
    %212 = vector.shape_cast %211 : vector<1x8x32xf32> to vector<8x32xf32>
    %cst_142 = arith.constant dense<0.000000e+00> : vector<1x32xf32>
    %213 = tpu.matmul %210, %212, %cst_142 {dimension_numbers = #tpu.dot_dimension_numbers<[1], [0], [0], [1], [0, 0, 1, 1], [], []>} : vector<1x8xf32>, vector<8x32xf32>, vector<1x32xf32> -> vector<1x32xf32>
    %214 = arith.addf %209, %213 : vector<1x32xf32>
    %215 = vector.extract_strided_slice %93 {offsets = [24, 0], sizes = [1, 8], strides = [1, 1]} : vector<32x8xf32> to vector<1x8xf32>
    %c24 = arith.constant 24 : index
    %c0_143 = arith.constant 0 : index
    %c0_144 = arith.constant 0 : index
    %216 = vector.load %arg10[%c24, %c0_143, %c0_144] : memref<32x8x32xf32, #tpu.memory_space<vmem>>, vector<1x8x32xf32>
    %217 = vector.shape_cast %216 : vector<1x8x32xf32> to vector<8x32xf32>
    %cst_145 = arith.constant dense<0.000000e+00> : vector<1x32xf32>
    %218 = tpu.matmul %215, %217, %cst_145 {dimension_numbers = #tpu.dot_dimension_numbers<[1], [0], [0], [1], [0, 0, 1, 1], [], []>} : vector<1x8xf32>, vector<8x32xf32>, vector<1x32xf32> -> vector<1x32xf32>
    %219 = arith.addf %214, %218 : vector<1x32xf32>
    %220 = vector.extract_strided_slice %93 {offsets = [25, 0], sizes = [1, 8], strides = [1, 1]} : vector<32x8xf32> to vector<1x8xf32>
    %c25 = arith.constant 25 : index
    %c0_146 = arith.constant 0 : index
    %c0_147 = arith.constant 0 : index
    %221 = vector.load %arg10[%c25, %c0_146, %c0_147] : memref<32x8x32xf32, #tpu.memory_space<vmem>>, vector<1x8x32xf32>
    %222 = vector.shape_cast %221 : vector<1x8x32xf32> to vector<8x32xf32>
    %cst_148 = arith.constant dense<0.000000e+00> : vector<1x32xf32>
    %223 = tpu.matmul %220, %222, %cst_148 {dimension_numbers = #tpu.dot_dimension_numbers<[1], [0], [0], [1], [0, 0, 1, 1], [], []>} : vector<1x8xf32>, vector<8x32xf32>, vector<1x32xf32> -> vector<1x32xf32>
    %224 = arith.addf %219, %223 : vector<1x32xf32>
    %225 = vector.extract_strided_slice %93 {offsets = [26, 0], sizes = [1, 8], strides = [1, 1]} : vector<32x8xf32> to vector<1x8xf32>
    %c26 = arith.constant 26 : index
    %c0_149 = arith.constant 0 : index
    %c0_150 = arith.constant 0 : index
    %226 = vector.load %arg10[%c26, %c0_149, %c0_150] : memref<32x8x32xf32, #tpu.memory_space<vmem>>, vector<1x8x32xf32>
    %227 = vector.shape_cast %226 : vector<1x8x32xf32> to vector<8x32xf32>
    %cst_151 = arith.constant dense<0.000000e+00> : vector<1x32xf32>
    %228 = tpu.matmul %225, %227, %cst_151 {dimension_numbers = #tpu.dot_dimension_numbers<[1], [0], [0], [1], [0, 0, 1, 1], [], []>} : vector<1x8xf32>, vector<8x32xf32>, vector<1x32xf32> -> vector<1x32xf32>
    %229 = arith.addf %224, %228 : vector<1x32xf32>
    %230 = vector.extract_strided_slice %93 {offsets = [27, 0], sizes = [1, 8], strides = [1, 1]} : vector<32x8xf32> to vector<1x8xf32>
    %c27 = arith.constant 27 : index
    %c0_152 = arith.constant 0 : index
    %c0_153 = arith.constant 0 : index
    %231 = vector.load %arg10[%c27, %c0_152, %c0_153] : memref<32x8x32xf32, #tpu.memory_space<vmem>>, vector<1x8x32xf32>
    %232 = vector.shape_cast %231 : vector<1x8x32xf32> to vector<8x32xf32>
    %cst_154 = arith.constant dense<0.000000e+00> : vector<1x32xf32>
    %233 = tpu.matmul %230, %232, %cst_154 {dimension_numbers = #tpu.dot_dimension_numbers<[1], [0], [0], [1], [0, 0, 1, 1], [], []>} : vector<1x8xf32>, vector<8x32xf32>, vector<1x32xf32> -> vector<1x32xf32>
    %234 = arith.addf %229, %233 : vector<1x32xf32>
    %235 = vector.extract_strided_slice %93 {offsets = [28, 0], sizes = [1, 8], strides = [1, 1]} : vector<32x8xf32> to vector<1x8xf32>
    %c28 = arith.constant 28 : index
    %c0_155 = arith.constant 0 : index
    %c0_156 = arith.constant 0 : index
    %236 = vector.load %arg10[%c28, %c0_155, %c0_156] : memref<32x8x32xf32, #tpu.memory_space<vmem>>, vector<1x8x32xf32>
    %237 = vector.shape_cast %236 : vector<1x8x32xf32> to vector<8x32xf32>
    %cst_157 = arith.constant dense<0.000000e+00> : vector<1x32xf32>
    %238 = tpu.matmul %235, %237, %cst_157 {dimension_numbers = #tpu.dot_dimension_numbers<[1], [0], [0], [1], [0, 0, 1, 1], [], []>} : vector<1x8xf32>, vector<8x32xf32>, vector<1x32xf32> -> vector<1x32xf32>
    %239 = arith.addf %234, %238 : vector<1x32xf32>
    %240 = vector.extract_strided_slice %93 {offsets = [29, 0], sizes = [1, 8], strides = [1, 1]} : vector<32x8xf32> to vector<1x8xf32>
    %c29 = arith.constant 29 : index
    %c0_158 = arith.constant 0 : index
    %c0_159 = arith.constant 0 : index
    %241 = vector.load %arg10[%c29, %c0_158, %c0_159] : memref<32x8x32xf32, #tpu.memory_space<vmem>>, vector<1x8x32xf32>
    %242 = vector.shape_cast %241 : vector<1x8x32xf32> to vector<8x32xf32>
    %cst_160 = arith.constant dense<0.000000e+00> : vector<1x32xf32>
    %243 = tpu.matmul %240, %242, %cst_160 {dimension_numbers = #tpu.dot_dimension_numbers<[1], [0], [0], [1], [0, 0, 1, 1], [], []>} : vector<1x8xf32>, vector<8x32xf32>, vector<1x32xf32> -> vector<1x32xf32>
    %244 = arith.addf %239, %243 : vector<1x32xf32>
    %245 = vector.extract_strided_slice %93 {offsets = [30, 0], sizes = [1, 8], strides = [1, 1]} : vector<32x8xf32> to vector<1x8xf32>
    %c30 = arith.constant 30 : index
    %c0_161 = arith.constant 0 : index
    %c0_162 = arith.constant 0 : index
    %246 = vector.load %arg10[%c30, %c0_161, %c0_162] : memref<32x8x32xf32, #tpu.memory_space<vmem>>, vector<1x8x32xf32>
    %247 = vector.shape_cast %246 : vector<1x8x32xf32> to vector<8x32xf32>
    %cst_163 = arith.constant dense<0.000000e+00> : vector<1x32xf32>
    %248 = tpu.matmul %245, %247, %cst_163 {dimension_numbers = #tpu.dot_dimension_numbers<[1], [0], [0], [1], [0, 0, 1, 1], [], []>} : vector<1x8xf32>, vector<8x32xf32>, vector<1x32xf32> -> vector<1x32xf32>
    %249 = arith.addf %244, %248 : vector<1x32xf32>
    %250 = vector.extract_strided_slice %93 {offsets = [31, 0], sizes = [1, 8], strides = [1, 1]} : vector<32x8xf32> to vector<1x8xf32>
    %c31 = arith.constant 31 : index
    %c0_164 = arith.constant 0 : index
    %c0_165 = arith.constant 0 : index
    %251 = vector.load %arg10[%c31, %c0_164, %c0_165] : memref<32x8x32xf32, #tpu.memory_space<vmem>>, vector<1x8x32xf32>
    %252 = vector.shape_cast %251 : vector<1x8x32xf32> to vector<8x32xf32>
    %cst_166 = arith.constant dense<0.000000e+00> : vector<1x32xf32>
    %253 = tpu.matmul %250, %252, %cst_166 {dimension_numbers = #tpu.dot_dimension_numbers<[1], [0], [0], [1], [0, 0, 1, 1], [], []>} : vector<1x8xf32>, vector<8x32xf32>, vector<1x32xf32> -> vector<1x32xf32>
    %254 = arith.addf %249, %253 : vector<1x32xf32>
    %c0_167 = arith.constant 0 : index
    %c0_168 = arith.constant 0 : index
    %255 = vector.load %arg21[%c0_167, %c0_168] : memref<2x32xf32, #tpu.memory_space<vmem>>, vector<1x32xf32>
    tpu.vector_store %arg21[%c0_167, %c0_168], %254 {strides = array<i32>} : memref<2x32xf32, #tpu.memory_space<vmem>>, vector<1x32xf32>,
    %c1_169 = arith.constant 1 : index
    %c0_170 = arith.constant 0 : index
    %c0_171 = arith.constant 0 : index
    %256 = vector.load %arg1[%c1_169, %c0_170, %c0_171] : memref<2x4x8xf32, #tpu.memory_space<vmem>>, vector<1x4x8xf32>
    %257 = vector.shape_cast %256 : vector<1x4x8xf32> to vector<4x8xf32>
    %c0_172 = arith.constant 0 : index
    %c0_173 = arith.constant 0 : index
    %258 = vector.load %arg2[%c0_172, %c0_173] : memref<32x4xf32, #tpu.memory_space<vmem>>, vector<32x4xf32>
    %cst_174 = arith.constant dense<0.000000e+00> : vector<32x8xf32>
    %259 = tpu.matmul %258, %257, %cst_174 {dimension_numbers = #tpu.dot_dimension_numbers<[1], [0], [0], [1], [0, 0, 1, 1], [], []>} : vector<32x4xf32>, vector<4x8xf32>, vector<32x8xf32> -> vector<32x8xf32>
    %c0_175 = arith.constant 0 : index
    %c0_176 = arith.constant 0 : index
    %260 = vector.load %arg3[%c0_175, %c0_176] : memref<32x1xf32, #tpu.memory_space<vmem>>, vector<32x1xf32>
    %261 = vector.broadcast %260 : vector<32x1xf32> to vector<32x8xf32>
    %262 = arith.addf %259, %261 : vector<32x8xf32>
    %cst_177 = arith.constant 0.000000e+00 : f32
    %263 = vector.broadcast %cst_177 : f32 to vector<32x8xf32>
    %264 = arith.cmpf ogt, %262, %263 : vector<32x8xf32>
    %cst_178 = arith.constant 1.000000e-01 : f32
    %265 = vector.broadcast %cst_178 : f32 to vector<32x8xf32>
    %266 = arith.mulf %265, %262 : vector<32x8xf32>
    %267 = arith.select %264, %262, %266 : vector<32x8xi1>, vector<32x8xf32>
    %c0_179 = arith.constant 0 : index
    %c0_180 = arith.constant 0 : index
    %c0_181 = arith.constant 0 : index
    %268 = vector.load %arg4[%c0_179, %c0_180, %c0_181] : memref<3x32x32xf32, #tpu.memory_space<vmem>>, vector<1x32x32xf32>
    %269 = vector.shape_cast %268 : vector<1x32x32xf32> to vector<32x32xf32>
    %cst_182 = arith.constant dense<0.000000e+00> : vector<32x8xf32>
    %270 = tpu.matmul %269, %267, %cst_182 {dimension_numbers = #tpu.dot_dimension_numbers<[1], [0], [0], [1], [0, 0, 1, 1], [], []>} : vector<32x32xf32>, vector<32x8xf32>, vector<32x8xf32> -> vector<32x8xf32>
    %c0_183 = arith.constant 0 : index
    %c0_184 = arith.constant 0 : index
    %c0_185 = arith.constant 0 : index
    %271 = vector.load %arg5[%c0_183, %c0_184, %c0_185] : memref<3x32x1xf32, #tpu.memory_space<vmem>>, vector<1x32x1xf32>
    %272 = vector.shape_cast %271 : vector<1x32x1xf32> to vector<32x1xf32>
    %273 = vector.broadcast %272 : vector<32x1xf32> to vector<32x8xf32>
    %274 = arith.addf %270, %273 : vector<32x8xf32>
    %cst_186 = arith.constant 0.000000e+00 : f32
    %275 = vector.broadcast %cst_186 : f32 to vector<32x8xf32>
    %276 = arith.cmpf ogt, %274, %275 : vector<32x8xf32>
    %cst_187 = arith.constant 1.000000e-01 : f32
    %277 = vector.broadcast %cst_187 : f32 to vector<32x8xf32>
    %278 = arith.mulf %277, %274 : vector<32x8xf32>
    %279 = arith.select %276, %274, %278 : vector<32x8xi1>, vector<32x8xf32>
    %c0_188 = arith.constant 0 : index
    %c0_189 = arith.constant 0 : index
    %c0_190 = arith.constant 0 : index
    %280 = vector.load %arg6[%c0_188, %c0_189, %c0_190] : memref<3x32x32xf32, #tpu.memory_space<vmem>>, vector<1x32x32xf32>
    %281 = vector.shape_cast %280 : vector<1x32x32xf32> to vector<32x32xf32>
    %cst_191 = arith.constant dense<0.000000e+00> : vector<32x8xf32>
    %282 = tpu.matmul %281, %279, %cst_191 {dimension_numbers = #tpu.dot_dimension_numbers<[1], [0], [0], [1], [0, 0, 1, 1], [], []>} : vector<32x32xf32>, vector<32x8xf32>, vector<32x8xf32> -> vector<32x8xf32>
    %c0_192 = arith.constant 0 : index
    %c0_193 = arith.constant 0 : index
    %c0_194 = arith.constant 0 : index
    %283 = vector.load %arg7[%c0_192, %c0_193, %c0_194] : memref<3x32x1xf32, #tpu.memory_space<vmem>>, vector<1x32x1xf32>
    %284 = vector.shape_cast %283 : vector<1x32x1xf32> to vector<32x1xf32>
    %285 = vector.broadcast %284 : vector<32x1xf32> to vector<32x8xf32>
    %286 = arith.addf %282, %285 : vector<32x8xf32>
    %287 = arith.addf %267, %286 : vector<32x8xf32>
    %cst_195 = arith.constant 0.000000e+00 : f32
    %288 = vector.broadcast %cst_195 : f32 to vector<32x8xf32>
    %289 = arith.cmpf ogt, %287, %288 : vector<32x8xf32>
    %cst_196 = arith.constant 1.000000e-01 : f32
    %290 = vector.broadcast %cst_196 : f32 to vector<32x8xf32>
    %291 = arith.mulf %290, %287 : vector<32x8xf32>
    %292 = arith.select %289, %287, %291 : vector<32x8xi1>, vector<32x8xf32>
    %c1_197 = arith.constant 1 : index
    %c0_198 = arith.constant 0 : index
    %c0_199 = arith.constant 0 : index
    %293 = vector.load %arg4[%c1_197, %c0_198, %c0_199] : memref<3x32x32xf32, #tpu.memory_space<vmem>>, vector<1x32x32xf32>
    %294 = vector.shape_cast %293 : vector<1x32x32xf32> to vector<32x32xf32>
    %cst_200 = arith.constant dense<0.000000e+00> : vector<32x8xf32>
    %295 = tpu.matmul %294, %292, %cst_200 {dimension_numbers = #tpu.dot_dimension_numbers<[1], [0], [0], [1], [0, 0, 1, 1], [], []>} : vector<32x32xf32>, vector<32x8xf32>, vector<32x8xf32> -> vector<32x8xf32>
    %c1_201 = arith.constant 1 : index
    %c0_202 = arith.constant 0 : index
    %c0_203 = arith.constant 0 : index
    %296 = vector.load %arg5[%c1_201, %c0_202, %c0_203] : memref<3x32x1xf32, #tpu.memory_space<vmem>>, vector<1x32x1xf32>
    %297 = vector.shape_cast %296 : vector<1x32x1xf32> to vector<32x1xf32>
    %298 = vector.broadcast %297 : vector<32x1xf32> to vector<32x8xf32>
    %299 = arith.addf %295, %298 : vector<32x8xf32>
    %cst_204 = arith.constant 0.000000e+00 : f32
    %300 = vector.broadcast %cst_204 : f32 to vector<32x8xf32>
    %301 = arith.cmpf ogt, %299, %300 : vector<32x8xf32>
    %cst_205 = arith.constant 1.000000e-01 : f32
    %302 = vector.broadcast %cst_205 : f32 to vector<32x8xf32>
    %303 = arith.mulf %302, %299 : vector<32x8xf32>
    %304 = arith.select %301, %299, %303 : vector<32x8xi1>, vector<32x8xf32>
    %c1_206 = arith.constant 1 : index
    %c0_207 = arith.constant 0 : index
    %c0_208 = arith.constant 0 : index
    %305 = vector.load %arg6[%c1_206, %c0_207, %c0_208] : memref<3x32x32xf32, #tpu.memory_space<vmem>>, vector<1x32x32xf32>
    %306 = vector.shape_cast %305 : vector<1x32x32xf32> to vector<32x32xf32>
    %cst_209 = arith.constant dense<0.000000e+00> : vector<32x8xf32>
    %307 = tpu.matmul %306, %304, %cst_209 {dimension_numbers = #tpu.dot_dimension_numbers<[1], [0], [0], [1], [0, 0, 1, 1], [], []>} : vector<32x32xf32>, vector<32x8xf32>, vector<32x8xf32> -> vector<32x8xf32>
    %c1_210 = arith.constant 1 : index
    %c0_211 = arith.constant 0 : index
    %c0_212 = arith.constant 0 : index
    %308 = vector.load %arg7[%c1_210, %c0_211, %c0_212] : memref<3x32x1xf32, #tpu.memory_space<vmem>>, vector<1x32x1xf32>
    %309 = vector.shape_cast %308 : vector<1x32x1xf32> to vector<32x1xf32>
    %310 = vector.broadcast %309 : vector<32x1xf32> to vector<32x8xf32>
    %311 = arith.addf %307, %310 : vector<32x8xf32>
    %312 = arith.addf %292, %311 : vector<32x8xf32>
    %cst_213 = arith.constant 0.000000e+00 : f32
    %313 = vector.broadcast %cst_213 : f32 to vector<32x8xf32>
    %314 = arith.cmpf ogt, %312, %313 : vector<32x8xf32>
    %cst_214 = arith.constant 1.000000e-01 : f32
    %315 = vector.broadcast %cst_214 : f32 to vector<32x8xf32>
    %316 = arith.mulf %315, %312 : vector<32x8xf32>
    %317 = arith.select %314, %312, %316 : vector<32x8xi1>, vector<32x8xf32>
    %c2_215 = arith.constant 2 : index
    %c0_216 = arith.constant 0 : index
    %c0_217 = arith.constant 0 : index
    %318 = vector.load %arg4[%c2_215, %c0_216, %c0_217] : memref<3x32x32xf32, #tpu.memory_space<vmem>>, vector<1x32x32xf32>
    %319 = vector.shape_cast %318 : vector<1x32x32xf32> to vector<32x32xf32>
    %cst_218 = arith.constant dense<0.000000e+00> : vector<32x8xf32>
    %320 = tpu.matmul %319, %317, %cst_218 {dimension_numbers = #tpu.dot_dimension_numbers<[1], [0], [0], [1], [0, 0, 1, 1], [], []>} : vector<32x32xf32>, vector<32x8xf32>, vector<32x8xf32> -> vector<32x8xf32>
    %c2_219 = arith.constant 2 : index
    %c0_220 = arith.constant 0 : index
    %c0_221 = arith.constant 0 : index
    %321 = vector.load %arg5[%c2_219, %c0_220, %c0_221] : memref<3x32x1xf32, #tpu.memory_space<vmem>>, vector<1x32x1xf32>
    %322 = vector.shape_cast %321 : vector<1x32x1xf32> to vector<32x1xf32>
    %323 = vector.broadcast %322 : vector<32x1xf32> to vector<32x8xf32>
    %324 = arith.addf %320, %323 : vector<32x8xf32>
    %cst_222 = arith.constant 0.000000e+00 : f32
    %325 = vector.broadcast %cst_222 : f32 to vector<32x8xf32>
    %326 = arith.cmpf ogt, %324, %325 : vector<32x8xf32>
    %cst_223 = arith.constant 1.000000e-01 : f32
    %327 = vector.broadcast %cst_223 : f32 to vector<32x8xf32>
    %328 = arith.mulf %327, %324 : vector<32x8xf32>
    %329 = arith.select %326, %324, %328 : vector<32x8xi1>, vector<32x8xf32>
    %c2_224 = arith.constant 2 : index
    %c0_225 = arith.constant 0 : index
    %c0_226 = arith.constant 0 : index
    %330 = vector.load %arg6[%c2_224, %c0_225, %c0_226] : memref<3x32x32xf32, #tpu.memory_space<vmem>>, vector<1x32x32xf32>
    %331 = vector.shape_cast %330 : vector<1x32x32xf32> to vector<32x32xf32>
    %cst_227 = arith.constant dense<0.000000e+00> : vector<32x8xf32>
    %332 = tpu.matmul %331, %329, %cst_227 {dimension_numbers = #tpu.dot_dimension_numbers<[1], [0], [0], [1], [0, 0, 1, 1], [], []>} : vector<32x32xf32>, vector<32x8xf32>, vector<32x8xf32> -> vector<32x8xf32>
    %c2_228 = arith.constant 2 : index
    %c0_229 = arith.constant 0 : index
    %c0_230 = arith.constant 0 : index
    %333 = vector.load %arg7[%c2_228, %c0_229, %c0_230] : memref<3x32x1xf32, #tpu.memory_space<vmem>>, vector<1x32x1xf32>
    %334 = vector.shape_cast %333 : vector<1x32x1xf32> to vector<32x1xf32>
    %335 = vector.broadcast %334 : vector<32x1xf32> to vector<32x8xf32>
    %336 = arith.addf %332, %335 : vector<32x8xf32>
    %337 = arith.addf %317, %336 : vector<32x8xf32>
    %cst_231 = arith.constant 0.000000e+00 : f32
    %338 = vector.broadcast %cst_231 : f32 to vector<32x8xf32>
    %339 = arith.cmpf ogt, %337, %338 : vector<32x8xf32>
    %cst_232 = arith.constant 1.000000e-01 : f32
    %340 = vector.broadcast %cst_232 : f32 to vector<32x8xf32>
    %341 = arith.mulf %340, %337 : vector<32x8xf32>
    %342 = arith.select %339, %337, %341 : vector<32x8xi1>, vector<32x8xf32>
    %c0_233 = arith.constant 0 : index
    %c0_234 = arith.constant 0 : index
    %343 = vector.load %arg8[%c0_233, %c0_234] : memref<32x32xf32, #tpu.memory_space<vmem>>, vector<32x32xf32>
    %cst_235 = arith.constant dense<0.000000e+00> : vector<32x8xf32>
    %344 = tpu.matmul %343, %342, %cst_235 {dimension_numbers = #tpu.dot_dimension_numbers<[1], [0], [0], [1], [0, 0, 1, 1], [], []>} : vector<32x32xf32>, vector<32x8xf32>, vector<32x8xf32> -> vector<32x8xf32>
    %c0_236 = arith.constant 0 : index
    %c0_237 = arith.constant 0 : index
    %345 = vector.load %arg9[%c0_236, %c0_237] : memref<32x1xf32, #tpu.memory_space<vmem>>, vector<32x1xf32>
    %346 = vector.broadcast %345 : vector<32x1xf32> to vector<32x8xf32>
    %347 = arith.addf %344, %346 : vector<32x8xf32>
    %cst_238 = arith.constant 0.000000e+00 : f32
    %348 = vector.broadcast %cst_238 : f32 to vector<32x8xf32>
    %349 = arith.maximumf %347, %348 : vector<32x8xf32>
    %c0_239 = arith.constant 0 : index
    %c0_240 = arith.constant 0 : index
    %350 = vector.load %arg11[%c0_239, %c0_240] : memref<1x32xf32, #tpu.memory_space<vmem>>, vector<1x32xf32>
    %351 = vector.extract_strided_slice %349 {offsets = [0, 0], sizes = [1, 8], strides = [1, 1]} : vector<32x8xf32> to vector<1x8xf32>
    %c0_241 = arith.constant 0 : index
    %c0_242 = arith.constant 0 : index
    %c0_243 = arith.constant 0 : index
    %352 = vector.load %arg10[%c0_241, %c0_242, %c0_243] : memref<32x8x32xf32, #tpu.memory_space<vmem>>, vector<1x8x32xf32>
    %353 = vector.shape_cast %352 : vector<1x8x32xf32> to vector<8x32xf32>
    %cst_244 = arith.constant dense<0.000000e+00> : vector<1x32xf32>
    %354 = tpu.matmul %351, %353, %cst_244 {dimension_numbers = #tpu.dot_dimension_numbers<[1], [0], [0], [1], [0, 0, 1, 1], [], []>} : vector<1x8xf32>, vector<8x32xf32>, vector<1x32xf32> -> vector<1x32xf32>
    %355 = arith.addf %350, %354 : vector<1x32xf32>
    %356 = vector.extract_strided_slice %349 {offsets = [1, 0], sizes = [1, 8], strides = [1, 1]} : vector<32x8xf32> to vector<1x8xf32>
    %c1_245 = arith.constant 1 : index
    %c0_246 = arith.constant 0 : index
    %c0_247 = arith.constant 0 : index
    %357 = vector.load %arg10[%c1_245, %c0_246, %c0_247] : memref<32x8x32xf32, #tpu.memory_space<vmem>>, vector<1x8x32xf32>
    %358 = vector.shape_cast %357 : vector<1x8x32xf32> to vector<8x32xf32>
    %cst_248 = arith.constant dense<0.000000e+00> : vector<1x32xf32>
    %359 = tpu.matmul %356, %358, %cst_248 {dimension_numbers = #tpu.dot_dimension_numbers<[1], [0], [0], [1], [0, 0, 1, 1], [], []>} : vector<1x8xf32>, vector<8x32xf32>, vector<1x32xf32> -> vector<1x32xf32>
    %360 = arith.addf %355, %359 : vector<1x32xf32>
    %361 = vector.extract_strided_slice %349 {offsets = [2, 0], sizes = [1, 8], strides = [1, 1]} : vector<32x8xf32> to vector<1x8xf32>
    %c2_249 = arith.constant 2 : index
    %c0_250 = arith.constant 0 : index
    %c0_251 = arith.constant 0 : index
    %362 = vector.load %arg10[%c2_249, %c0_250, %c0_251] : memref<32x8x32xf32, #tpu.memory_space<vmem>>, vector<1x8x32xf32>
    %363 = vector.shape_cast %362 : vector<1x8x32xf32> to vector<8x32xf32>
    %cst_252 = arith.constant dense<0.000000e+00> : vector<1x32xf32>
    %364 = tpu.matmul %361, %363, %cst_252 {dimension_numbers = #tpu.dot_dimension_numbers<[1], [0], [0], [1], [0, 0, 1, 1], [], []>} : vector<1x8xf32>, vector<8x32xf32>, vector<1x32xf32> -> vector<1x32xf32>
    %365 = arith.addf %360, %364 : vector<1x32xf32>
    %366 = vector.extract_strided_slice %349 {offsets = [3, 0], sizes = [1, 8], strides = [1, 1]} : vector<32x8xf32> to vector<1x8xf32>
    %c3_253 = arith.constant 3 : index
    %c0_254 = arith.constant 0 : index
    %c0_255 = arith.constant 0 : index
    %367 = vector.load %arg10[%c3_253, %c0_254, %c0_255] : memref<32x8x32xf32, #tpu.memory_space<vmem>>, vector<1x8x32xf32>
    %368 = vector.shape_cast %367 : vector<1x8x32xf32> to vector<8x32xf32>
    %cst_256 = arith.constant dense<0.000000e+00> : vector<1x32xf32>
    %369 = tpu.matmul %366, %368, %cst_256 {dimension_numbers = #tpu.dot_dimension_numbers<[1], [0], [0], [1], [0, 0, 1, 1], [], []>} : vector<1x8xf32>, vector<8x32xf32>, vector<1x32xf32> -> vector<1x32xf32>
    %370 = arith.addf %365, %369 : vector<1x32xf32>
    %371 = vector.extract_strided_slice %349 {offsets = [4, 0], sizes = [1, 8], strides = [1, 1]} : vector<32x8xf32> to vector<1x8xf32>
    %c4_257 = arith.constant 4 : index
    %c0_258 = arith.constant 0 : index
    %c0_259 = arith.constant 0 : index
    %372 = vector.load %arg10[%c4_257, %c0_258, %c0_259] : memref<32x8x32xf32, #tpu.memory_space<vmem>>, vector<1x8x32xf32>
    %373 = vector.shape_cast %372 : vector<1x8x32xf32> to vector<8x32xf32>
    %cst_260 = arith.constant dense<0.000000e+00> : vector<1x32xf32>
    %374 = tpu.matmul %371, %373, %cst_260 {dimension_numbers = #tpu.dot_dimension_numbers<[1], [0], [0], [1], [0, 0, 1, 1], [], []>} : vector<1x8xf32>, vector<8x32xf32>, vector<1x32xf32> -> vector<1x32xf32>
    %375 = arith.addf %370, %374 : vector<1x32xf32>
    %376 = vector.extract_strided_slice %349 {offsets = [5, 0], sizes = [1, 8], strides = [1, 1]} : vector<32x8xf32> to vector<1x8xf32>
    %c5_261 = arith.constant 5 : index
    %c0_262 = arith.constant 0 : index
    %c0_263 = arith.constant 0 : index
    %377 = vector.load %arg10[%c5_261, %c0_262, %c0_263] : memref<32x8x32xf32, #tpu.memory_space<vmem>>, vector<1x8x32xf32>
    %378 = vector.shape_cast %377 : vector<1x8x32xf32> to vector<8x32xf32>
    %cst_264 = arith.constant dense<0.000000e+00> : vector<1x32xf32>
    %379 = tpu.matmul %376, %378, %cst_264 {dimension_numbers = #tpu.dot_dimension_numbers<[1], [0], [0], [1], [0, 0, 1, 1], [], []>} : vector<1x8xf32>, vector<8x32xf32>, vector<1x32xf32> -> vector<1x32xf32>
    %380 = arith.addf %375, %379 : vector<1x32xf32>
    %381 = vector.extract_strided_slice %349 {offsets = [6, 0], sizes = [1, 8], strides = [1, 1]} : vector<32x8xf32> to vector<1x8xf32>
    %c6_265 = arith.constant 6 : index
    %c0_266 = arith.constant 0 : index
    %c0_267 = arith.constant 0 : index
    %382 = vector.load %arg10[%c6_265, %c0_266, %c0_267] : memref<32x8x32xf32, #tpu.memory_space<vmem>>, vector<1x8x32xf32>
    %383 = vector.shape_cast %382 : vector<1x8x32xf32> to vector<8x32xf32>
    %cst_268 = arith.constant dense<0.000000e+00> : vector<1x32xf32>
    %384 = tpu.matmul %381, %383, %cst_268 {dimension_numbers = #tpu.dot_dimension_numbers<[1], [0], [0], [1], [0, 0, 1, 1], [], []>} : vector<1x8xf32>, vector<8x32xf32>, vector<1x32xf32> -> vector<1x32xf32>
    %385 = arith.addf %380, %384 : vector<1x32xf32>
    %386 = vector.extract_strided_slice %349 {offsets = [7, 0], sizes = [1, 8], strides = [1, 1]} : vector<32x8xf32> to vector<1x8xf32>
    %c7_269 = arith.constant 7 : index
    %c0_270 = arith.constant 0 : index
    %c0_271 = arith.constant 0 : index
    %387 = vector.load %arg10[%c7_269, %c0_270, %c0_271] : memref<32x8x32xf32, #tpu.memory_space<vmem>>, vector<1x8x32xf32>
    %388 = vector.shape_cast %387 : vector<1x8x32xf32> to vector<8x32xf32>
    %cst_272 = arith.constant dense<0.000000e+00> : vector<1x32xf32>
    %389 = tpu.matmul %386, %388, %cst_272 {dimension_numbers = #tpu.dot_dimension_numbers<[1], [0], [0], [1], [0, 0, 1, 1], [], []>} : vector<1x8xf32>, vector<8x32xf32>, vector<1x32xf32> -> vector<1x32xf32>
    %390 = arith.addf %385, %389 : vector<1x32xf32>
    %391 = vector.extract_strided_slice %349 {offsets = [8, 0], sizes = [1, 8], strides = [1, 1]} : vector<32x8xf32> to vector<1x8xf32>
    %c8_273 = arith.constant 8 : index
    %c0_274 = arith.constant 0 : index
    %c0_275 = arith.constant 0 : index
    %392 = vector.load %arg10[%c8_273, %c0_274, %c0_275] : memref<32x8x32xf32, #tpu.memory_space<vmem>>, vector<1x8x32xf32>
    %393 = vector.shape_cast %392 : vector<1x8x32xf32> to vector<8x32xf32>
    %cst_276 = arith.constant dense<0.000000e+00> : vector<1x32xf32>
    %394 = tpu.matmul %391, %393, %cst_276 {dimension_numbers = #tpu.dot_dimension_numbers<[1], [0], [0], [1], [0, 0, 1, 1], [], []>} : vector<1x8xf32>, vector<8x32xf32>, vector<1x32xf32> -> vector<1x32xf32>
    %395 = arith.addf %390, %394 : vector<1x32xf32>
    %396 = vector.extract_strided_slice %349 {offsets = [9, 0], sizes = [1, 8], strides = [1, 1]} : vector<32x8xf32> to vector<1x8xf32>
    %c9_277 = arith.constant 9 : index
    %c0_278 = arith.constant 0 : index
    %c0_279 = arith.constant 0 : index
    %397 = vector.load %arg10[%c9_277, %c0_278, %c0_279] : memref<32x8x32xf32, #tpu.memory_space<vmem>>, vector<1x8x32xf32>
    %398 = vector.shape_cast %397 : vector<1x8x32xf32> to vector<8x32xf32>
    %cst_280 = arith.constant dense<0.000000e+00> : vector<1x32xf32>
    %399 = tpu.matmul %396, %398, %cst_280 {dimension_numbers = #tpu.dot_dimension_numbers<[1], [0], [0], [1], [0, 0, 1, 1], [], []>} : vector<1x8xf32>, vector<8x32xf32>, vector<1x32xf32> -> vector<1x32xf32>
    %400 = arith.addf %395, %399 : vector<1x32xf32>
    %401 = vector.extract_strided_slice %349 {offsets = [10, 0], sizes = [1, 8], strides = [1, 1]} : vector<32x8xf32> to vector<1x8xf32>
    %c10_281 = arith.constant 10 : index
    %c0_282 = arith.constant 0 : index
    %c0_283 = arith.constant 0 : index
    %402 = vector.load %arg10[%c10_281, %c0_282, %c0_283] : memref<32x8x32xf32, #tpu.memory_space<vmem>>, vector<1x8x32xf32>
    %403 = vector.shape_cast %402 : vector<1x8x32xf32> to vector<8x32xf32>
    %cst_284 = arith.constant dense<0.000000e+00> : vector<1x32xf32>
    %404 = tpu.matmul %401, %403, %cst_284 {dimension_numbers = #tpu.dot_dimension_numbers<[1], [0], [0], [1], [0, 0, 1, 1], [], []>} : vector<1x8xf32>, vector<8x32xf32>, vector<1x32xf32> -> vector<1x32xf32>
    %405 = arith.addf %400, %404 : vector<1x32xf32>
    %406 = vector.extract_strided_slice %349 {offsets = [11, 0], sizes = [1, 8], strides = [1, 1]} : vector<32x8xf32> to vector<1x8xf32>
    %c11_285 = arith.constant 11 : index
    %c0_286 = arith.constant 0 : index
    %c0_287 = arith.constant 0 : index
    %407 = vector.load %arg10[%c11_285, %c0_286, %c0_287] : memref<32x8x32xf32, #tpu.memory_space<vmem>>, vector<1x8x32xf32>
    %408 = vector.shape_cast %407 : vector<1x8x32xf32> to vector<8x32xf32>
    %cst_288 = arith.constant dense<0.000000e+00> : vector<1x32xf32>
    %409 = tpu.matmul %406, %408, %cst_288 {dimension_numbers = #tpu.dot_dimension_numbers<[1], [0], [0], [1], [0, 0, 1, 1], [], []>} : vector<1x8xf32>, vector<8x32xf32>, vector<1x32xf32> -> vector<1x32xf32>
    %410 = arith.addf %405, %409 : vector<1x32xf32>
    %411 = vector.extract_strided_slice %349 {offsets = [12, 0], sizes = [1, 8], strides = [1, 1]} : vector<32x8xf32> to vector<1x8xf32>
    %c12_289 = arith.constant 12 : index
    %c0_290 = arith.constant 0 : index
    %c0_291 = arith.constant 0 : index
    %412 = vector.load %arg10[%c12_289, %c0_290, %c0_291] : memref<32x8x32xf32, #tpu.memory_space<vmem>>, vector<1x8x32xf32>
    %413 = vector.shape_cast %412 : vector<1x8x32xf32> to vector<8x32xf32>
    %cst_292 = arith.constant dense<0.000000e+00> : vector<1x32xf32>
    %414 = tpu.matmul %411, %413, %cst_292 {dimension_numbers = #tpu.dot_dimension_numbers<[1], [0], [0], [1], [0, 0, 1, 1], [], []>} : vector<1x8xf32>, vector<8x32xf32>, vector<1x32xf32> -> vector<1x32xf32>
    %415 = arith.addf %410, %414 : vector<1x32xf32>
    %416 = vector.extract_strided_slice %349 {offsets = [13, 0], sizes = [1, 8], strides = [1, 1]} : vector<32x8xf32> to vector<1x8xf32>
    %c13_293 = arith.constant 13 : index
    %c0_294 = arith.constant 0 : index
    %c0_295 = arith.constant 0 : index
    %417 = vector.load %arg10[%c13_293, %c0_294, %c0_295] : memref<32x8x32xf32, #tpu.memory_space<vmem>>, vector<1x8x32xf32>
    %418 = vector.shape_cast %417 : vector<1x8x32xf32> to vector<8x32xf32>
    %cst_296 = arith.constant dense<0.000000e+00> : vector<1x32xf32>
    %419 = tpu.matmul %416, %418, %cst_296 {dimension_numbers = #tpu.dot_dimension_numbers<[1], [0], [0], [1], [0, 0, 1, 1], [], []>} : vector<1x8xf32>, vector<8x32xf32>, vector<1x32xf32> -> vector<1x32xf32>
    %420 = arith.addf %415, %419 : vector<1x32xf32>
    %421 = vector.extract_strided_slice %349 {offsets = [14, 0], sizes = [1, 8], strides = [1, 1]} : vector<32x8xf32> to vector<1x8xf32>
    %c14_297 = arith.constant 14 : index
    %c0_298 = arith.constant 0 : index
    %c0_299 = arith.constant 0 : index
    %422 = vector.load %arg10[%c14_297, %c0_298, %c0_299] : memref<32x8x32xf32, #tpu.memory_space<vmem>>, vector<1x8x32xf32>
    %423 = vector.shape_cast %422 : vector<1x8x32xf32> to vector<8x32xf32>
    %cst_300 = arith.constant dense<0.000000e+00> : vector<1x32xf32>
    %424 = tpu.matmul %421, %423, %cst_300 {dimension_numbers = #tpu.dot_dimension_numbers<[1], [0], [0], [1], [0, 0, 1, 1], [], []>} : vector<1x8xf32>, vector<8x32xf32>, vector<1x32xf32> -> vector<1x32xf32>
    %425 = arith.addf %420, %424 : vector<1x32xf32>
    %426 = vector.extract_strided_slice %349 {offsets = [15, 0], sizes = [1, 8], strides = [1, 1]} : vector<32x8xf32> to vector<1x8xf32>
    %c15_301 = arith.constant 15 : index
    %c0_302 = arith.constant 0 : index
    %c0_303 = arith.constant 0 : index
    %427 = vector.load %arg10[%c15_301, %c0_302, %c0_303] : memref<32x8x32xf32, #tpu.memory_space<vmem>>, vector<1x8x32xf32>
    %428 = vector.shape_cast %427 : vector<1x8x32xf32> to vector<8x32xf32>
    %cst_304 = arith.constant dense<0.000000e+00> : vector<1x32xf32>
    %429 = tpu.matmul %426, %428, %cst_304 {dimension_numbers = #tpu.dot_dimension_numbers<[1], [0], [0], [1], [0, 0, 1, 1], [], []>} : vector<1x8xf32>, vector<8x32xf32>, vector<1x32xf32> -> vector<1x32xf32>
    %430 = arith.addf %425, %429 : vector<1x32xf32>
    %431 = vector.extract_strided_slice %349 {offsets = [16, 0], sizes = [1, 8], strides = [1, 1]} : vector<32x8xf32> to vector<1x8xf32>
    %c16_305 = arith.constant 16 : index
    %c0_306 = arith.constant 0 : index
    %c0_307 = arith.constant 0 : index
    %432 = vector.load %arg10[%c16_305, %c0_306, %c0_307] : memref<32x8x32xf32, #tpu.memory_space<vmem>>, vector<1x8x32xf32>
    %433 = vector.shape_cast %432 : vector<1x8x32xf32> to vector<8x32xf32>
    %cst_308 = arith.constant dense<0.000000e+00> : vector<1x32xf32>
    %434 = tpu.matmul %431, %433, %cst_308 {dimension_numbers = #tpu.dot_dimension_numbers<[1], [0], [0], [1], [0, 0, 1, 1], [], []>} : vector<1x8xf32>, vector<8x32xf32>, vector<1x32xf32> -> vector<1x32xf32>
    %435 = arith.addf %430, %434 : vector<1x32xf32>
    %436 = vector.extract_strided_slice %349 {offsets = [17, 0], sizes = [1, 8], strides = [1, 1]} : vector<32x8xf32> to vector<1x8xf32>
    %c17_309 = arith.constant 17 : index
    %c0_310 = arith.constant 0 : index
    %c0_311 = arith.constant 0 : index
    %437 = vector.load %arg10[%c17_309, %c0_310, %c0_311] : memref<32x8x32xf32, #tpu.memory_space<vmem>>, vector<1x8x32xf32>
    %438 = vector.shape_cast %437 : vector<1x8x32xf32> to vector<8x32xf32>
    %cst_312 = arith.constant dense<0.000000e+00> : vector<1x32xf32>
    %439 = tpu.matmul %436, %438, %cst_312 {dimension_numbers = #tpu.dot_dimension_numbers<[1], [0], [0], [1], [0, 0, 1, 1], [], []>} : vector<1x8xf32>, vector<8x32xf32>, vector<1x32xf32> -> vector<1x32xf32>
    %440 = arith.addf %435, %439 : vector<1x32xf32>
    %441 = vector.extract_strided_slice %349 {offsets = [18, 0], sizes = [1, 8], strides = [1, 1]} : vector<32x8xf32> to vector<1x8xf32>
    %c18_313 = arith.constant 18 : index
    %c0_314 = arith.constant 0 : index
    %c0_315 = arith.constant 0 : index
    %442 = vector.load %arg10[%c18_313, %c0_314, %c0_315] : memref<32x8x32xf32, #tpu.memory_space<vmem>>, vector<1x8x32xf32>
    %443 = vector.shape_cast %442 : vector<1x8x32xf32> to vector<8x32xf32>
    %cst_316 = arith.constant dense<0.000000e+00> : vector<1x32xf32>
    %444 = tpu.matmul %441, %443, %cst_316 {dimension_numbers = #tpu.dot_dimension_numbers<[1], [0], [0], [1], [0, 0, 1, 1], [], []>} : vector<1x8xf32>, vector<8x32xf32>, vector<1x32xf32> -> vector<1x32xf32>
    %445 = arith.addf %440, %444 : vector<1x32xf32>
    %446 = vector.extract_strided_slice %349 {offsets = [19, 0], sizes = [1, 8], strides = [1, 1]} : vector<32x8xf32> to vector<1x8xf32>
    %c19_317 = arith.constant 19 : index
    %c0_318 = arith.constant 0 : index
    %c0_319 = arith.constant 0 : index
    %447 = vector.load %arg10[%c19_317, %c0_318, %c0_319] : memref<32x8x32xf32, #tpu.memory_space<vmem>>, vector<1x8x32xf32>
    %448 = vector.shape_cast %447 : vector<1x8x32xf32> to vector<8x32xf32>
    %cst_320 = arith.constant dense<0.000000e+00> : vector<1x32xf32>
    %449 = tpu.matmul %446, %448, %cst_320 {dimension_numbers = #tpu.dot_dimension_numbers<[1], [0], [0], [1], [0, 0, 1, 1], [], []>} : vector<1x8xf32>, vector<8x32xf32>, vector<1x32xf32> -> vector<1x32xf32>
    %450 = arith.addf %445, %449 : vector<1x32xf32>
    %451 = vector.extract_strided_slice %349 {offsets = [20, 0], sizes = [1, 8], strides = [1, 1]} : vector<32x8xf32> to vector<1x8xf32>
    %c20_321 = arith.constant 20 : index
    %c0_322 = arith.constant 0 : index
    %c0_323 = arith.constant 0 : index
    %452 = vector.load %arg10[%c20_321, %c0_322, %c0_323] : memref<32x8x32xf32, #tpu.memory_space<vmem>>, vector<1x8x32xf32>
    %453 = vector.shape_cast %452 : vector<1x8x32xf32> to vector<8x32xf32>
    %cst_324 = arith.constant dense<0.000000e+00> : vector<1x32xf32>
    %454 = tpu.matmul %451, %453, %cst_324 {dimension_numbers = #tpu.dot_dimension_numbers<[1], [0], [0], [1], [0, 0, 1, 1], [], []>} : vector<1x8xf32>, vector<8x32xf32>, vector<1x32xf32> -> vector<1x32xf32>
    %455 = arith.addf %450, %454 : vector<1x32xf32>
    %456 = vector.extract_strided_slice %349 {offsets = [21, 0], sizes = [1, 8], strides = [1, 1]} : vector<32x8xf32> to vector<1x8xf32>
    %c21_325 = arith.constant 21 : index
    %c0_326 = arith.constant 0 : index
    %c0_327 = arith.constant 0 : index
    %457 = vector.load %arg10[%c21_325, %c0_326, %c0_327] : memref<32x8x32xf32, #tpu.memory_space<vmem>>, vector<1x8x32xf32>
    %458 = vector.shape_cast %457 : vector<1x8x32xf32> to vector<8x32xf32>
    %cst_328 = arith.constant dense<0.000000e+00> : vector<1x32xf32>
    %459 = tpu.matmul %456, %458, %cst_328 {dimension_numbers = #tpu.dot_dimension_numbers<[1], [0], [0], [1], [0, 0, 1, 1], [], []>} : vector<1x8xf32>, vector<8x32xf32>, vector<1x32xf32> -> vector<1x32xf32>
    %460 = arith.addf %455, %459 : vector<1x32xf32>
    %461 = vector.extract_strided_slice %349 {offsets = [22, 0], sizes = [1, 8], strides = [1, 1]} : vector<32x8xf32> to vector<1x8xf32>
    %c22_329 = arith.constant 22 : index
    %c0_330 = arith.constant 0 : index
    %c0_331 = arith.constant 0 : index
    %462 = vector.load %arg10[%c22_329, %c0_330, %c0_331] : memref<32x8x32xf32, #tpu.memory_space<vmem>>, vector<1x8x32xf32>
    %463 = vector.shape_cast %462 : vector<1x8x32xf32> to vector<8x32xf32>
    %cst_332 = arith.constant dense<0.000000e+00> : vector<1x32xf32>
    %464 = tpu.matmul %461, %463, %cst_332 {dimension_numbers = #tpu.dot_dimension_numbers<[1], [0], [0], [1], [0, 0, 1, 1], [], []>} : vector<1x8xf32>, vector<8x32xf32>, vector<1x32xf32> -> vector<1x32xf32>
    %465 = arith.addf %460, %464 : vector<1x32xf32>
    %466 = vector.extract_strided_slice %349 {offsets = [23, 0], sizes = [1, 8], strides = [1, 1]} : vector<32x8xf32> to vector<1x8xf32>
    %c23_333 = arith.constant 23 : index
    %c0_334 = arith.constant 0 : index
    %c0_335 = arith.constant 0 : index
    %467 = vector.load %arg10[%c23_333, %c0_334, %c0_335] : memref<32x8x32xf32, #tpu.memory_space<vmem>>, vector<1x8x32xf32>
    %468 = vector.shape_cast %467 : vector<1x8x32xf32> to vector<8x32xf32>
    %cst_336 = arith.constant dense<0.000000e+00> : vector<1x32xf32>
    %469 = tpu.matmul %466, %468, %cst_336 {dimension_numbers = #tpu.dot_dimension_numbers<[1], [0], [0], [1], [0, 0, 1, 1], [], []>} : vector<1x8xf32>, vector<8x32xf32>, vector<1x32xf32> -> vector<1x32xf32>
    %470 = arith.addf %465, %469 : vector<1x32xf32>
    %471 = vector.extract_strided_slice %349 {offsets = [24, 0], sizes = [1, 8], strides = [1, 1]} : vector<32x8xf32> to vector<1x8xf32>
    %c24_337 = arith.constant 24 : index
    %c0_338 = arith.constant 0 : index
    %c0_339 = arith.constant 0 : index
    %472 = vector.load %arg10[%c24_337, %c0_338, %c0_339] : memref<32x8x32xf32, #tpu.memory_space<vmem>>, vector<1x8x32xf32>
    %473 = vector.shape_cast %472 : vector<1x8x32xf32> to vector<8x32xf32>
    %cst_340 = arith.constant dense<0.000000e+00> : vector<1x32xf32>
    %474 = tpu.matmul %471, %473, %cst_340 {dimension_numbers = #tpu.dot_dimension_numbers<[1], [0], [0], [1], [0, 0, 1, 1], [], []>} : vector<1x8xf32>, vector<8x32xf32>, vector<1x32xf32> -> vector<1x32xf32>
    %475 = arith.addf %470, %474 : vector<1x32xf32>
    %476 = vector.extract_strided_slice %349 {offsets = [25, 0], sizes = [1, 8], strides = [1, 1]} : vector<32x8xf32> to vector<1x8xf32>
    %c25_341 = arith.constant 25 : index
    %c0_342 = arith.constant 0 : index
    %c0_343 = arith.constant 0 : index
    %477 = vector.load %arg10[%c25_341, %c0_342, %c0_343] : memref<32x8x32xf32, #tpu.memory_space<vmem>>, vector<1x8x32xf32>
    %478 = vector.shape_cast %477 : vector<1x8x32xf32> to vector<8x32xf32>
    %cst_344 = arith.constant dense<0.000000e+00> : vector<1x32xf32>
    %479 = tpu.matmul %476, %478, %cst_344 {dimension_numbers = #tpu.dot_dimension_numbers<[1], [0], [0], [1], [0, 0, 1, 1], [], []>} : vector<1x8xf32>, vector<8x32xf32>, vector<1x32xf32> -> vector<1x32xf32>
    %480 = arith.addf %475, %479 : vector<1x32xf32>
    %481 = vector.extract_strided_slice %349 {offsets = [26, 0], sizes = [1, 8], strides = [1, 1]} : vector<32x8xf32> to vector<1x8xf32>
    %c26_345 = arith.constant 26 : index
    %c0_346 = arith.constant 0 : index
    %c0_347 = arith.constant 0 : index
    %482 = vector.load %arg10[%c26_345, %c0_346, %c0_347] : memref<32x8x32xf32, #tpu.memory_space<vmem>>, vector<1x8x32xf32>
    %483 = vector.shape_cast %482 : vector<1x8x32xf32> to vector<8x32xf32>
    %cst_348 = arith.constant dense<0.000000e+00> : vector<1x32xf32>
    %484 = tpu.matmul %481, %483, %cst_348 {dimension_numbers = #tpu.dot_dimension_numbers<[1], [0], [0], [1], [0, 0, 1, 1], [], []>} : vector<1x8xf32>, vector<8x32xf32>, vector<1x32xf32> -> vector<1x32xf32>
    %485 = arith.addf %480, %484 : vector<1x32xf32>
    %486 = vector.extract_strided_slice %349 {offsets = [27, 0], sizes = [1, 8], strides = [1, 1]} : vector<32x8xf32> to vector<1x8xf32>
    %c27_349 = arith.constant 27 : index
    %c0_350 = arith.constant 0 : index
    %c0_351 = arith.constant 0 : index
    %487 = vector.load %arg10[%c27_349, %c0_350, %c0_351] : memref<32x8x32xf32, #tpu.memory_space<vmem>>, vector<1x8x32xf32>
    %488 = vector.shape_cast %487 : vector<1x8x32xf32> to vector<8x32xf32>
    %cst_352 = arith.constant dense<0.000000e+00> : vector<1x32xf32>
    %489 = tpu.matmul %486, %488, %cst_352 {dimension_numbers = #tpu.dot_dimension_numbers<[1], [0], [0], [1], [0, 0, 1, 1], [], []>} : vector<1x8xf32>, vector<8x32xf32>, vector<1x32xf32> -> vector<1x32xf32>
    %490 = arith.addf %485, %489 : vector<1x32xf32>
    %491 = vector.extract_strided_slice %349 {offsets = [28, 0], sizes = [1, 8], strides = [1, 1]} : vector<32x8xf32> to vector<1x8xf32>
    %c28_353 = arith.constant 28 : index
    %c0_354 = arith.constant 0 : index
    %c0_355 = arith.constant 0 : index
    %492 = vector.load %arg10[%c28_353, %c0_354, %c0_355] : memref<32x8x32xf32, #tpu.memory_space<vmem>>, vector<1x8x32xf32>
    %493 = vector.shape_cast %492 : vector<1x8x32xf32> to vector<8x32xf32>
    %cst_356 = arith.constant dense<0.000000e+00> : vector<1x32xf32>
    %494 = tpu.matmul %491, %493, %cst_356 {dimension_numbers = #tpu.dot_dimension_numbers<[1], [0], [0], [1], [0, 0, 1, 1], [], []>} : vector<1x8xf32>, vector<8x32xf32>, vector<1x32xf32> -> vector<1x32xf32>
    %495 = arith.addf %490, %494 : vector<1x32xf32>
    %496 = vector.extract_strided_slice %349 {offsets = [29, 0], sizes = [1, 8], strides = [1, 1]} : vector<32x8xf32> to vector<1x8xf32>
    %c29_357 = arith.constant 29 : index
    %c0_358 = arith.constant 0 : index
    %c0_359 = arith.constant 0 : index
    %497 = vector.load %arg10[%c29_357, %c0_358, %c0_359] : memref<32x8x32xf32, #tpu.memory_space<vmem>>, vector<1x8x32xf32>
    %498 = vector.shape_cast %497 : vector<1x8x32xf32> to vector<8x32xf32>
    %cst_360 = arith.constant dense<0.000000e+00> : vector<1x32xf32>
    %499 = tpu.matmul %496, %498, %cst_360 {dimension_numbers = #tpu.dot_dimension_numbers<[1], [0], [0], [1], [0, 0, 1, 1], [], []>} : vector<1x8xf32>, vector<8x32xf32>, vector<1x32xf32> -> vector<1x32xf32>
    %500 = arith.addf %495, %499 : vector<1x32xf32>
    %501 = vector.extract_strided_slice %349 {offsets = [30, 0], sizes = [1, 8], strides = [1, 1]} : vector<32x8xf32> to vector<1x8xf32>
    %c30_361 = arith.constant 30 : index
    %c0_362 = arith.constant 0 : index
    %c0_363 = arith.constant 0 : index
    %502 = vector.load %arg10[%c30_361, %c0_362, %c0_363] : memref<32x8x32xf32, #tpu.memory_space<vmem>>, vector<1x8x32xf32>
    %503 = vector.shape_cast %502 : vector<1x8x32xf32> to vector<8x32xf32>
    %cst_364 = arith.constant dense<0.000000e+00> : vector<1x32xf32>
    %504 = tpu.matmul %501, %503, %cst_364 {dimension_numbers = #tpu.dot_dimension_numbers<[1], [0], [0], [1], [0, 0, 1, 1], [], []>} : vector<1x8xf32>, vector<8x32xf32>, vector<1x32xf32> -> vector<1x32xf32>
    %505 = arith.addf %500, %504 : vector<1x32xf32>
    %506 = vector.extract_strided_slice %349 {offsets = [31, 0], sizes = [1, 8], strides = [1, 1]} : vector<32x8xf32> to vector<1x8xf32>
    %c31_365 = arith.constant 31 : index
    %c0_366 = arith.constant 0 : index
    %c0_367 = arith.constant 0 : index
    %507 = vector.load %arg10[%c31_365, %c0_366, %c0_367] : memref<32x8x32xf32, #tpu.memory_space<vmem>>, vector<1x8x32xf32>
    %508 = vector.shape_cast %507 : vector<1x8x32xf32> to vector<8x32xf32>
    %cst_368 = arith.constant dense<0.000000e+00> : vector<1x32xf32>
    %509 = tpu.matmul %506, %508, %cst_368 {dimension_numbers = #tpu.dot_dimension_numbers<[1], [0], [0], [1], [0, 0, 1, 1], [], []>} : vector<1x8xf32>, vector<8x32xf32>, vector<1x32xf32> -> vector<1x32xf32>
    %510 = arith.addf %505, %509 : vector<1x32xf32>
    %c1_369 = arith.constant 1 : index
    %c0_370 = arith.constant 0 : index
    %511 = vector.load %arg21[%c1_369, %c0_370] : memref<2x32xf32, #tpu.memory_space<vmem>>, vector<1x32xf32>
    tpu.vector_store %arg21[%c1_369, %c0_370], %510 {strides = array<i32>} : memref<2x32xf32, #tpu.memory_space<vmem>>, vector<1x32xf32>,
    %c0_371 = arith.constant 0 : index
    %c0_372 = arith.constant 0 : index
    %512 = vector.load %arg21[%c0_371, %c0_372] : memref<2x32xf32, #tpu.memory_space<vmem>>, vector<2x32xf32>
    %cst_373 = arith.constant 0.000000e+00 : f32
    %513 = vector.broadcast %cst_373 : f32 to vector<2x32xf32>
    %514 = arith.cmpf ogt, %512, %513 : vector<2x32xf32>
    %cst_374 = arith.constant 1.000000e-01 : f32
    %515 = vector.broadcast %cst_374 : f32 to vector<2x32xf32>
    %516 = arith.mulf %515, %512 : vector<2x32xf32>
    %517 = arith.select %514, %512, %516 : vector<2x32xi1>, vector<2x32xf32>
    %c0_375 = arith.constant 0 : index
    %c0_376 = arith.constant 0 : index
    %c0_377 = arith.constant 0 : index
    %518 = vector.load %arg12[%c0_375, %c0_376, %c0_377] : memref<3x32x32xf32, #tpu.memory_space<vmem>>, vector<1x32x32xf32>
    %519 = vector.shape_cast %518 : vector<1x32x32xf32> to vector<32x32xf32>
    %cst_378 = arith.constant dense<0.000000e+00> : vector<2x32xf32>
    %520 = tpu.matmul %517, %519, %cst_378 {dimension_numbers = #tpu.dot_dimension_numbers<[1], [0], [0], [1], [0, 0, 1, 1], [], []>} : vector<2x32xf32>, vector<32x32xf32>, vector<2x32xf32> -> vector<2x32xf32>
    %c0_379 = arith.constant 0 : index
    %c0_380 = arith.constant 0 : index
    %c0_381 = arith.constant 0 : index
    %521 = vector.load %arg13[%c0_379, %c0_380, %c0_381] : memref<3x1x32xf32, #tpu.memory_space<vmem>>, vector<1x1x32xf32>
    %522 = vector.shape_cast %521 : vector<1x1x32xf32> to vector<1x32xf32>
    %523 = vector.broadcast %522 : vector<1x32xf32> to vector<2x32xf32>
    %524 = arith.addf %520, %523 : vector<2x32xf32>
    %cst_382 = arith.constant 0.000000e+00 : f32
    %525 = vector.broadcast %cst_382 : f32 to vector<2x32xf32>
    %526 = arith.cmpf ogt, %524, %525 : vector<2x32xf32>
    %cst_383 = arith.constant 1.000000e-01 : f32
    %527 = vector.broadcast %cst_383 : f32 to vector<2x32xf32>
    %528 = arith.mulf %527, %524 : vector<2x32xf32>
    %529 = arith.select %526, %524, %528 : vector<2x32xi1>, vector<2x32xf32>
    %c0_384 = arith.constant 0 : index
    %c0_385 = arith.constant 0 : index
    %c0_386 = arith.constant 0 : index
    %530 = vector.load %arg14[%c0_384, %c0_385, %c0_386] : memref<3x32x32xf32, #tpu.memory_space<vmem>>, vector<1x32x32xf32>
    %531 = vector.shape_cast %530 : vector<1x32x32xf32> to vector<32x32xf32>
    %cst_387 = arith.constant dense<0.000000e+00> : vector<2x32xf32>
    %532 = tpu.matmul %529, %531, %cst_387 {dimension_numbers = #tpu.dot_dimension_numbers<[1], [0], [0], [1], [0, 0, 1, 1], [], []>} : vector<2x32xf32>, vector<32x32xf32>, vector<2x32xf32> -> vector<2x32xf32>
    %c0_388 = arith.constant 0 : index
    %c0_389 = arith.constant 0 : index
    %c0_390 = arith.constant 0 : index
    %533 = vector.load %arg15[%c0_388, %c0_389, %c0_390] : memref<3x1x32xf32, #tpu.memory_space<vmem>>, vector<1x1x32xf32>
    %534 = vector.shape_cast %533 : vector<1x1x32xf32> to vector<1x32xf32>
    %535 = vector.broadcast %534 : vector<1x32xf32> to vector<2x32xf32>
    %536 = arith.addf %532, %535 : vector<2x32xf32>
    %537 = arith.addf %517, %536 : vector<2x32xf32>
    %cst_391 = arith.constant 0.000000e+00 : f32
    %538 = vector.broadcast %cst_391 : f32 to vector<2x32xf32>
    %539 = arith.cmpf ogt, %537, %538 : vector<2x32xf32>
    %cst_392 = arith.constant 1.000000e-01 : f32
    %540 = vector.broadcast %cst_392 : f32 to vector<2x32xf32>
    %541 = arith.mulf %540, %537 : vector<2x32xf32>
    %542 = arith.select %539, %537, %541 : vector<2x32xi1>, vector<2x32xf32>
    %c1_393 = arith.constant 1 : index
    %c0_394 = arith.constant 0 : index
    %c0_395 = arith.constant 0 : index
    %543 = vector.load %arg12[%c1_393, %c0_394, %c0_395] : memref<3x32x32xf32, #tpu.memory_space<vmem>>, vector<1x32x32xf32>
    %544 = vector.shape_cast %543 : vector<1x32x32xf32> to vector<32x32xf32>
    %cst_396 = arith.constant dense<0.000000e+00> : vector<2x32xf32>
    %545 = tpu.matmul %542, %544, %cst_396 {dimension_numbers = #tpu.dot_dimension_numbers<[1], [0], [0], [1], [0, 0, 1, 1], [], []>} : vector<2x32xf32>, vector<32x32xf32>, vector<2x32xf32> -> vector<2x32xf32>
    %c1_397 = arith.constant 1 : index
    %c0_398 = arith.constant 0 : index
    %c0_399 = arith.constant 0 : index
    %546 = vector.load %arg13[%c1_397, %c0_398, %c0_399] : memref<3x1x32xf32, #tpu.memory_space<vmem>>, vector<1x1x32xf32>
    %547 = vector.shape_cast %546 : vector<1x1x32xf32> to vector<1x32xf32>
    %548 = vector.broadcast %547 : vector<1x32xf32> to vector<2x32xf32>
    %549 = arith.addf %545, %548 : vector<2x32xf32>
    %cst_400 = arith.constant 0.000000e+00 : f32
    %550 = vector.broadcast %cst_400 : f32 to vector<2x32xf32>
    %551 = arith.cmpf ogt, %549, %550 : vector<2x32xf32>
    %cst_401 = arith.constant 1.000000e-01 : f32
    %552 = vector.broadcast %cst_401 : f32 to vector<2x32xf32>
    %553 = arith.mulf %552, %549 : vector<2x32xf32>
    %554 = arith.select %551, %549, %553 : vector<2x32xi1>, vector<2x32xf32>
    %c1_402 = arith.constant 1 : index
    %c0_403 = arith.constant 0 : index
    %c0_404 = arith.constant 0 : index
    %555 = vector.load %arg14[%c1_402, %c0_403, %c0_404] : memref<3x32x32xf32, #tpu.memory_space<vmem>>, vector<1x32x32xf32>
    %556 = vector.shape_cast %555 : vector<1x32x32xf32> to vector<32x32xf32>
    %cst_405 = arith.constant dense<0.000000e+00> : vector<2x32xf32>
    %557 = tpu.matmul %554, %556, %cst_405 {dimension_numbers = #tpu.dot_dimension_numbers<[1], [0], [0], [1], [0, 0, 1, 1], [], []>} : vector<2x32xf32>, vector<32x32xf32>, vector<2x32xf32> -> vector<2x32xf32>
    %c1_406 = arith.constant 1 : index
    %c0_407 = arith.constant 0 : index
    %c0_408 = arith.constant 0 : index
    %558 = vector.load %arg15[%c1_406, %c0_407, %c0_408] : memref<3x1x32xf32, #tpu.memory_space<vmem>>, vector<1x1x32xf32>
    %559 = vector.shape_cast %558 : vector<1x1x32xf32> to vector<1x32xf32>
    %560 = vector.broadcast %559 : vector<1x32xf32> to vector<2x32xf32>
    %561 = arith.addf %557, %560 : vector<2x32xf32>
    %562 = arith.addf %542, %561 : vector<2x32xf32>
    %cst_409 = arith.constant 0.000000e+00 : f32
    %563 = vector.broadcast %cst_409 : f32 to vector<2x32xf32>
    %564 = arith.cmpf ogt, %562, %563 : vector<2x32xf32>
    %cst_410 = arith.constant 1.000000e-01 : f32
    %565 = vector.broadcast %cst_410 : f32 to vector<2x32xf32>
    %566 = arith.mulf %565, %562 : vector<2x32xf32>
    %567 = arith.select %564, %562, %566 : vector<2x32xi1>, vector<2x32xf32>
    %c2_411 = arith.constant 2 : index
    %c0_412 = arith.constant 0 : index
    %c0_413 = arith.constant 0 : index
    %568 = vector.load %arg12[%c2_411, %c0_412, %c0_413] : memref<3x32x32xf32, #tpu.memory_space<vmem>>, vector<1x32x32xf32>
    %569 = vector.shape_cast %568 : vector<1x32x32xf32> to vector<32x32xf32>
    %cst_414 = arith.constant dense<0.000000e+00> : vector<2x32xf32>
    %570 = tpu.matmul %567, %569, %cst_414 {dimension_numbers = #tpu.dot_dimension_numbers<[1], [0], [0], [1], [0, 0, 1, 1], [], []>} : vector<2x32xf32>, vector<32x32xf32>, vector<2x32xf32> -> vector<2x32xf32>
    %c2_415 = arith.constant 2 : index
    %c0_416 = arith.constant 0 : index
    %c0_417 = arith.constant 0 : index
    %571 = vector.load %arg13[%c2_415, %c0_416, %c0_417] : memref<3x1x32xf32, #tpu.memory_space<vmem>>, vector<1x1x32xf32>
    %572 = vector.shape_cast %571 : vector<1x1x32xf32> to vector<1x32xf32>
    %573 = vector.broadcast %572 : vector<1x32xf32> to vector<2x32xf32>
    %574 = arith.addf %570, %573 : vector<2x32xf32>
    %cst_418 = arith.constant 0.000000e+00 : f32
    %575 = vector.broadcast %cst_418 : f32 to vector<2x32xf32>
    %576 = arith.cmpf ogt, %574, %575 : vector<2x32xf32>
    %cst_419 = arith.constant 1.000000e-01 : f32
    %577 = vector.broadcast %cst_419 : f32 to vector<2x32xf32>
    %578 = arith.mulf %577, %574 : vector<2x32xf32>
    %579 = arith.select %576, %574, %578 : vector<2x32xi1>, vector<2x32xf32>
    %c2_420 = arith.constant 2 : index
    %c0_421 = arith.constant 0 : index
    %c0_422 = arith.constant 0 : index
    %580 = vector.load %arg14[%c2_420, %c0_421, %c0_422] : memref<3x32x32xf32, #tpu.memory_space<vmem>>, vector<1x32x32xf32>
    %581 = vector.shape_cast %580 : vector<1x32x32xf32> to vector<32x32xf32>
    %cst_423 = arith.constant dense<0.000000e+00> : vector<2x32xf32>
    %582 = tpu.matmul %579, %581, %cst_423 {dimension_numbers = #tpu.dot_dimension_numbers<[1], [0], [0], [1], [0, 0, 1, 1], [], []>} : vector<2x32xf32>, vector<32x32xf32>, vector<2x32xf32> -> vector<2x32xf32>
    %c2_424 = arith.constant 2 : index
    %c0_425 = arith.constant 0 : index
    %c0_426 = arith.constant 0 : index
    %583 = vector.load %arg15[%c2_424, %c0_425, %c0_426] : memref<3x1x32xf32, #tpu.memory_space<vmem>>, vector<1x1x32xf32>
    %584 = vector.shape_cast %583 : vector<1x1x32xf32> to vector<1x32xf32>
    %585 = vector.broadcast %584 : vector<1x32xf32> to vector<2x32xf32>
    %586 = arith.addf %582, %585 : vector<2x32xf32>
    %587 = arith.addf %567, %586 : vector<2x32xf32>
    %cst_427 = arith.constant 0.000000e+00 : f32
    %588 = vector.broadcast %cst_427 : f32 to vector<2x32xf32>
    %589 = arith.cmpf ogt, %587, %588 : vector<2x32xf32>
    %cst_428 = arith.constant 1.000000e-01 : f32
    %590 = vector.broadcast %cst_428 : f32 to vector<2x32xf32>
    %591 = arith.mulf %590, %587 : vector<2x32xf32>
    %592 = arith.select %589, %587, %591 : vector<2x32xi1>, vector<2x32xf32>
    %c0_429 = arith.constant 0 : index
    %c0_430 = arith.constant 0 : index
    %593 = vector.load %arg16[%c0_429, %c0_430] : memref<32x32xf32, #tpu.memory_space<vmem>>, vector<32x32xf32>
    %cst_431 = arith.constant dense<0.000000e+00> : vector<2x32xf32>
    %594 = tpu.matmul %592, %593, %cst_431 {dimension_numbers = #tpu.dot_dimension_numbers<[1], [0], [0], [1], [0, 0, 1, 1], [], []>} : vector<2x32xf32>, vector<32x32xf32>, vector<2x32xf32> -> vector<2x32xf32>
    %c0_432 = arith.constant 0 : index
    %c0_433 = arith.constant 0 : index
    %595 = vector.load %arg17[%c0_432, %c0_433] : memref<1x32xf32, #tpu.memory_space<vmem>>, vector<1x32xf32>
    %596 = vector.broadcast %595 : vector<1x32xf32> to vector<2x32xf32>
    %597 = arith.addf %594, %596 : vector<2x32xf32>
    %cst_434 = arith.constant 0.000000e+00 : f32
    %598 = vector.broadcast %cst_434 : f32 to vector<2x32xf32>
    %599 = arith.cmpf ogt, %597, %598 : vector<2x32xf32>
    %cst_435 = arith.constant 1.000000e-01 : f32
    %600 = vector.broadcast %cst_435 : f32 to vector<2x32xf32>
    %601 = arith.mulf %600, %597 : vector<2x32xf32>
    %602 = arith.select %599, %597, %601 : vector<2x32xi1>, vector<2x32xf32>
    %c0_436 = arith.constant 0 : index
    %c0_437 = arith.constant 0 : index
    %603 = vector.load %arg18[%c0_436, %c0_437] : memref<32x128xf32, #tpu.memory_space<vmem>>, vector<32x128xf32>
    %cst_438 = arith.constant dense<0.000000e+00> : vector<2x128xf32>
    %604 = tpu.matmul %602, %603, %cst_438 {dimension_numbers = #tpu.dot_dimension_numbers<[1], [0], [0], [1], [0, 0, 1, 1], [], []>} : vector<2x32xf32>, vector<32x128xf32>, vector<2x128xf32> -> vector<2x128xf32>
    %c0_439 = arith.constant 0 : index
    %c0_440 = arith.constant 0 : index
    %605 = vector.load %arg19[%c0_439, %c0_440] : memref<1x128xf32, #tpu.memory_space<vmem>>, vector<1x128xf32>
    %606 = vector.broadcast %605 : vector<1x128xf32> to vector<2x128xf32>
    %607 = arith.addf %604, %606 : vector<2x128xf32>
    %c0_441 = arith.constant 0 : index
    %c0_442 = arith.constant 0 : index
    %608 = vector.load %arg20[%c0_441, %c0_442] : memref<2x128xf32, #tpu.memory_space<vmem>>, vector<2x128xf32>
    tpu.vector_store %arg20[%c0_441, %c0_442], %607 {strides = array<i32>} : memref<2x128xf32, #tpu.memory_space<vmem>>, vector<2x128xf32>,
    return
  }
  func.func @transform_0(%arg0: i32) -> (i32, i32, i32) {
    %c0_i32 = arith.constant 0 : i32
    %c0_i32_0 = arith.constant 0 : i32
    %c0_i32_1 = arith.constant 0 : i32
    return %arg0, %c0_i32, %c0_i32_0 : i32, i32, i32
  }
  func.func @transform_1(%arg0: i32) -> (i32, i32) {
    %c0_i32 = arith.constant 0 : i32
    %c0_i32_0 = arith.constant 0 : i32
    %c0_i32_1 = arith.constant 0 : i32
    return %c0_i32, %c0_i32_0 : i32, i32
  }
  func.func @transform_2(%arg0: i32) -> (i32, i32) {
    %c0_i32 = arith.constant 0 : i32
    %c0_i32_0 = arith.constant 0 : i32
    %c0_i32_1 = arith.constant 0 : i32
    return %c0_i32, %c0_i32_0 : i32, i32
  }
  func.func @transform_3(%arg0: i32) -> (i32, i32, i32) {
    %c0_i32 = arith.constant 0 : i32
    %c0_i32_0 = arith.constant 0 : i32
    %c0_i32_1 = arith.constant 0 : i32
    %c0_i32_2 = arith.constant 0 : i32
    return %c0_i32, %c0_i32_0, %c0_i32_1 : i32, i32, i32
  }
  func.func @transform_4(%arg0: i32) -> (i32, i32, i32) {
    %c0_i32 = arith.constant 0 : i32
    %c0_i32_0 = arith.constant 0 : i32
    %c0_i32_1 = arith.constant 0 : i32
    %c0_i32_2 = arith.constant 0 : i32
    return %c0_i32, %c0_i32_0, %c0_i32_1 : i32, i32, i32
  }
  func.func @transform_5(%arg0: i32) -> (i32, i32, i32) {
    %c0_i32 = arith.constant 0 : i32
    %c0_i32_0 = arith.constant 0 : i32
    %c0_i32_1 = arith.constant 0 : i32
    %c0_i32_2 = arith.constant 0 : i32
    return %c0_i32, %c0_i32_0, %c0_i32_1 : i32, i32, i32
  }
  func.func @transform_6(%arg0: i32) -> (i32, i32, i32) {
    %c0_i32 = arith.constant 0 : i32
    %c0_i32_0 = arith.constant 0 : i32
    %c0_i32_1 = arith.constant 0 : i32
    %c0_i32_2 = arith.constant 0 : i32
    return %c0_i32, %c0_i32_0, %c0_i32_1 : i32, i32, i32
  }
  func.func @transform_7(%arg0: i32) -> (i32, i32) {
    %c0_i32 = arith.constant 0 : i32
    %c0_i32_0 = arith.constant 0 : i32
    %c0_i32_1 = arith.constant 0 : i32
    return %c0_i32, %c0_i32_0 : i32, i32
  }
  func.func @transform_8(%arg0: i32) -> (i32, i32) {
    %c0_i32 = arith.constant 0 : i32
    %c0_i32_0 = arith.constant 0 : i32
    %c0_i32_1 = arith.constant 0 : i32
    return %c0_i32, %c0_i32_0 : i32, i32
  }
  func.func @transform_9(%arg0: i32) -> (i32, i32, i32) {
    %c0_i32 = arith.constant 0 : i32
    %c0_i32_0 = arith.constant 0 : i32
    %c0_i32_1 = arith.constant 0 : i32
    %c0_i32_2 = arith.constant 0 : i32
    return %c0_i32, %c0_i32_0, %c0_i32_1 : i32, i32, i32
  }
  func.func @transform_10(%arg0: i32) -> (i32, i32) {
    %c0_i32 = arith.constant 0 : i32
    %c0_i32_0 = arith.constant 0 : i32
    %c0_i32_1 = arith.constant 0 : i32
    return %c0_i32, %c0_i32_0 : i32, i32
  }
  func.func @transform_11(%arg0: i32) -> (i32, i32, i32) {
    %c0_i32 = arith.constant 0 : i32
    %c0_i32_0 = arith.constant 0 : i32
    %c0_i32_1 = arith.constant 0 : i32
    %c0_i32_2 = arith.constant 0 : i32
    return %c0_i32, %c0_i32_0, %c0_i32_1 : i32, i32, i32
  }
  func.func @transform_12(%arg0: i32) -> (i32, i32, i32) {
    %c0_i32 = arith.constant 0 : i32
    %c0_i32_0 = arith.constant 0 : i32
    %c0_i32_1 = arith.constant 0 : i32
    %c0_i32_2 = arith.constant 0 : i32
    return %c0_i32, %c0_i32_0, %c0_i32_1 : i32, i32, i32
  }
  func.func @transform_13(%arg0: i32) -> (i32, i32, i32) {
    %c0_i32 = arith.constant 0 : i32
    %c0_i32_0 = arith.constant 0 : i32
    %c0_i32_1 = arith.constant 0 : i32
    %c0_i32_2 = arith.constant 0 : i32
    return %c0_i32, %c0_i32_0, %c0_i32_1 : i32, i32, i32
  }
  func.func @transform_14(%arg0: i32) -> (i32, i32, i32) {
    %c0_i32 = arith.constant 0 : i32
    %c0_i32_0 = arith.constant 0 : i32
    %c0_i32_1 = arith.constant 0 : i32
    %c0_i32_2 = arith.constant 0 : i32
    return %c0_i32, %c0_i32_0, %c0_i32_1 : i32, i32, i32
  }
  func.func @transform_15(%arg0: i32) -> (i32, i32) {
    %c0_i32 = arith.constant 0 : i32
    %c0_i32_0 = arith.constant 0 : i32
    %c0_i32_1 = arith.constant 0 : i32
    return %c0_i32, %c0_i32_0 : i32, i32
  }
  func.func @transform_16(%arg0: i32) -> (i32, i32) {
    %c0_i32 = arith.constant 0 : i32
    %c0_i32_0 = arith.constant 0 : i32
    %c0_i32_1 = arith.constant 0 : i32
    return %c0_i32, %c0_i32_0 : i32, i32
  }
  func.func @transform_17(%arg0: i32) -> (i32, i32) {
    %c0_i32 = arith.constant 0 : i32
    %c0_i32_0 = arith.constant 0 : i32
    %c0_i32_1 = arith.constant 0 : i32
    return %c0_i32, %c0_i32_0 : i32, i32
  }
  func.func @transform_18(%arg0: i32) -> (i32, i32) {
    %c0_i32 = arith.constant 0 : i32
    %c0_i32_0 = arith.constant 0 : i32
    %c0_i32_1 = arith.constant 0 : i32
    return %c0_i32, %c0_i32_0 : i32, i32
  }
  func.func @transform_19(%arg0: i32) -> (i32, i32) {
    %c0_i32 = arith.constant 0 : i32
    %c0_i32_0 = arith.constant 0 : i32
    return %arg0, %c0_i32 : i32, i32
  }
}

</mosaic_0001>

<bundles_post_ra>
// kernel: tpu_custom_call.1
= control target key start
LH: loop header
LB: loop body
LE: loop exit
PB: predicated region body
PF: predicated region fallthrough
CT: control target
= control target key end

     0   :  { %s10897_s0 = inlined_call_operand.hbm [shape: f32[2,4,8], index: 0, kind: input, shape index: {}]   ;;  %s10898_s1 = inlined_call_operand.vmem [shape: f32[32,4], index: 1, kind: input, shape index: {}]   ;;  %s10899_s2 = inlined_call_operand.vmem [shape: f32[32,1], index: 2, kind: input, shape index: {}]   ;;  %s10900_s3 = inlined_call_operand.hbm [shape: f32[3,32,32], index: 3, kind: input, shape index: {}]   ;;  %s10901_s4 = inlined_call_operand.vmem [shape: f32[3,32,1], index: 4, kind: input, shape index: {}]   ;;  %s10902_s5 = inlined_call_operand.hbm [shape: f32[3,32,32], index: 5, kind: input, shape index: {}]   ;;  %s10903_s6 = inlined_call_operand.vmem [shape: f32[3,32,1], index: 6, kind: input, shape index: {}]   ;;  %s10904_s7 = inlined_call_operand.vmem [shape: f32[32,32], index: 7, kind: input, shape index: {}]   ;;  %s10905_s8 = inlined_call_operand.vmem [shape: f32[32,1], index: 8, kind: input, shape index: {}]   ;;  %s10906_s9 = inlined_call_operand.vmem [shape: f32[32,8,32], index: 9, kind: input, shape index: {}]   ;;  %s10907_s10 = inlined_call_operand.hbm [shape: f32[1,32], index: 10, kind: input, shape index: {}]   ;;  %s10908_s11 = inlined_call_operand.hbm [shape: f32[3,32,32], index: 11, kind: input, shape index: {}]   ;;  %s10909_s12 = inlined_call_operand.hbm [shape: f32[3,1,32], index: 12, kind: input, shape index: {}]   ;;  %s10910_s13 = inlined_call_operand.hbm [shape: f32[3,32,32], index: 13, kind: input, shape index: {}]   ;;  %s10911_s14 = inlined_call_operand.hbm [shape: f32[3,1,32], index: 14, kind: input, shape index: {}]   ;;  %s10912_s15 = inlined_call_operand.vmem [shape: f32[32,32], index: 15, kind: input, shape index: {}]   ;;  %s10913_s16 = inlined_call_operand.vmem [shape: f32[1,32], index: 16, kind: input, shape index: {}]   ;;  %s10914_s17 = inlined_call_operand.vmem [shape: f32[32,128], index: 17, kind: input, shape index: {}]   ;;  %s10915_s18 = inlined_call_operand.vmem [shape: f32[1,128], index: 18, kind: input, shape index: {}]   ;;  %s10916_s19 = inlined_call_operand.hbm [shape: f32[2,128], index: 19, kind: output, shape index: {}]  }
   0x1   :  { %10947 = sst [smem:[#allocation45_spill]] %s10897_s0 }
   0x2   :  { %10948 = sst [smem:[#allocation46_spill]] %s10898_s1 }
   0x3   :  { %10949 = sst [smem:[#allocation47_spill]] %s10899_s2 }
   0x4   :  { %10950 = sst [smem:[#allocation48_spill]] %s10900_s3 }
   0x5   :  { %10951 = sst [smem:[#allocation49_spill]] %s10915_s18 }
   0x6   :  { %10952 = sst [smem:[#allocation50_spill]] %s10916_s19 }
   0x7   :  { %24 = vsyncpa [#allocation4], 0 }
   0x8   :  { %25 = vsyncpa [#allocation7], 0 }
   0x9   :  { %26 = vsyncpa [#allocation10], 0 }
   0xa   :  { %27 = vsyncpa [#allocation13], 0 }
   0xb   :  { %28 = vsyncpa [#allocation16], 0 }
   0xc   :  { %29 = vsyncpa [#allocation5], 0  ;;  %s9627_s0 = smov [#allocation6]   ;;  %s10953_s1 = sld [smem:[#allocation48_spill]] }
   0xd   :  { %s51_s30 = sshll.u32 %s9627_s0, 4  ;;  %s52_s30 = int_to_ptr.vmem [resolvable:$true] %s51_s30 }
  0x12   :  { %s9417_s22 = scalar_lea.hbm %s10953_s1, 1536 }
  0x13   :  { %p9418_p0 = scmp.ne.s32.totalorder %s10953_s1, %s9417_s22  ;;  %p9421_p1 = scmp.lt.u32.totalorder %s9417_s22, %s10953_s1 }
  0x15   :  { %p9423_p2 = pnand %p9421_p1, %p9418_p0 }
  0x17   :  { %9426 = shalt.err (!%p9423_p2)
}
  0x18   :  { %s9427_s3 = scalar_lea.vmem %s52_s30, 1536  ;;  %p9432_p4 = scmp.lt.s32.totalorder %s52_s30, %s52_s30 }
  0x19   :  { %p9428_p3 = scmp.ne.s32.totalorder %s52_s30, %s9427_s3  ;;  %p9433_p5 = scmp.lt.s32.totalorder %s9427_s3, %s9427_s3 }
  0x1b   :  { %p9434_p6 = por %p9433_p5, %p9432_p4 }
  0x1d   :  { %p9435_p7 = pnand %p9434_p6, %p9428_p3 }
  0x1f   :  { %9438 = shalt.err (!%p9435_p7)
}
  0x20   :  { %s9628_s26 = smov 128   ;;  %s9629_s27 = smov 8  }
  0x21   :  { %57 = dma.hbm_to_vmem [thread:$0]  %s10953_s1, 1536, %s52_s30, [#allocation7], %s9628_s26, %s9628_s26, %s9629_s27  }
  0x22   :  { %s9630_s0 = smov [#allocation9]   ;;  %s9631_s21 = smov [#allocation12]  }
  0x23   :  { %s86_s20 = sshll.u32 %s9630_s0, 4  ;;  %s107_s22 = sshll.u32 %s9631_s21, 4  ;;  %s87_s20 = int_to_ptr.vmem [resolvable:$true] %s86_s20  ;;  %s108_s22 = int_to_ptr.vmem [resolvable:$true] %s107_s22 }
  0x24   :  { %s9439_s24 = scalar_lea.hbm %s10907_s10, 16 }
  0x25   :  { %p9440_p8 = scmp.ne.s32.totalorder %s10907_s10, %s9439_s24  ;;  %p9443_p9 = scmp.lt.u32.totalorder %s9439_s24, %s10907_s10 }
  0x27   :  { %p9445_p10 = pnand %p9443_p9, %p9440_p8 }
  0x29   :  { %9448 = shalt.err (!%p9445_p10)
}
  0x2a   :  { %s9449_s30 = scalar_lea.vmem %s87_s20, 16  ;;  %s9453_s1 = scalar_lea.vmem %s87_s20, 32 }
  0x2b   :  { %p9450_p11 = scmp.ne.s32.totalorder %s87_s20, %s9449_s30  ;;  %p9454_p12 = scmp.lt.s32.totalorder %s87_s20, %s87_s20 }
  0x2c   :  { %p9455_p13 = scmp.lt.s32.totalorder %s9453_s1, %s9449_s30 }
  0x2e   :  { %p9456_p0 = por %p9455_p13, %p9454_p12 }
  0x30   :  { %p9457_p1 = pnand %p9456_p0, %p9450_p11 }
  0x32   :  { %9460 = shalt.err (!%p9457_p1)
}
  0x33   :  { %89 = dma.hbm_to_vmem [thread:$0]  %s10907_s10, 16, %s87_s20, [#allocation10]  }
  0x34   :  { %s9461_s18 = scalar_lea.hbm %s10909_s12, 48 }
  0x35   :  { %p9462_p2 = scmp.ne.s32.totalorder %s10909_s12, %s9461_s18  ;;  %p9465_p3 = scmp.lt.u32.totalorder %s9461_s18, %s10909_s12 }
  0x37   :  { %p9467_p4 = pnand %p9465_p3, %p9462_p2 }
  0x39   :  { %9470 = shalt.err (!%p9467_p4)
}
  0x3a   :  { %s9471_s25 = scalar_lea.vmem %s108_s22, 48  ;;  %s9475_s3 = scalar_lea.vmem %s108_s22, 64 }
  0x3b   :  { %p9472_p5 = scmp.ne.s32.totalorder %s108_s22, %s9471_s25  ;;  %p9476_p6 = scmp.lt.s32.totalorder %s108_s22, %s108_s22 }
  0x3c   :  { %p9477_p7 = scmp.lt.s32.totalorder %s9475_s3, %s9471_s25 }
  0x3e   :  { %p9478_p8 = por %p9477_p7, %p9476_p6 }
  0x40   :  { %p9479_p9 = pnand %p9478_p8, %p9472_p5 }
  0x42   :  { %9482 = shalt.err (!%p9479_p9)
}
  0x43   :  { %s10922_s10 = smov 16   ;;  %s10923_s20 = smov 1  }
  0x44   :  { %113 = dma.hbm_to_vmem [thread:$0]  %s10909_s12, 48, %s108_s22, [#allocation13], %s10922_s10, %s10922_s10, %s10923_s20  }
  0x45   :  { %s9634_s28 = smov [#allocation3]   ;;  %s10954_s18 = sld [smem:[#allocation45_spill]] }
  0x46   :  { %s35_s29 = sshll.u32 %s9634_s28, 4  ;;  %s36_s29 = int_to_ptr.vmem [resolvable:$true] %s35_s29 }
  0x4b   :  { %s9483_s19 = scalar_lea.hbm %s10954_s18, 128 }
  0x4c   :  { %p9484_p10 = scmp.ne.s32.totalorder %s10954_s18, %s9483_s19  ;;  %p9487_p11 = scmp.lt.u32.totalorder %s9483_s19, %s10954_s18 }
  0x4e   :  { %p9489_p12 = pnand %p9487_p11, %p9484_p10 }
  0x50   :  { %9492 = shalt.err (!%p9489_p12)
}
  0x51   :  { %s9493_s3 = scalar_lea.vmem %s36_s29, 128  ;;  %p9498_p0 = scmp.lt.s32.totalorder %s36_s29, %s36_s29 }
  0x52   :  { %p9494_p13 = scmp.ne.s32.totalorder %s36_s29, %s9493_s3  ;;  %p9499_p1 = scmp.lt.s32.totalorder %s9493_s3, %s9493_s3 }
  0x54   :  { %p9500_p2 = por %p9499_p1, %p9498_p0 }
  0x56   :  { %p9501_p3 = pnand %p9500_p2, %p9494_p13 }
  0x58   :  { %9504 = shalt.err (!%p9501_p3)
}
  0x59   :  { %s9635_s12 = smov 64   ;;  %s9636_s22 = smov 4  }
  0x5a   :  { %41 = dma.hbm_to_vmem [thread:$0]  %s10954_s18, 128, %s36_s29, [#allocation4], %s9635_s12, %s9635_s12, %s9636_s22  }
  0x5b   :  { %s9637_s28 = smov [#allocation8]   ;;  %s9638_s21 = smov [#allocation11]  }
  0x5c   :  { %s65_s0 = sshll.u32 %s9637_s28, 4  ;;  %s95_s2 = sshll.u32 %s9638_s21, 4  ;;  %s66_s0 = int_to_ptr.vmem [resolvable:$true] %s65_s0  ;;  %s9800_s2 = int_to_ptr.vmem [resolvable:$true] %s95_s2 }
  0x5d   :  { %s9505_s24 = scalar_lea.hbm %s10902_s5, 1536 }
  0x5e   :  { %p9506_p4 = scmp.ne.s32.totalorder %s10902_s5, %s9505_s24  ;;  %p9509_p5 = scmp.lt.u32.totalorder %s9505_s24, %s10902_s5 }
  0x60   :  { %p9511_p6 = pnand %p9509_p5, %p9506_p4 }
  0x62   :  { %9514 = shalt.err (!%p9511_p6)
}
  0x63   :  { %s9515_s29 = scalar_lea.vmem %s66_s0, 1536  ;;  %p9520_p8 = scmp.lt.s32.totalorder %s66_s0, %s66_s0 }
  0x64   :  { %p9516_p7 = scmp.ne.s32.totalorder %s66_s0, %s9515_s29  ;;  %p9521_p9 = scmp.lt.s32.totalorder %s9515_s29, %s9515_s29 }
  0x66   :  { %p9522_p10 = por %p9521_p9, %p9520_p8 }
  0x68   :  { %p9523_p11 = pnand %p9522_p10, %p9516_p7 }
  0x6a   :  { %9526 = shalt.err (!%p9523_p11)
}
  0x6b   :  { %71 = dma.hbm_to_vmem [thread:$0]  %s10902_s5, 1536, %s66_s0, [#allocation7], %s9628_s26, %s9628_s26, %s9629_s27  }
  0x6c   :  { %s9527_s10 = scalar_lea.hbm %s10908_s11, 1536 }
  0x6d   :  { %p9528_p12 = scmp.ne.s32.totalorder %s10908_s11, %s9527_s10  ;;  %p9531_p13 = scmp.lt.u32.totalorder %s9527_s10, %s10908_s11 }
  0x6f   :  { %p9533_p0 = pnand %p9531_p13, %p9528_p12 }
  0x71   :  { %9536 = shalt.err (!%p9533_p0)
}
  0x72   :  { %s9537_s19 = scalar_lea.vmem %s9800_s2, 1536  ;;  %p9542_p2 = scmp.lt.s32.totalorder %s9800_s2, %s9800_s2 }
  0x73   :  { %p9538_p1 = scmp.ne.s32.totalorder %s9800_s2, %s9537_s19  ;;  %p9543_p3 = scmp.lt.s32.totalorder %s9537_s19, %s9537_s19 }
  0x75   :  { %p9544_p4 = por %p9543_p3, %p9542_p2 }
  0x77   :  { %p9545_p5 = pnand %p9544_p4, %p9538_p1 }
  0x79   :  { %9548 = shalt.err (!%p9545_p5)
}
  0x7a   :  { %101 = dma.hbm_to_vmem [thread:$0]  %s10908_s11, 1536, %s9800_s2, [#allocation10], %s9628_s26, %s9628_s26, %s9629_s27  }
  0x7b   :  { %s9639_s23 = smov [#allocation14]   ;;  %s9640_s25 = smov [#allocation15]  }
  0x7c   :  { %s119_s24 = sshll.u32 %s9639_s23, 4  ;;  %s131_s3 = sshll.u32 %s9640_s25, 4  ;;  %s120_s24 = int_to_ptr.vmem [resolvable:$true] %s119_s24  ;;  %s9837_s3 = int_to_ptr.vmem [resolvable:$true] %s131_s3 }
  0x7d   :  { %s9549_s12 = scalar_lea.hbm %s10910_s13, 1536 }
  0x7e   :  { %p9550_p6 = scmp.ne.s32.totalorder %s10910_s13, %s9549_s12  ;;  %p9553_p7 = scmp.lt.u32.totalorder %s9549_s12, %s10910_s13 }
  0x80   :  { %p9555_p8 = pnand %p9553_p7, %p9550_p6 }
  0x82   :  { %9558 = shalt.err (!%p9555_p8)
}
  0x83   :  { %s9559_s11 = scalar_lea.vmem %s120_s24, 1536  ;;  %p9564_p10 = scmp.lt.s32.totalorder %s120_s24, %s120_s24 }
  0x84   :  { %p9560_p9 = scmp.ne.s32.totalorder %s120_s24, %s9559_s11  ;;  %p9565_p11 = scmp.lt.s32.totalorder %s9559_s11, %s9559_s11 }
  0x86   :  { %p9566_p12 = por %p9565_p11, %p9564_p10 }
  0x88   :  { %p9567_p13 = pnand %p9566_p12, %p9560_p9 }
  0x8a   :  { %9570 = shalt.err (!%p9567_p13)
}
  0x8b   :  { %125 = dma.hbm_to_vmem [thread:$0]  %s10910_s13, 1536, %s120_s24, [#allocation13], %s9628_s26, %s9628_s26, %s9629_s27  }
  0x8c   :  { %s9571_s19 = scalar_lea.hbm %s10911_s14, 48 }
  0x8d   :  { %p9572_p0 = scmp.ne.s32.totalorder %s10911_s14, %s9571_s19  ;;  %p9575_p1 = scmp.lt.u32.totalorder %s9571_s19, %s10911_s14 }
  0x8f   :  { %p9577_p2 = pnand %p9575_p1, %p9572_p0 }
  0x91   :  { %9580 = shalt.err (!%p9577_p2)
}
  0x92   :  { %s9581_s29 = scalar_lea.vmem %s9837_s3, 48  ;;  %s9585_s13 = scalar_lea.vmem %s9837_s3, 64 }
  0x93   :  { %p9582_p3 = scmp.ne.s32.totalorder %s9837_s3, %s9581_s29  ;;  %p9586_p4 = scmp.lt.s32.totalorder %s9837_s3, %s9837_s3 }
  0x94   :  { %p9587_p5 = scmp.lt.s32.totalorder %s9585_s13, %s9581_s29 }
  0x96   :  { %p9588_p6 = por %p9587_p5, %p9586_p4 }
  0x98   :  { %p9589_p7 = pnand %p9588_p6, %p9582_p3 }
  0x9a   :  { %9592 = shalt.err (!%p9589_p7)
}
  0x9b   :  { %s10955_s26 = smov 1   ;;  %s10956_s27 = smov 16  }
  0x9c   :  { %137 = dma.hbm_to_vmem [thread:$0]  %s10911_s14, 48, %s9837_s3, [#allocation16], %s10956_s27, %s10956_s27, %s10955_s26  }
  0x9d   :  { %9615 = dma.done.wait [#allocation4], 128  }
  0x9e   :  { %9616 = vsyncadd [#allocation4], 4294967168 }
  0x9f   :  { %9617 = dma.done.wait [#allocation7], 3072  }
  0xa0   :  { %9618 = vsyncadd [#allocation7], 4294964224 }
  0xa1   :  { %9619 = dma.done.wait [#allocation10], 1552  }
  0xa2   :  { %9620 = vsyncadd [#allocation10], 4294965744 }
  0xa3   :  { %9621 = dma.done.wait [#allocation13], 1584  }
  0xa4   :  { %9622 = vsyncadd [#allocation13], 4294965712 }
  0xa5   :  { %9623 = dma.done.wait [#allocation16], 48  }
  0xa6   :  { %9624 = vsyncadd [#allocation16], 4294967248  ;;  %v9641_v0 = vmov 0   ;;  %vm212_vm0 = vcmask 1043456   ;;  %vm199_vm1 = vcmask 31744   ;;  %s10957_s30 = sld [smem:[#allocation47_spill]] }
  0xa7   :  { %9415 = vset.pattern.permute.xlu1 %v9641_v0  ;;  %9414 = vset.pattern.permute.xlu0 %v9641_v0  ;;  %v170_v3 = vld [vmem:[#allocation3] sm:$0xf]  ;;  %s10958_s11 = sld [smem:[#allocation46_spill]]  ;;  %v318_v10 = vld [vmem:[%s10901_s4 + $0x8] sm:$0xff]  ;;  %v320_v12 = vld [vmem:[%s10901_s4 + $0x18] sm:$0xff]  ;;  %vm341_vm2 = vcmask 261120  }
  0xa8   :  { %8485 = vmatprep.subr.msk.mxu0 %vm212_vm0, %v170_v3  ;;  %v317_v11 = vld [vmem:[%s10901_s4] sm:$0xff]  ;;  %v319_v13 = vld [vmem:[%s10901_s4 + $0x10] sm:$0xff]  ;;  %v456_v14 = vld [vmem:[%s10903_s6 + $0x8] sm:$0xff]  ;;  %s11002_s23 = sld [smem:[#allocation49_spill]]  ;;  %s9645_s25 = smov [#allocation17]  }
  0xa9   :  { %8486 = vmatpush3.msk.msra.mxu0 %vm212_vm0, %v170_v3  ;;  %v455_v15 = vld [vmem:[%s10903_s6] sm:$0xff]  ;;  %v458_v16 = vld [vmem:[%s10903_s6 + $0x18] sm:$0xff]  ;;  %v457_v17 = vld [vmem:[%s10903_s6 + $0x10] sm:$0xff] }
  0xaa   :  { %v7969_v18 = vld [vmem:[%s10901_s4 + $0x28] sm:$0xff]  ;;  %v7968_v19 = vld [vmem:[%s10901_s4 + $0x20] sm:$0xff]  ;;  %v7971_v20 = vld [vmem:[%s10901_s4 + $0x38] sm:$0xff] }
  0xab   :  { %v7970_v21 = vld [vmem:[%s10901_s4 + $0x30] sm:$0xff]  ;;  %v7977_v22 = vld [vmem:[%s10903_s6 + $0x28] sm:$0xff]  ;;  %v7976_v23 = vld [vmem:[%s10903_s6 + $0x20] sm:$0xff] }
  0xac   :  { %v9878_v1 = vld [vmem:[%s10957_s30 + $0x10] sm:$0xff]  ;;  %v9883_v2 = vld [vmem:[%s10957_s30] sm:$0xff]  ;;  %v178_v6 = vld [vmem:[%s10957_s30 + $0x18] sm:$0xff] }
  0xad   :  { %191 = vperm.xlu1 %9415, %v9878_v1   ;;  %181 = vperm.xlu0 %9414, %v9883_v2   ;;  %v9890_v4 = vld [vmem:[%s10958_s11] sm:$0xff]  ;;  %v9895_v5 = vld [vmem:[%s10958_s11 + $0x8] sm:$0xff]  ;;  %v9910_v8 = vld [vmem:[%s10958_s11 + $0x10] sm:$0xff] }
  0xae   :  { %8487 = vmatprep.mubr.msk.f32.mxu0 %vm199_vm1, %v9890_v4  ;;  %v176_v7 = vld [vmem:[%s10957_s30 + $0x8] sm:$0xff]  ;;  %v9917_v9 = vld [vmem:[%s10958_s11 + $0x18] sm:$0xff]  ;;  %v7978_v25 = vld [vmem:[%s10903_s6 + $0x30] sm:$0xff] }
  0xaf   :  { %8488 = vmatmul.mubr.msk.f32.vlgmr.msra.gmra.mrb[0].mxu0 %vm199_vm1, %v9895_v5  ;;  %v7979_v24 = vld [vmem:[%s10903_s6 + $0x38] sm:$0xff]  ;;  %v7985_v26 = vld [vmem:[%s10901_s4 + $0x48] sm:$0xff]  ;;  %v7984_v27 = vld [vmem:[%s10901_s4 + $0x40] sm:$0xff] }
  0xb0   :  { %8490 = vmatprep.mubr.msk.f32.mxu0 %vm199_vm1, %v9910_v8  ;;  %v7987_v28 = vld [vmem:[%s10901_s4 + $0x58] sm:$0xff]  ;;  %v7986_v29 = vld [vmem:[%s10901_s4 + $0x50] sm:$0xff]  ;;  %v7993_v30 = vld [vmem:[%s10903_s6 + $0x48] sm:$0xff] }
  0xb1   :  { %196 = vperm.xlu1 %9415, %v178_v6   ;;  %186 = vperm.xlu0 %9414, %v176_v7   ;;  %v7992_v31 = vld [vmem:[%s10903_s6 + $0x40] sm:$0xff]  ;;  %v7995_v32 = vld [vmem:[%s10903_s6 + $0x58] sm:$0xff]  ;;  %v7994_v33 = vld [vmem:[%s10903_s6 + $0x50] sm:$0xff] }
  0xb2   :  { %v9997_v34 = vld [vmem:[#allocation6] sm:$0xff]  ;;  %v4700_v35 = vld [vmem:[%s10905_s8] sm:$0xff]  ;;  %v4703_v38 = vld [vmem:[%s10905_s8 + $0x18] sm:$0xff] }
  0xb3   :  { %8491 = vmatmul.mubr.msk.f32.gmra.mrb[2].mxu0 %vm199_vm1, %v9917_v9  ;;  %8501 = vmatprep.mubr.msk.f32.mxu1 %vm341_vm2, %v9997_v34  ;;  %v4701_v36 = vld [vmem:[%s10905_s8 + $0x8] sm:$0xff]  ;;  %v4702_v37 = vld [vmem:[%s10905_s8 + $0x10] sm:$0xff]  ;;  %v10027_v62 = vld [vmem:[#allocation6 + $0x10] sm:$0xff] }
  0xb4   :  { %v10025_v61 = vld [vmem:[#allocation6 + $0x8] sm:$0xff]  ;;  %v10033_v63 = vld [vmem:[#allocation6 + $0x18] sm:$0xff]  ;;  %v10037_v0 = vld [vmem:[#allocation8] sm:$0xff] }
  0xb5   :  { %328 = vperm.xlu1 %9415, %v318_v10   ;;  %323 = vperm.xlu0 %9414, %v317_v11  }
  0xb6   :  { %8515 = vmatprep.mubr.msk.f32.mxu0 %vm341_vm2, %v10037_v0 }
  0xb9   :  { %338 = vperm.xlu1 %9415, %v320_v12   ;;  %333 = vperm.xlu0 %9414, %v319_v13  }
  0xbd   :  { %466 = vperm.xlu1 %9415, %v456_v14   ;;  %461 = vperm.xlu0 %9414, %v455_v15  }
  0xc1   :  { %476 = vperm.xlu1 %9415, %v458_v16   ;;  %471 = vperm.xlu0 %9414, %v457_v17  }
  0xc5   :  { %609 = vperm.xlu1 %9415, %v7969_v18   ;;  %604 = vperm.xlu0 %9414, %v7968_v19  }
  0xc9   :  { %619 = vperm.xlu1 %9415, %v7971_v20   ;;  %614 = vperm.xlu0 %9414, %v7970_v21  }
  0xcd   :  { %748 = vperm.xlu1 %9415, %v7977_v22   ;;  %743 = vperm.xlu0 %9414, %v7976_v23  }
  0xd1   :  { %758 = vperm.xlu1 %9415, %v7979_v24   ;;  %753 = vperm.xlu0 %9414, %v7978_v25  }
  0xd5   :  { %891 = vperm.xlu1 %9415, %v7985_v26   ;;  %886 = vperm.xlu0 %9414, %v7984_v27  }
  0xd9   :  { %901 = vperm.xlu1 %9415, %v7987_v28   ;;  %896 = vperm.xlu0 %9414, %v7986_v29  }
  0xdd   :  { %1030 = vperm.xlu1 %9415, %v7993_v30   ;;  %1025 = vperm.xlu0 %9414, %v7992_v31  }
  0xe1   :  { %1040 = vperm.xlu1 %9415, %v7995_v32   ;;  %1035 = vperm.xlu0 %9414, %v7994_v33  }
  0xe5   :  { %3737 = vperm.xlu1 %9415, %v176_v7   ;;  %3732 = vperm.xlu0 %9414, %v9883_v2  }
  0xe9   :  { %3747 = vperm.xlu1 %9415, %v178_v6   ;;  %3742 = vperm.xlu0 %9414, %v9878_v1  }
  0xed   :  { %3877 = vperm.xlu1 %9415, %v318_v10   ;;  %3872 = vperm.xlu0 %9414, %v317_v11  }
  0xf1   :  { %3887 = vperm.xlu1 %9415, %v320_v12   ;;  %3882 = vperm.xlu0 %9414, %v319_v13  }
  0xf5   :  { %4014 = vperm.xlu1 %9415, %v456_v14   ;;  %4009 = vperm.xlu0 %9414, %v455_v15  }
  0xf9   :  { %4024 = vperm.xlu1 %9415, %v458_v16   ;;  %4019 = vperm.xlu0 %9414, %v457_v17  }
  0xfd   :  { %4155 = vperm.xlu1 %9415, %v7969_v18   ;;  %4150 = vperm.xlu0 %9414, %v7968_v19  }
 0x101   :  { %4165 = vperm.xlu1 %9415, %v7971_v20   ;;  %4160 = vperm.xlu0 %9414, %v7970_v21  }
 0x105   :  { %4292 = vperm.xlu1 %9415, %v7977_v22   ;;  %4287 = vperm.xlu0 %9414, %v7976_v23  }
 0x109   :  { %4302 = vperm.xlu1 %9415, %v7979_v24   ;;  %4297 = vperm.xlu0 %9414, %v7978_v25  }
 0x10d   :  { %4433 = vperm.xlu1 %9415, %v7985_v26   ;;  %4428 = vperm.xlu0 %9414, %v7984_v27   ;;  %v10041_v27 = vld [vmem:[#allocation8 + $0x8] sm:$0xff] }
 0x111   :  { %4443 = vperm.xlu1 %9415, %v7987_v28   ;;  %4438 = vperm.xlu0 %9414, %v7986_v29   ;;  %v10043_v28 = vld [vmem:[#allocation8 + $0x10] sm:$0xff]  ;;  %v10049_v29 = vld [vmem:[#allocation8 + $0x18] sm:$0xff] }
 0x115   :  { %4570 = vperm.xlu1 %9415, %v7993_v30   ;;  %4565 = vperm.xlu0 %9414, %v7992_v31   ;;  %v10053_v30 = vld [vmem:[#allocation6 + $0x20] sm:$0xff] }
 0x119   :  { %4580 = vperm.xlu1 %9415, %v7995_v32   ;;  %4575 = vperm.xlu0 %9414, %v7994_v33  }
 0x11d   :  { %4706 = vperm.xlu1 %9415, %v4700_v35   ;;  %1166 = vperm.xlu0 %9414, %v4700_v35  }
 0x121   :  { %4711 = vperm.xlu1 %9415, %v4701_v36   ;;  %1171 = vperm.xlu0 %9414, %v4701_v36  }
 0x125   :  { %4716 = vperm.xlu1 %9415, %v4702_v37   ;;  %1176 = vperm.xlu0 %9414, %v4702_v37  }
 0x129   :  { %4721 = vperm.xlu1 %9415, %v4703_v38   ;;  %1181 = vperm.xlu0 %9414, %v4703_v38  }
 0x12c   :  { %v182_v39 = vpop.permute.xlu0 %181  ;;  %v192_v40 = vpop.permute.xlu1 %191 }
 0x130   :  { %v187_v41 = vpop.permute.xlu0 %186  ;;  %v197_v47 = vpop.permute.xlu1 %196 }
 0x134   :  { %v329_v1 = vpop.permute.xlu1 %328  ;;  %v324_v2 = vpop.permute.xlu0 %323 }
 0x138   :  { %v339_v12 = vpop.permute.xlu1 %338  ;;  %v334_v15 = vpop.permute.xlu0 %333 }
 0x13c   :  { %v467_v31 = vpop.permute.xlu1 %466  ;;  %v462_v32 = vpop.permute.xlu0 %461 }
 0x182   :  { %v8489_v42 = vpop.f32.mrb[0].mxu0 }
 0x183   :  { %v288_v43 = vadd.f32 %v8489_v42, %v187_v41  ;;  %v282_v44 = vpop.f32.mrb[1].mxu0  ;;  %v472_v42 = vpop.permute.xlu0 %471 }
 0x184   :  { %v283_v45 = vadd.f32 %v282_v44, %v182_v39  ;;  %v477_v39 = vpop.permute.xlu1 %476 }
 0x185   :  { %v306_v46 = vmul.f32 0.1, %v288_v43  ;;  %vm302_vm3 = vcmp.gt.f32.partialorder %v288_v43, 0.0 }
 0x186   :  { %v305_v48 = vmul.f32 0.1, %v283_v45  ;;  %v8492_v49 = vpop.f32.mrb[2].mxu0  ;;  %vm301_vm4 = vcmp.gt.f32.partialorder %v283_v45, 0.0 }
 0x187   :  { %v298_v50 = vadd.f32 %v8492_v49, %v197_v47  ;;  %v292_v51 = vpop.f32.mrb[3].mxu0  ;;  %v10013_v52 = vsel %vm302_vm3, %v288_v43, %v306_v46 }
 0x188   :  { %v293_v53 = vadd.f32 %v292_v51, %v192_v40  ;;  %v10015_v54 = vsel %vm301_vm4, %v283_v45, %v305_v48 }
 0x189   :  { %vm304_vm5 = vcmp.gt.f32.partialorder %v298_v50, 0.0  ;;  %v308_v55 = vmul.f32 0.1, %v298_v50  ;;  %v9105_v56 = vpack.c.bf16 %v10013_v52, %v10015_v54 }
 0x18a   :  { %vm303_vm6 = vcmp.gt.f32.partialorder %v293_v53, 0.0  ;;  %v307_v57 = vmul.f32 0.1, %v293_v53 }
 0x18b   :  { %9106 = vmatprep.subr.bf16.mxu1 %v9105_v56  ;;  %v10019_v58 = vsel %vm304_vm5, %v298_v50, %v308_v55 }
 0x18c   :  { %9108 = vmatpush3.bf16.msra.mxu1 %v9105_v56  ;;  %v10021_v59 = vsel %vm303_vm6, %v293_v53, %v307_v57 }
 0x18d   :  { %v9109_v60 = vpack.c.bf16 %v10019_v58, %v10021_v59 }
 0x18f   :  { %9110 = vmatprep.subr.bf16.mxu1 %v9109_v60 }
 0x190   :  { %9112 = vmatpush3.bf16.msra.mxu1 %v9109_v60  ;;  %v10081_v60 = vld [vmem:[#allocation6 + $0x38] sm:$0xff] }
 0x193   :  { %8502 = vmatmul.mubr.msk.f32.vlgmr.msra.gmra.mrb[0].mxu1 %vm341_vm2, %v10025_v61 }
 0x194   :  { %8504 = vmatprep.mubr.msk.f32.mxu1 %vm341_vm2, %v10027_v62 }
 0x197   :  { %8505 = vmatmul.mubr.msk.f32.gmra.mrb[2].mxu1 %vm341_vm2, %v10033_v63 }
 0x198   :  { %8529 = vmatprep.mubr.msk.f32.mxu1 %vm341_vm2, %v10053_v30 }
 0x266   :  { %v8503_v3 = vpop.f32.mrb[0].mxu1 }
 0x267   :  { %v426_v6 = vadd.f32 %v8503_v3, %v329_v1  ;;  %v420_v7 = vpop.f32.mrb[1].mxu1  ;;  %v10085_v1 = vld [vmem:[#allocation8 + $0x20] sm:$0xff]  ;;  %v605_v3 = vpop.permute.xlu0 %604 }
 0x268   :  { %v421_v10 = vadd.f32 %v420_v7, %v324_v2  ;;  %v610_v2 = vpop.permute.xlu1 %609 }
 0x269   :  { %vm440_vm7 = vcmp.gt.f32.partialorder %v426_v6, 0.0  ;;  %v444_v11 = vmul.f32 0.1, %v426_v6 }
 0x26a   :  { %vm439_vm8 = vcmp.gt.f32.partialorder %v421_v10, 0.0  ;;  %v443_v13 = vmul.f32 0.1, %v421_v10  ;;  %v8506_v14 = vpop.f32.mrb[2].mxu1 }
 0x26b   :  { %v436_v16 = vadd.f32 %v8506_v14, %v339_v12  ;;  %v430_v17 = vpop.f32.mrb[3].mxu1  ;;  %v448_v18 = vsel %vm440_vm7, %v426_v6, %v444_v11 }
 0x26c   :  { %v431_v19 = vadd.f32 %v430_v17, %v334_v15  ;;  %v447_v20 = vsel %vm439_vm8, %v421_v10, %v443_v13  ;;  %v620_v13 = vpop.permute.xlu1 %619 }
 0x26d   :  { %vm442_vm9 = vcmp.gt.f32.partialorder %v436_v16, 0.0  ;;  %v446_v21 = vmul.f32 0.1, %v436_v16  ;;  %v9113_v22 = vpack.c.bf16 %v448_v18, %v447_v20 }
 0x26e   :  { %vm441_vm10 = vcmp.gt.f32.partialorder %v431_v19, 0.0  ;;  %v445_v23 = vmul.f32 0.1, %v431_v19 }
 0x26f   :  { %9114 = vmatprep.subr.bf16.mxu0 %v9113_v22  ;;  %v450_v24 = vsel %vm442_vm9, %v436_v16, %v446_v21  ;;  %v615_v16 = vpop.permute.xlu0 %614 }
 0x270   :  { %9116 = vmatpush3.bf16.msra.mxu0 %v9113_v22  ;;  %v449_v25 = vsel %vm441_vm10, %v431_v19, %v445_v23 }
 0x271   :  { %v9117_v26 = vpack.c.bf16 %v450_v24, %v449_v25 }
 0x273   :  { %9118 = vmatprep.subr.bf16.mxu0 %v9117_v26 }
 0x274   :  { %9120 = vmatpush3.bf16.msra.mxu0 %v9117_v26 }
 0x277   :  { %8516 = vmatmul.mubr.msk.f32.vlgmr.msra.gmra.mrb[4].mxu0 %vm341_vm2, %v10041_v27 }
 0x278   :  { %8518 = vmatprep.mubr.msk.f32.mxu0 %vm341_vm2, %v10043_v28 }
 0x27b   :  { %8519 = vmatmul.mubr.msk.f32.gmra.mrb[6].mxu0 %vm341_vm2, %v10049_v29 }
 0x27c   :  { %8543 = vmatprep.mubr.msk.f32.mxu0 %vm341_vm2, %v10085_v1 }
 0x34a   :  { %v8517_v33 = vpop.f32.mrb[4].mxu0 }
 0x34b   :  { %v563_v35 = vadd.f32 %v8517_v33, %v467_v31  ;;  %v557_v36 = vpop.f32.mrb[5].mxu0  ;;  %v10091_v33 = vld [vmem:[#allocation8 + $0x30] sm:$0xff] }
 0x34c   :  { %v558_v37 = vadd.f32 %v557_v36, %v462_v32  ;;  %v10089_v32 = vld [vmem:[#allocation8 + $0x28] sm:$0xff]  ;;  %v10101_v36 = vld [vmem:[#allocation6 + $0x40] sm:$0xff] }
 0x34d   :  { %v577_v38 = vadd.f32 %v563_v35, %v10013_v52  ;;  %v10097_v35 = vld [vmem:[#allocation8 + $0x38] sm:$0xff] }
 0x34e   :  { %v576_v40 = vadd.f32 %v558_v37, %v10015_v54  ;;  %v8520_v41 = vpop.f32.mrb[6].mxu0  ;;  %v749_v37 = vpop.permute.xlu1 %748 }
 0x34f   :  { %vm581_vm11 = vcmp.gt.f32.partialorder %v577_v38, 0.0  ;;  %v585_v43 = vmul.f32 0.1, %v577_v38  ;;  %v573_v44 = vadd.f32 %v8520_v41, %v477_v39  ;;  %v567_v45 = vpop.f32.mrb[7].mxu0 }
 0x350   :  { %vm580_vm12 = vcmp.gt.f32.partialorder %v576_v40, 0.0  ;;  %v584_v46 = vmul.f32 0.1, %v576_v40  ;;  %v568_v47 = vadd.f32 %v567_v45, %v472_v42 }
 0x351   :  { %v579_v48 = vadd.f32 %v573_v44, %v10019_v58  ;;  %v10060_v49 = vsel %vm581_vm11, %v577_v38, %v585_v43  ;;  %v10073_v58 = vld [vmem:[#allocation6 + $0x28] sm:$0xff]  ;;  %v744_v38 = vpop.permute.xlu0 %743 }
 0x352   :  { %v578_v50 = vadd.f32 %v568_v47, %v10021_v59  ;;  %v10063_v51 = vsel %vm580_vm12, %v576_v40, %v584_v46  ;;  %v10075_v59 = vld [vmem:[#allocation6 + $0x30] sm:$0xff]  ;;  %v759_v44 = vpop.permute.xlu1 %758 }
 0x353   :  { %vm583_vm13 = vcmp.gt.f32.partialorder %v579_v48, 0.0  ;;  %v587_v52 = vmul.f32 0.1, %v579_v48  ;;  %v9121_v53 = vpack.c.bf16 %v10060_v49, %v10063_v51 }
 0x354   :  { %vm582_vm14 = vcmp.gt.f32.partialorder %v578_v50, 0.0  ;;  %v586_v54 = vmul.f32 0.1, %v578_v50 }
 0x355   :  { %9122 = vmatprep.subr.bf16.mxu1 %v9121_v53  ;;  %v10067_v55 = vsel %vm583_vm13, %v579_v48, %v587_v52  ;;  %v754_v47 = vpop.permute.xlu0 %753 }
 0x356   :  { %9124 = vmatpush3.bf16.msra.mxu1 %v9121_v53  ;;  %v10069_v56 = vsel %vm582_vm14, %v578_v50, %v586_v54 }
 0x357   :  { %v9125_v57 = vpack.c.bf16 %v10067_v55, %v10069_v56 }
 0x359   :  { %9126 = vmatprep.subr.bf16.mxu1 %v9125_v57 }
 0x35a   :  { %9128 = vmatpush3.bf16.msra.mxu1 %v9125_v57 }
 0x35d   :  { %8530 = vmatmul.mubr.msk.f32.vlgmr.msra.gmra.mrb[4].mxu1 %vm341_vm2, %v10073_v58 }
 0x35e   :  { %8532 = vmatprep.mubr.msk.f32.mxu1 %vm341_vm2, %v10075_v59 }
 0x361   :  { %8533 = vmatmul.mubr.msk.f32.gmra.mrb[6].mxu1 %vm341_vm2, %v10081_v60 }
 0x362   :  { %8557 = vmatprep.mubr.msk.f32.mxu1 %vm341_vm2, %v10101_v36 }
 0x430   :  { %v8531_v6 = vpop.f32.mrb[4].mxu1 }
 0x431   :  { %v706_v7 = vadd.f32 %v8531_v6, %v610_v2  ;;  %v700_v10 = vpop.f32.mrb[5].mxu1 }
 0x432   :  { %v701_v11 = vadd.f32 %v700_v10, %v605_v3 }
 0x433   :  { %vm720_vm15 = vcmp.gt.f32.partialorder %v706_v7, 0.0  ;;  %v724_v12 = vmul.f32 0.1, %v706_v7 }
 0x434   :  { %vm719_vm3 = vcmp.gt.f32.partialorder %v701_v11, 0.0  ;;  %v723_v14 = vmul.f32 0.1, %v701_v11  ;;  %v8534_v15 = vpop.f32.mrb[6].mxu1 }
 0x435   :  { %v716_v17 = vadd.f32 %v8534_v15, %v620_v13  ;;  %v710_v18 = vpop.f32.mrb[7].mxu1  ;;  %v728_v19 = vsel %vm720_vm15, %v706_v7, %v724_v12  ;;  %v10123_v12 = vld [vmem:[#allocation6 + $0x50] sm:$0xff]  ;;  %v10129_v13 = vld [vmem:[#allocation6 + $0x58] sm:$0xff]  ;;  %v892_v15 = vpop.permute.xlu1 %891 }
 0x436   :  { %v711_v20 = vadd.f32 %v710_v18, %v615_v16  ;;  %v727_v21 = vsel %vm719_vm3, %v701_v11, %v723_v14  ;;  %v10133_v14 = vld [vmem:[#allocation8 + $0x40] sm:$0xff]  ;;  %v887_v16 = vpop.permute.xlu0 %886 }
 0x437   :  { %vm722_vm4 = vcmp.gt.f32.partialorder %v716_v17, 0.0  ;;  %v726_v22 = vmul.f32 0.1, %v716_v17  ;;  %v9129_v23 = vpack.c.bf16 %v728_v19, %v727_v21 }
 0x438   :  { %vm721_vm5 = vcmp.gt.f32.partialorder %v711_v20, 0.0  ;;  %v725_v24 = vmul.f32 0.1, %v711_v20 }
 0x439   :  { %9130 = vmatprep.subr.bf16.mxu0 %v9129_v23  ;;  %v730_v25 = vsel %vm722_vm4, %v716_v17, %v726_v22  ;;  %v902_v22 = vpop.permute.xlu1 %901 }
 0x43a   :  { %9132 = vmatpush3.bf16.msra.mxu0 %v9129_v23  ;;  %v729_v26 = vsel %vm721_vm5, %v711_v20, %v725_v24 }
 0x43b   :  { %v9133_v31 = vpack.c.bf16 %v730_v25, %v729_v26  ;;  %v897_v25 = vpop.permute.xlu0 %896 }
 0x43d   :  { %9134 = vmatprep.subr.bf16.mxu0 %v9133_v31 }
 0x43e   :  { %9136 = vmatpush3.bf16.msra.mxu0 %v9133_v31 }
 0x441   :  { %8544 = vmatmul.mubr.msk.f32.vlgmr.msra.gmra.mrb[8].mxu0 %vm341_vm2, %v10089_v32 }
 0x442   :  { %8546 = vmatprep.mubr.msk.f32.mxu0 %vm341_vm2, %v10091_v33 }
 0x445   :  { %8547 = vmatmul.mubr.msk.f32.gmra.mrb[10].mxu0 %vm341_vm2, %v10097_v35 }
 0x446   :  { %8571 = vmatprep.mubr.msk.f32.mxu0 %vm341_vm2, %v10133_v14 }
 0x514   :  { %v8545_v39 = vpop.f32.mrb[8].mxu0 }
 0x515   :  { %v845_v40 = vadd.f32 %v8545_v39, %v749_v37  ;;  %v839_v41 = vpop.f32.mrb[9].mxu0 }
 0x516   :  { %v840_v42 = vadd.f32 %v839_v41, %v744_v38 }
 0x517   :  { %v859_v43 = vadd.f32 %v845_v40, %v10060_v49 }
 0x518   :  { %v858_v45 = vadd.f32 %v840_v42, %v10063_v51  ;;  %v8548_v46 = vpop.f32.mrb[10].mxu0 }
 0x519   :  { %vm863_vm6 = vcmp.gt.f32.partialorder %v859_v43, 0.0  ;;  %v867_v48 = vmul.f32 0.1, %v859_v43  ;;  %v855_v50 = vadd.f32 %v8548_v46, %v759_v44  ;;  %v849_v52 = vpop.f32.mrb[11].mxu0  ;;  %v10137_v46 = vld [vmem:[#allocation8 + $0x48] sm:$0xff] }
 0x51a   :  { %vm862_vm7 = vcmp.gt.f32.partialorder %v858_v45, 0.0  ;;  %v866_v53 = vmul.f32 0.1, %v858_v45  ;;  %v850_v54 = vadd.f32 %v849_v52, %v754_v47  ;;  %v10139_v47 = vld [vmem:[#allocation8 + $0x50] sm:$0xff]  ;;  %v1158_v52 = vld [vmem:[%s10904_s7 + $0x10] sm:$0xff] }
 0x51b   :  { %v861_v57 = vadd.f32 %v855_v50, %v10067_v55  ;;  %v10108_v2 = vsel %vm863_vm6, %v859_v43, %v867_v48  ;;  %v10145_v48 = vld [vmem:[#allocation8 + $0x58] sm:$0xff] }
 0x51c   :  { %v860_v3 = vadd.f32 %v850_v54, %v10069_v56  ;;  %v10111_v6 = vsel %vm862_vm7, %v858_v45, %v866_v53  ;;  %v10121_v56 = vld [vmem:[#allocation6 + $0x48] sm:$0xff]  ;;  %v10152_v50 = vld [vmem:[%s10904_s7] sm:$0xff]  ;;  %v1031_v53 = vpop.permute.xlu1 %1030  ;;  %v1026_v54 = vpop.permute.xlu0 %1025 }
 0x51d   :  { %vm865_vm8 = vcmp.gt.f32.partialorder %v861_v57, 0.0  ;;  %v869_v49 = vmul.f32 0.1, %v861_v57  ;;  %v9137_v51 = vpack.c.bf16 %v10108_v2, %v10111_v6 }
 0x51e   :  { %vm864_vm9 = vcmp.gt.f32.partialorder %v860_v3, 0.0  ;;  %v868_v7 = vmul.f32 0.1, %v860_v3 }
 0x51f   :  { %9138 = vmatprep.subr.bf16.mxu1 %v9137_v51  ;;  %v10115_v10 = vsel %vm865_vm8, %v861_v57, %v869_v49 }
 0x520   :  { %9140 = vmatpush3.bf16.msra.mxu1 %v9137_v51  ;;  %v10117_v11 = vsel %vm864_vm9, %v860_v3, %v868_v7 }
 0x521   :  { %v9141_v55 = vpack.c.bf16 %v10115_v10, %v10117_v11 }
 0x523   :  { %9142 = vmatprep.subr.bf16.mxu1 %v9141_v55 }
 0x524   :  { %9144 = vmatpush3.bf16.msra.mxu1 %v9141_v55  ;;  %v1041_v55 = vpop.permute.xlu1 %1040 }
 0x527   :  { %8558 = vmatmul.mubr.msk.f32.vlgmr.msra.gmra.mrb[8].mxu1 %vm341_vm2, %v10121_v56 }
 0x528   :  { %8560 = vmatprep.mubr.msk.f32.mxu1 %vm341_vm2, %v10123_v12 }
 0x52b   :  { %8561 = vmatmul.mubr.msk.f32.gmra.mrb[10].mxu1 %vm341_vm2, %v10129_v13 }
 0x52c   :  { %8588 = vmatprep.mubr.msk.f32.mxu1 %vm341_vm2, %v1158_v52 }
 0x5fa   :  { %v8559_v17 = vpop.f32.mrb[8].mxu1 }
 0x5fb   :  { %v988_v18 = vadd.f32 %v8559_v17, %v892_v15  ;;  %v982_v19 = vpop.f32.mrb[9].mxu1  ;;  %v1036_v17 = vpop.permute.xlu0 %1035 }
 0x5fc   :  { %v983_v20 = vadd.f32 %v982_v19, %v887_v16 }
 0x5fd   :  { %vm1002_vm10 = vcmp.gt.f32.partialorder %v988_v18, 0.0  ;;  %v1006_v21 = vmul.f32 0.1, %v988_v18 }
 0x5fe   :  { %vm1001_vm11 = vcmp.gt.f32.partialorder %v983_v20, 0.0  ;;  %v1005_v23 = vmul.f32 0.1, %v983_v20  ;;  %v8562_v24 = vpop.f32.mrb[10].mxu1 }
 0x5ff   :  { %v998_v26 = vadd.f32 %v8562_v24, %v902_v22  ;;  %v992_v31 = vpop.f32.mrb[11].mxu1  ;;  %v1010_v37 = vsel %vm1002_vm10, %v988_v18, %v1006_v21 }
 0x600   :  { %v993_v38 = vadd.f32 %v992_v31, %v897_v25  ;;  %v1009_v39 = vsel %vm1001_vm11, %v983_v20, %v1005_v23 }
 0x601   :  { %vm1004_vm12 = vcmp.gt.f32.partialorder %v998_v26, 0.0  ;;  %v1008_v40 = vmul.f32 0.1, %v998_v26  ;;  %v9145_v41 = vpack.c.bf16 %v1010_v37, %v1009_v39 }
 0x602   :  { %vm1003_vm13 = vcmp.gt.f32.partialorder %v993_v38, 0.0  ;;  %v1007_v42 = vmul.f32 0.1, %v993_v38 }
 0x603   :  { %9146 = vmatprep.subr.bf16.mxu0 %v9145_v41  ;;  %v1012_v43 = vsel %vm1004_vm12, %v998_v26, %v1008_v40  ;;  %v3721_v40 = vld [vmem:[#allocation3 + $0x4] sm:$0xf] }
 0x604   :  { %9148 = vmatpush3.bf16.msra.mxu0 %v9145_v41  ;;  %v1011_v44 = vsel %vm1003_vm13, %v993_v38, %v1007_v42  ;;  %v10943_v41 = vmov 0.0   ;;  %v10194_v42 = vld [vmem:[%s10906_s9] sm:$0xff] }
 0x605   :  { %v9149_v45 = vpack.c.bf16 %v1012_v43, %v1011_v44 }
 0x607   :  { %9150 = vmatprep.subr.bf16.mxu0 %v9149_v45 }
 0x608   :  { %9152 = vmatpush3.bf16.msra.mxu0 %v9149_v45 }
 0x60b   :  { %8572 = vmatmul.mubr.msk.f32.vlgmr.msra.gmra.mrb[12].mxu0 %vm341_vm2, %v10137_v46 }
 0x60c   :  { %8574 = vmatprep.mubr.msk.f32.mxu0 %vm341_vm2, %v10139_v47 }
 0x60f   :  { %8575 = vmatmul.mubr.msk.f32.gmra.mrb[14].mxu0 %vm341_vm2, %v10145_v48 }
 0x610   :  { %8585 = vmatprep.mubr.msk.f32.mxu0 %vm341_vm2, %v10152_v50 }
 0x6de   :  { %v8573_v57 = vpop.f32.mrb[12].mxu0 }
 0x6df   :  { %v1127_v3 = vadd.f32 %v8573_v57, %v1031_v53  ;;  %v1121_v49 = vpop.f32.mrb[13].mxu0 }
 0x6e0   :  { %v1122_v51 = vadd.f32 %v1121_v49, %v1026_v54 }
 0x6e1   :  { %v1141_v7 = vadd.f32 %v1127_v3, %v10108_v2 }
 0x6e2   :  { %v1140_v15 = vadd.f32 %v1122_v51, %v10111_v6  ;;  %v8576_v16 = vpop.f32.mrb[14].mxu0 }
 0x6e3   :  { %vm1145_vm14 = vcmp.gt.f32.partialorder %v1141_v7, 0.0  ;;  %v1149_v18 = vmul.f32 0.1, %v1141_v7  ;;  %v1137_v19 = vadd.f32 %v8576_v16, %v1041_v55  ;;  %v1131_v20 = vpop.f32.mrb[15].mxu0 }
 0x6e4   :  { %vm1144_vm15 = vcmp.gt.f32.partialorder %v1140_v15, 0.0  ;;  %v1148_v21 = vmul.f32 0.1, %v1140_v15  ;;  %v1132_v22 = vadd.f32 %v1131_v20, %v1036_v17  ;;  %v3738_v17 = vpop.permute.xlu1 %3737 }
 0x6e5   :  { %v1153_v23 = vsel %vm1145_vm14, %v1141_v7, %v1149_v18  ;;  %v1143_v24 = vadd.f32 %v1137_v19, %v10115_v10  ;;  %v10167_v10 = vld [vmem:[%s10904_s7 + $0x8] sm:$0xff]  ;;  %vm3718_vm14 = vcmask 253952  }
 0x6e6   :  { %v1152_v25 = vsel %vm1144_vm15, %v1140_v15, %v1148_v21  ;;  %v1142_v26 = vadd.f32 %v1132_v22, %v10117_v11  ;;  %v10172_v11 = vld [vmem:[%s10904_s7 + $0x18] sm:$0xff]  ;;  %v10235_v21 = vld [vmem:[%s10906_s9 + $0x8] sm:$0xff] }
 0x6e7   :  { %vm1147_vm3 = vcmp.gt.f32.partialorder %v1143_v24, 0.0  ;;  %v1151_v2 = vmul.f32 0.1, %v1143_v24  ;;  %v9153_v31 = vpack.c.bf16 %v1153_v23, %v1152_v25 }
 0x6e8   :  { %vm1146_vm4 = vcmp.gt.f32.partialorder %v1142_v26, 0.0  ;;  %v1150_v6 = vmul.f32 0.1, %v1142_v26 }
 0x6e9   :  { %v1155_v37 = vsel %vm1147_vm3, %v1143_v24, %v1151_v2  ;;  %9154 = vmatprep.subr.bf16.mxu0 %v9153_v31  ;;  %9265 = vmatprep.subr.bf16.mxu1 %v9153_v31 }
 0x6ea   :  { %v1154_v38 = vsel %vm1146_vm4, %v1142_v26, %v1150_v6  ;;  %9156 = vmatpush3.bf16.msra.mxu0 %v9153_v31  ;;  %9267 = vmatpush3.bf16.msra.mxu1 %v9153_v31  ;;  %v3748_v26 = vpop.permute.xlu1 %3747 }
 0x6eb   :  { %v9157_v39 = vpack.c.bf16 %v1155_v37, %v1154_v38 }
 0x6ed   :  { %9158 = vmatprep.subr.bf16.mxu0 %v9157_v39  ;;  %9266 = vmatprep.subr.bf16.mxu1 %v9157_v39 }
 0x6ee   :  { %9160 = vmatpush3.bf16.msra.mxu0 %v9157_v39  ;;  %9268 = vmatpush3.bf16.msra.mxu1 %v9157_v39 }
 0x6ef   :  { %8751 = vmatprep.subr.msk.mxu1 %vm212_vm0, %v3721_v40  ;;  %8591 = vmatprep.subr.mxu0 %v10943_v41 }
 0x6f1   :  { %8586 = vmatmul.mubr.msk.f32.vlgmr.msra.gmra.mrb[16].mxu0 %vm341_vm2, %v10167_v10  ;;  %8589 = vmatmul.mubr.msk.f32.vlgmr.msra.gmra.mrb[12].mxu1 %vm341_vm2, %v10172_v11 }
 0x6f2   :  { %8752 = vmatpush3.msk.msra.mxu1 %vm212_vm0, %v3721_v40  ;;  %8753 = vmatprep.mubr.msk.f32.mxu1 %vm199_vm1, %v9890_v4  ;;  %vm9643_vm0 = vmmov 0   ;;  %v3733_v4 = vpop.permute.xlu0 %3732 }
 0x6f3   :  { %8592 = vmatpush3.msra.mxu0 %v10194_v42  ;;  %8593 = vmatprep.mubr.msk.f32.mxu0 %vm9643_vm0, %v10943_v41 }
 0x6f4   :  { %8596 = vmatprep.subr.mxu0 %v10943_v41 }
 0x6f5   :  { %8754 = vmatmul.mubr.msk.f32.vlgmr.msra.gmra.mrb[14].mxu1 %vm199_vm1, %v9895_v5 }
 0x6f6   :  { %8756 = vmatprep.mubr.msk.f32.mxu1 %vm199_vm1, %v9910_v8  ;;  %v3743_v5 = vpop.permute.xlu0 %3742 }
 0x6f9   :  { %8757 = vmatmul.mubr.msk.f32.gmra.mrb[16].mxu1 %vm199_vm1, %v9917_v9  ;;  %vm1287_vm1 = vcmask 64512  }
 0x6fa   :  { %8767 = vmatprep.mubr.msk.f32.mxu1 %vm341_vm2, %v9997_v34  ;;  %v10200_v8 = vpop.permute.xlu0 %3872 }
 0x6fe   :  { %v10202_v9 = vpop.permute.xlu0 %3882 }
 0x702   :  { %v10204_v34 = vpop.permute.xlu0 %4009 }
 0x706   :  { %v10206_v43 = vpop.permute.xlu0 %4019 }
 0x70a   :  { %v10208_v44 = vpop.permute.xlu0 %4150 }
 0x70e   :  { %v10210_v45 = vpop.permute.xlu0 %4160 }
 0x712   :  { %v10212_v52 = vpop.permute.xlu0 %4287 }
 0x716   :  { %v10214_v53 = vpop.permute.xlu0 %4297 }
 0x71a   :  { %v10216_v54 = vpop.permute.xlu0 %4428 }
 0x71e   :  { %v10218_v57 = vpop.permute.xlu0 %4438 }
 0x722   :  { %v10220_v3 = vpop.permute.xlu0 %4565 }
 0x726   :  { %v10222_v49 = vpop.permute.xlu0 %4575 }
 0x72a   :  { %v1167_v51 = vpop.permute.xlu0 %1166 }
 0x7c4   :  { %v10224_v7 = vpop.f32.mrb[16].mxu0  ;;  %v10226_v55 = vpop.f32.mrb[12].mxu1 }
 0x7c5   :  { %v1262_v15 = vpop.f32.mrb[17].mxu0  ;;  %v10228_v16 = vpop.f32.mrb[13].mxu1 }
 0x7c6   :  { %v1263_v18 = vadd.f32 %v1262_v15, %v1167_v51 }
 0x7c8   :  { %v10230_v19 = vmax.f32 %v1263_v18, 0.0  ;;  %v8755_v20 = vpop.f32.mrb[14].mxu1  ;;  %v10253_v18 = vld [vmem:[%s10906_s9 + $0x10] sm:$0xff] }
 0x7c9   :  { %v3837_v22 = vadd.f32 %v8755_v20, %v3738_v17  ;;  %v3831_v23 = vpop.f32.mrb[15].mxu1 }
 0x7ca   :  { %v3832_v24 = vadd.f32 %v3831_v23, %v3733_v4  ;;  %8594 = vmatmul.mubr.msk.f32.vlgmr.msra.gmra.mrb[18].mxu0 %vm1287_vm1, %v10230_v19  ;;  %v1364_v17 = vrot.slane %v10230_v19, 1  ;;  %v1440_v23 = vrot.slane %v10230_v19, 2 }
 0x7cb   :  { %vm3851_vm5 = vcmp.gt.f32.partialorder %v3837_v22, 0.0  ;;  %v3855_v25 = vmul.f32 0.1, %v3837_v22  ;;  %8597 = vmatpush3.msra.mxu0 %v10235_v21  ;;  %8598 = vmatprep.mubr.msk.f32.mxu0 %vm9643_vm0, %v10943_v41 }
 0x7cc   :  { %vm3850_vm6 = vcmp.gt.f32.partialorder %v3832_v24, 0.0  ;;  %v3854_v2 = vmul.f32 0.1, %v3832_v24  ;;  %v8758_v31 = vpop.f32.mrb[16].mxu1  ;;  %8601 = vmatprep.subr.mxu0 %v10943_v41 }
 0x7cd   :  { %v3847_v6 = vadd.f32 %v8758_v31, %v3748_v26  ;;  %v3841_v37 = vpop.f32.mrb[17].mxu1  ;;  %v10243_v38 = vsel %vm3851_vm5, %v3837_v22, %v3855_v25  ;;  %v10289_v25 = vld [vmem:[%s10906_s9 + $0x20] sm:$0xff]  ;;  %v10311_v26 = vld [vmem:[%s10906_s9 + $0x30] sm:$0xff]  ;;  %v10322_v31 = vld [vmem:[%s10906_s9 + $0x38] sm:$0xff] }
 0x7ce   :  { %v3842_v39 = vadd.f32 %v3841_v37, %v3743_v5  ;;  %v10245_v40 = vsel %vm3850_vm6, %v3832_v24, %v3854_v2  ;;  %v10270_v24 = vld [vmem:[%s10906_s9 + $0x18] sm:$0xff]  ;;  %v1744_v2 = vrot.slane %v10230_v19, 6  ;;  %v10333_v37 = vld [vmem:[%s10906_s9 + $0x40] sm:$0xff] }
 0x7cf   :  { %vm3853_vm7 = vcmp.gt.f32.partialorder %v3847_v6, 0.0  ;;  %v3857_v4 = vmul.f32 0.1, %v3847_v6  ;;  %v9161_v51 = vpack.c.bf16 %v10243_v38, %v10245_v40 }
 0x7d0   :  { %vm3852_vm8 = vcmp.gt.f32.partialorder %v3842_v39, 0.0  ;;  %v3856_v15 = vmul.f32 0.1, %v3842_v39 }
 0x7d1   :  { %9162 = vmatprep.subr.bf16.mxu1 %v9161_v51  ;;  %v10255_v20 = vsel %vm3853_vm7, %v3847_v6, %v3857_v4  ;;  %v1820_v6 = vrot.slane %v10230_v19, 7 }
 0x7d2   :  { %8599 = vmatmul.mubr.msk.f32.vlgmr.msra.gmra.mrb[18].mxu0 %vm1287_vm1, %v1364_v17  ;;  %9164 = vmatpush3.bf16.msra.mxu1 %v9161_v51  ;;  %v10258_v5 = vsel %vm3852_vm8, %v3842_v39, %v3856_v15  ;;  %v1172_v39 = vpop.permute.xlu0 %1171 }
 0x7d3   :  { %v9165_v22 = vpack.c.bf16 %v10255_v20, %v10258_v5  ;;  %8602 = vmatpush3.msra.mxu0 %v10253_v18  ;;  %8603 = vmatprep.mubr.msk.f32.mxu0 %vm9643_vm0, %v10943_v41  ;;  %v1268_v4 = vadd.f32 %v10224_v7, %v1172_v39  ;;  %v10354_v7 = vld [vmem:[%s10906_s9 + $0x50] sm:$0xff] }
 0x7d4   :  { %8606 = vmatprep.subr.mxu0 %v10943_v41  ;;  %10960 = vst [vmem:[#allocation25_spill] sm:$0xff] %v10354_v7 }
 0x7d5   :  { %9166 = vmatprep.subr.bf16.mxu1 %v9165_v22  ;;  %v1282_v51 = vmax.f32 %v1268_v4, 0.0  ;;  %v10404_v4 = vld [vmem:[%s10906_s9 + $0x78] sm:$0xff] }
 0x7d6   :  { %9168 = vmatpush3.bf16.msra.mxu1 %v9165_v22  ;;  %v10364_v22 = vld [vmem:[%s10906_s9 + $0x58] sm:$0xff]  ;;  %10965 = vst [vmem:[#allocation30_spill] sm:$0xff] %v10404_v4 }
 0x7d7   :  { %v1972_v15 = vrot.slane %v1282_v51, 1  ;;  %v2048_v17 = vrot.slane %v1282_v51, 2  ;;  %10961 = vst [vmem:[#allocation26_spill] sm:$0xff] %v10364_v22  ;;  %v2352_v39 = vrot.slane %v1282_v51, 6 }
 0x7d9   :  { %8768 = vmatmul.mubr.msk.f32.vlgmr.msra.gmra.mrb[18].mxu1 %vm341_vm2, %v10025_v61  ;;  %v1516_v61 = vrot.slane %v10230_v19, 3 }
 0x7da   :  { %8604 = vmatmul.mubr.msk.f32.vlgmr.msra.gmra.mrb[18].mxu0 %vm1287_vm1, %v1440_v23  ;;  %8770 = vmatprep.mubr.msk.f32.mxu1 %vm341_vm2, %v10027_v62  ;;  %v1592_v62 = vrot.slane %v10230_v19, 4  ;;  %v2124_v23 = vrot.slane %v1282_v51, 3 }
 0x7db   :  { %8607 = vmatpush3.msra.mxu0 %v10270_v24  ;;  %8608 = vmatprep.mubr.msk.f32.mxu0 %vm9643_vm0, %v10943_v41 }
 0x7dc   :  { %8611 = vmatprep.subr.mxu0 %v10943_v41 }
 0x7dd   :  { %8771 = vmatmul.mubr.msk.f32.gmra.mrb[20].mxu1 %vm341_vm2, %v10033_v63  ;;  %v10300_v63 = vld [vmem:[%s10906_s9 + $0x28] sm:$0xff] }
 0x7de   :  { %8781 = vmatprep.mubr.msk.f32.mxu1 %vm341_vm2, %v10037_v0  ;;  %v1668_v0 = vrot.slane %v10230_v19, 5  ;;  %v10344_v19 = vld [vmem:[%s10906_s9 + $0x48] sm:$0xff] }
 0x7df   :  { %10959 = vst [vmem:[#allocation24_spill] sm:$0xff] %v10344_v19 }
 0x7e2   :  { %8609 = vmatmul.mubr.msk.f32.vlgmr.msra.gmra.mrb[18].mxu0 %vm1287_vm1, %v1516_v61  ;;  %v10374_v61 = vld [vmem:[%s10906_s9 + $0x60] sm:$0xff] }
 0x7e3   :  { %8612 = vmatpush3.msra.mxu0 %v10289_v25  ;;  %8613 = vmatprep.mubr.msk.f32.mxu0 %vm9643_vm0, %v10943_v41  ;;  %10962 = vst [vmem:[#allocation27_spill] sm:$0xff] %v10374_v61 }
 0x7e4   :  { %8616 = vmatprep.subr.mxu0 %v10943_v41 }
 0x7ea   :  { %8614 = vmatmul.mubr.msk.f32.vlgmr.msra.gmra.mrb[18].mxu0 %vm1287_vm1, %v1592_v62  ;;  %v2200_v62 = vrot.slane %v1282_v51, 4 }
 0x7eb   :  { %8617 = vmatpush3.msra.mxu0 %v10300_v63  ;;  %8618 = vmatprep.mubr.msk.f32.mxu0 %vm9643_vm0, %v10943_v41 }
 0x7ec   :  { %8621 = vmatprep.subr.mxu0 %v10943_v41 }
 0x7f2   :  { %8619 = vmatmul.mubr.msk.f32.vlgmr.msra.gmra.mrb[18].mxu0 %vm1287_vm1, %v1668_v0  ;;  %v10384_v0 = vld [vmem:[%s10906_s9 + $0x68] sm:$0xff] }
 0x7f3   :  { %8622 = vmatpush3.msra.mxu0 %v10311_v26  ;;  %8623 = vmatprep.mubr.msk.f32.mxu0 %vm9643_vm0, %v10943_v41  ;;  %10963 = vst [vmem:[#allocation28_spill] sm:$0xff] %v10384_v0 }
 0x7f4   :  { %8626 = vmatprep.subr.mxu0 %v10943_v41 }
 0x7fa   :  { %8624 = vmatmul.mubr.msk.f32.vlgmr.msra.gmra.mrb[18].mxu0 %vm1287_vm1, %v1744_v2  ;;  %v2276_v2 = vrot.slane %v1282_v51, 5 }
 0x7fb   :  { %8627 = vmatpush3.msra.mxu0 %v10322_v31  ;;  %8628 = vmatprep.mubr.msk.f32.mxu0 %vm9643_vm0, %v10943_v41 }
 0x7fc   :  { %8631 = vmatprep.subr.mxu0 %v10943_v41 }
 0x802   :  { %8629 = vmatmul.mubr.msk.f32.vlgmr.msra.gmra.mrb[18].mxu0 %vm1287_vm1, %v1820_v6  ;;  %v10394_v6 = vld [vmem:[%s10906_s9 + $0x70] sm:$0xff] }
 0x803   :  { %8632 = vmatpush3.msra.mxu0 %v10333_v37  ;;  %8633 = vmatprep.mubr.msk.f32.mxu0 %vm9643_vm0, %v10943_v41  ;;  %10964 = vst [vmem:[#allocation29_spill] sm:$0xff] %v10394_v6 }
 0x804   :  { %8636 = vmatprep.subr.mxu0 %v10943_v41 }
 0x80a   :  { %8634 = vmatmul.mubr.msk.f32.vlgmr.msra.gmra.mrb[18].mxu0 %vm1287_vm1, %v1282_v51 }
 0x80b   :  { %8637 = vmatpush3.msra.mxu0 %v10344_v19  ;;  %8638 = vmatprep.mubr.msk.f32.mxu0 %vm9643_vm0, %v10943_v41 }
 0x80c   :  { %8641 = vmatprep.subr.mxu0 %v10943_v41 }
 0x812   :  { %8639 = vmatmul.mubr.msk.f32.vlgmr.msra.gmra.mrb[18].mxu0 %vm1287_vm1, %v1972_v15  ;;  %v2428_v15 = vrot.slane %v1282_v51, 7  ;;  %v10425_v51 = vld [vmem:[%s10906_s9 + $0x88] sm:$0xff] }
 0x813   :  { %8642 = vmatpush3.msra.mxu0 %v10354_v7  ;;  %8643 = vmatprep.mubr.msk.f32.mxu0 %vm9643_vm0, %v10943_v41  ;;  %10967 = vst [vmem:[#allocation32_spill] sm:$0xff] %v10425_v51  ;;  %v10980_v7 = vmov 0.0  }
 0x814   :  { %8646 = vmatprep.subr.mxu0 %v10943_v41 }
 0x81a   :  { %8644 = vmatmul.mubr.msk.f32.vlgmr.msra.gmra.mrb[18].mxu0 %vm1287_vm1, %v2048_v17  ;;  %v10414_v17 = vld [vmem:[%s10906_s9 + $0x80] sm:$0xff] }
 0x81b   :  { %8647 = vmatpush3.msra.mxu0 %v10364_v22  ;;  %8648 = vmatprep.mubr.msk.f32.mxu0 %vm9643_vm0, %v10943_v41  ;;  %10966 = vst [vmem:[#allocation31_spill] sm:$0xff] %v10414_v17 }
 0x81c   :  { %8651 = vmatprep.subr.mxu0 %v10943_v41 }
 0x822   :  { %8649 = vmatmul.mubr.msk.f32.vlgmr.msra.gmra.mrb[18].mxu0 %vm1287_vm1, %v2124_v23  ;;  %v1177_v23 = vpop.permute.xlu0 %1176 }
 0x823   :  { %8652 = vmatpush3.msra.mxu0 %v10374_v61  ;;  %8653 = vmatprep.mubr.msk.f32.mxu0 %vm9643_vm0, %v10943_v41 }
 0x824   :  { %8656 = vmatprep.subr.mxu0 %v10943_v41 }
 0x82a   :  { %8654 = vmatmul.mubr.msk.f32.vlgmr.msra.gmra.mrb[18].mxu0 %vm1287_vm1, %v2200_v62  ;;  %v1273_v62 = vadd.f32 %v10228_v16, %v1177_v23  ;;  %v10435_v16 = vld [vmem:[%s10906_s9 + $0x90] sm:$0xff]  ;;  %v10445_v23 = vld [vmem:[%s10906_s9 + $0x98] sm:$0xff] }
 0x82b   :  { %8657 = vmatpush3.msra.mxu0 %v10384_v0  ;;  %8658 = vmatprep.mubr.msk.f32.mxu0 %vm9643_vm0, %v10943_v41  ;;  %10968 = vst [vmem:[#allocation33_spill] sm:$0xff] %v10435_v16  ;;  %10969 = vst [vmem:[#allocation34_spill] sm:$0xff] %v10445_v23 }
 0x82c   :  { %8661 = vmatprep.subr.mxu0 %v10943_v41 }
 0x832   :  { %8659 = vmatmul.mubr.msk.f32.vlgmr.msra.gmra.mrb[18].mxu0 %vm1287_vm1, %v2276_v2  ;;  %v1283_v2 = vmax.f32 %v1273_v62, 0.0 }
 0x833   :  { %8662 = vmatpush3.msra.mxu0 %v10394_v6  ;;  %8663 = vmatprep.mubr.msk.f32.mxu0 %vm9643_vm0, %v10943_v41 }
 0x834   :  { %8666 = vmatprep.subr.mxu0 %v10943_v41  ;;  %v2732_v62 = vrot.slane %v1283_v2, 3 }
 0x83a   :  { %8664 = vmatmul.mubr.msk.f32.vlgmr.msra.gmra.mrb[18].mxu0 %vm1287_vm1, %v2352_v39  ;;  %v2580_v39 = vrot.slane %v1283_v2, 1 }
 0x83b   :  { %8667 = vmatpush3.msra.mxu0 %v10404_v4  ;;  %8668 = vmatprep.mubr.msk.f32.mxu0 %vm9643_vm0, %v10943_v41 }
 0x83c   :  { %8671 = vmatprep.subr.mxu0 %v10943_v41 }
 0x842   :  { %8669 = vmatmul.mubr.msk.f32.vlgmr.msra.gmra.mrb[18].mxu0 %vm1287_vm1, %v2428_v15  ;;  %v2656_v15 = vrot.slane %v1283_v2, 2 }
 0x843   :  { %8672 = vmatpush3.msra.mxu0 %v10414_v17  ;;  %8673 = vmatprep.mubr.msk.f32.mxu0 %vm9643_vm0, %v10943_v41 }
 0x844   :  { %8676 = vmatprep.subr.mxu0 %v10943_v41 }
 0x84a   :  { %8674 = vmatmul.mubr.msk.f32.vlgmr.msra.gmra.mrb[18].mxu0 %vm1287_vm1, %v1283_v2 }
 0x84b   :  { %8677 = vmatpush3.msra.mxu0 %v10425_v51  ;;  %8678 = vmatprep.mubr.msk.f32.mxu0 %vm9643_vm0, %v10943_v41 }
 0x84c   :  { %8681 = vmatprep.subr.mxu0 %v10943_v41 }
 0x852   :  { %8679 = vmatmul.mubr.msk.f32.vlgmr.msra.gmra.mrb[18].mxu0 %vm1287_vm1, %v2580_v39  ;;  %v10455_v39 = vld [vmem:[%s10906_s9 + $0xa0] sm:$0xff] }
 0x853   :  { %8682 = vmatpush3.msra.mxu0 %v10435_v16  ;;  %8683 = vmatprep.mubr.msk.f32.mxu0 %vm9643_vm0, %v10943_v41  ;;  %10970 = vst [vmem:[#allocation35_spill] sm:$0xff] %v10455_v39  ;;  %v1182_v16 = vpop.permute.xlu0 %1181 }
 0x854   :  { %8686 = vmatprep.subr.mxu0 %v10943_v41 }
 0x85a   :  { %8684 = vmatmul.mubr.msk.f32.vlgmr.msra.gmra.mrb[18].mxu0 %vm1287_vm1, %v2656_v15  ;;  %v2808_v15 = vrot.slane %v1283_v2, 4 }
 0x85b   :  { %8687 = vmatpush3.msra.mxu0 %v10445_v23  ;;  %8688 = vmatprep.mubr.msk.f32.mxu0 %vm9643_vm0, %v10943_v41  ;;  %v10465_v23 = vld [vmem:[%s10906_s9 + $0xa8] sm:$0xff] }
 0x85c   :  { %8691 = vmatprep.subr.mxu0 %v10943_v41  ;;  %10971 = vst [vmem:[#allocation36_spill] sm:$0xff] %v10465_v23 }
 0x862   :  { %8689 = vmatmul.mubr.msk.f32.vlgmr.msra.gmra.mrb[18].mxu0 %vm1287_vm1, %v2732_v62  ;;  %v2884_v62 = vrot.slane %v1283_v2, 5 }
 0x863   :  { %8692 = vmatpush3.msra.mxu0 %v10455_v39  ;;  %8693 = vmatprep.mubr.msk.f32.mxu0 %vm9643_vm0, %v10943_v41  ;;  %v10475_v39 = vld [vmem:[%s10906_s9 + $0xb0] sm:$0xff] }
 0x864   :  { %8696 = vmatprep.subr.mxu0 %v10943_v41  ;;  %10972 = vst [vmem:[#allocation37_spill] sm:$0xff] %v10475_v39 }
 0x86a   :  { %8694 = vmatmul.mubr.msk.f32.vlgmr.msra.gmra.mrb[18].mxu0 %vm1287_vm1, %v2808_v15  ;;  %v2960_v15 = vrot.slane %v1283_v2, 6 }
 0x86b   :  { %8697 = vmatpush3.msra.mxu0 %v10465_v23  ;;  %8698 = vmatprep.mubr.msk.f32.mxu0 %vm9643_vm0, %v10943_v41  ;;  %v10485_v23 = vld [vmem:[%s10906_s9 + $0xb8] sm:$0xff] }
 0x86c   :  { %8701 = vmatprep.subr.mxu0 %v10943_v41  ;;  %10973 = vst [vmem:[#allocation38_spill] sm:$0xff] %v10485_v23 }
 0x872   :  { %8699 = vmatmul.mubr.msk.f32.vlgmr.msra.gmra.mrb[18].mxu0 %vm1287_vm1, %v2884_v62  ;;  %v3036_v62 = vrot.slane %v1283_v2, 7  ;;  %v10508_v2 = vld [vmem:[%s10906_s9 + $0xc8] sm:$0xff] }
 0x873   :  { %8702 = vmatpush3.msra.mxu0 %v10475_v39  ;;  %8703 = vmatprep.mubr.msk.f32.mxu0 %vm9643_vm0, %v10943_v41  ;;  %v10495_v39 = vld [vmem:[%s10906_s9 + $0xc0] sm:$0xff]  ;;  %10975 = vst [vmem:[#allocation40_spill] sm:$0xff] %v10508_v2 }
 0x874   :  { %8706 = vmatprep.subr.mxu0 %v10943_v41  ;;  %10974 = vst [vmem:[#allocation39_spill] sm:$0xff] %v10495_v39 }
 0x87a   :  { %8704 = vmatmul.mubr.msk.f32.vlgmr.msra.gmra.mrb[18].mxu0 %vm1287_vm1, %v2960_v15  ;;  %v1278_v15 = vadd.f32 %v10226_v55, %v1182_v16  ;;  %v10520_v16 = vld [vmem:[%s10906_s9 + $0xd0] sm:$0xff] }
 0x87b   :  { %8707 = vmatpush3.msra.mxu0 %v10485_v23  ;;  %8708 = vmatprep.mubr.msk.f32.mxu0 %vm9643_vm0, %v10943_v41  ;;  %10976 = vst [vmem:[#allocation41_spill] sm:$0xff] %v10520_v16 }
 0x87c   :  { %8711 = vmatprep.subr.mxu0 %v10943_v41  ;;  %v10503_v23 = vmax.f32 %v1278_v15, 0.0  ;;  %v10531_v15 = vld [vmem:[%s10906_s9 + $0xd8] sm:$0xff] }
 0x87d   :  { %10977 = vst [vmem:[#allocation42_spill] sm:$0xff] %v10531_v15 }
 0x87e   :  { %v3188_v55 = vrot.slane %v10503_v23, 1 }
 0x882   :  { %8709 = vmatmul.mubr.msk.f32.vlgmr.msra.gmra.mrb[18].mxu0 %vm1287_vm1, %v3036_v62  ;;  %v3264_v62 = vrot.slane %v10503_v23, 2 }
 0x883   :  { %8712 = vmatpush3.msra.mxu0 %v10495_v39  ;;  %8713 = vmatprep.mubr.msk.f32.mxu0 %vm9643_vm0, %v10943_v41 }
 0x884   :  { %8716 = vmatprep.subr.mxu0 %v10943_v41 }
 0x88a   :  { %8714 = vmatmul.mubr.msk.f32.vlgmr.msra.gmra.mrb[18].mxu0 %vm1287_vm1, %v10503_v23 }
 0x88b   :  { %8717 = vmatpush3.msra.mxu0 %v10508_v2  ;;  %8718 = vmatprep.mubr.msk.f32.mxu0 %vm9643_vm0, %v10943_v41  ;;  %v3878_v2 = vpop.permute.xlu1 %3877 }
 0x88c   :  { %8721 = vmatprep.subr.mxu0 %v10943_v41 }
 0x88f   :  { %v3888_v4 = vpop.permute.xlu1 %3887 }
 0x892   :  { %8719 = vmatmul.mubr.msk.f32.vlgmr.msra.gmra.mrb[18].mxu0 %vm1287_vm1, %v3188_v55  ;;  %v3340_v55 = vrot.slane %v10503_v23, 3 }
 0x893   :  { %8722 = vmatpush3.msra.mxu0 %v10520_v16  ;;  %8723 = vmatprep.mubr.msk.f32.mxu0 %vm9643_vm0, %v10943_v41  ;;  %v10542_v16 = vld [vmem:[%s10906_s9 + $0xe0] sm:$0xff] }
 0x894   :  { %8726 = vmatprep.subr.mxu0 %v10943_v41  ;;  %10978 = vst [vmem:[#allocation43_spill] sm:$0xff] %v10542_v16 }
 0x89a   :  { %8724 = vmatmul.mubr.msk.f32.vlgmr.msra.gmra.mrb[18].mxu0 %vm1287_vm1, %v3264_v62  ;;  %v3416_v62 = vrot.slane %v10503_v23, 4 }
 0x89b   :  { %8727 = vmatpush3.msra.mxu0 %v10531_v15  ;;  %8728 = vmatprep.mubr.msk.f32.mxu0 %vm9643_vm0, %v10943_v41  ;;  %v10553_v15 = vld [vmem:[%s10906_s9 + $0xe8] sm:$0xff] }
 0x89c   :  { %8731 = vmatprep.subr.mxu0 %v10943_v41  ;;  %10979 = vst [vmem:[#allocation44_spill] sm:$0xff] %v10553_v15 }
 0x8a2   :  { %8729 = vmatmul.mubr.msk.f32.vlgmr.msra.gmra.mrb[18].mxu0 %vm1287_vm1, %v3340_v55 }
 0x8a3   :  { %8732 = vmatpush3.msra.mxu0 %v10542_v16  ;;  %8733 = vmatprep.mubr.msk.f32.mxu0 %vm9643_vm0, %v10943_v41 }
 0x8a4   :  { %8736 = vmatprep.subr.mxu0 %v10943_v41 }
 0x8aa   :  { %8734 = vmatmul.mubr.msk.f32.vlgmr.msra.gmra.mrb[18].mxu0 %vm1287_vm1, %v3416_v62  ;;  %v3492_v62 = vrot.slane %v10503_v23, 5 }
 0x8ab   :  { %8737 = vmatpush3.msra.mxu0 %v10553_v15  ;;  %8738 = vmatprep.mubr.msk.f32.mxu0 %vm9643_vm0, %v10943_v41  ;;  %v10565_v15 = vld [vmem:[%s10906_s9 + $0xf0] sm:$0xff] }
 0x8ac   :  { %v8769_v55 = vpop.f32.mrb[18].mxu1  ;;  %8741 = vmatprep.subr.mxu0 %v10943_v41 }
 0x8ad   :  { %v3974_v16 = vadd.f32 %v8769_v55, %v3878_v2  ;;  %v3968_v39 = vpop.f32.mrb[19].mxu1 }
 0x8ae   :  { %v3969_v51 = vadd.f32 %v3968_v39, %v10200_v8 }
 0x8af   :  { %vm3988_vm9 = vcmp.gt.f32.partialorder %v3974_v16, 0.0  ;;  %v3992_v17 = vmul.f32 0.1, %v3974_v16 }
 0x8b0   :  { %vm3987_vm10 = vcmp.gt.f32.partialorder %v3969_v51, 0.0  ;;  %v3991_v6 = vmul.f32 0.1, %v3969_v51  ;;  %v8772_v0 = vpop.f32.mrb[20].mxu1 }
 0x8b1   :  { %v3984_v61 = vadd.f32 %v8772_v0, %v3888_v4  ;;  %v3978_v22 = vpop.f32.mrb[21].mxu1  ;;  %v3996_v41 = vsel %vm3988_vm9, %v3974_v16, %v3992_v17 }
 0x8b2   :  { %v3979_v2 = vadd.f32 %v3978_v22, %v10202_v9  ;;  %8739 = vmatmul.mubr.msk.f32.vlgmr.msra.gmra.mrb[18].mxu0 %vm1287_vm1, %v3492_v62  ;;  %v3995_v8 = vsel %vm3987_vm10, %v3969_v51, %v3991_v6  ;;  %v3568_v22 = vrot.slane %v10503_v23, 6 }
 0x8b3   :  { %vm3990_vm11 = vcmp.gt.f32.partialorder %v3984_v61, 0.0  ;;  %v3994_v39 = vmul.f32 0.1, %v3984_v61  ;;  %v9169_v55 = vpack.c.bf16 %v3996_v41, %v3995_v8  ;;  %8742 = vmatpush3.msra.mxu0 %v10565_v15  ;;  %8743 = vmatprep.mubr.msk.f32.mxu0 %vm9643_vm0, %v10980_v7  ;;  %v10577_v41 = vld [vmem:[%s10906_s9 + $0xf8] sm:$0xff] }
 0x8b4   :  { %vm3989_vm12 = vcmp.gt.f32.partialorder %v3979_v2, 0.0  ;;  %v3993_v19 = vmul.f32 0.1, %v3979_v2  ;;  %8746 = vmatprep.subr.mxu0 %v10980_v7 }
 0x8b5   :  { %9170 = vmatprep.subr.bf16.mxu1 %v9169_v55  ;;  %v3998_v0 = vsel %vm3990_vm11, %v3984_v61, %v3994_v39  ;;  %v4015_v61 = vpop.permute.xlu1 %4014 }
 0x8b6   :  { %9172 = vmatpush3.bf16.msra.mxu1 %v9169_v55  ;;  %v3997_v4 = vsel %vm3989_vm12, %v3979_v2, %v3993_v19  ;;  %v3644_v19 = vrot.slane %v10503_v23, 7  ;;  %v1285_v23 = vld [vmem:[#allocation9] sm:$0x1] }
 0x8b7   :  { %v9173_v9 = vpack.c.bf16 %v3998_v0, %v3997_v4 }
 0x8b9   :  { %9174 = vmatprep.subr.bf16.mxu1 %v9173_v9  ;;  %v4025_v16 = vpop.permute.xlu1 %4024 }
 0x8ba   :  { %8744 = vmatmul.mubr.msk.f32.vlgmr.msra.gmra.mrb[18].mxu0 %vm1287_vm1, %v3568_v22  ;;  %9176 = vmatpush3.bf16.msra.mxu1 %v9173_v9 }
 0x8bb   :  { %8747 = vmatpush3.msra.mxu0 %v10577_v41  ;;  %8748 = vmatprep.mubr.msk.f32.mxu0 %vm9643_vm0, %v10980_v7 }
 0x8bd   :  { %8782 = vmatmul.mubr.msk.f32.vlgmr.msra.gmra.mrb[22].mxu1 %vm341_vm2, %v10041_v27 }
 0x8be   :  { %8784 = vmatprep.mubr.msk.f32.mxu1 %vm341_vm2, %v10043_v28 }
 0x8c1   :  { %8785 = vmatmul.mubr.msk.f32.gmra.mrb[24].mxu1 %vm341_vm2, %v10049_v29 }
 0x8c2   :  { %8749 = vmatmul.mubr.msk.f32.vlgmr.msra.gmra.mrb[18].mxu0 %vm1287_vm1, %v3644_v19  ;;  %8795 = vmatprep.mubr.msk.f32.mxu1 %vm341_vm2, %v10053_v30 }
 0x8c3   :  { %9025 = vmatprep.mubr.msk.f32.mxu0 %vm9643_vm0, %v10980_v7 }
 0x990   :  { %v8783_v6 = vpop.f32.mrb[22].mxu1 }
 0x991   :  { %v4111_v17 = vadd.f32 %v8783_v6, %v4015_v61  ;;  %v4105_v27 = vpop.f32.mrb[23].mxu1 }
 0x992   :  { %v4106_v51 = vadd.f32 %v4105_v27, %v10204_v34 }
 0x993   :  { %v4125_v28 = vadd.f32 %v4111_v17, %v10243_v38 }
 0x994   :  { %v4124_v29 = vadd.f32 %v4106_v51, %v10245_v40  ;;  %v8786_v62 = vpop.f32.mrb[24].mxu1 }
 0x995   :  { %vm4129_vm13 = vcmp.gt.f32.partialorder %v4125_v28, 0.0  ;;  %v4133_v2 = vmul.f32 0.1, %v4125_v28  ;;  %v4121_v8 = vadd.f32 %v8786_v62, %v4025_v16  ;;  %v3713_v30 = vpop.f32.mrb[18].mxu0  ;;  %v4115_v39 = vpop.f32.mrb[25].mxu1 }
 0x996   :  { %vm4128_vm15 = vcmp.gt.f32.partialorder %v4124_v29, 0.0  ;;  %v4132_v55 = vmul.f32 0.1, %v4124_v29  ;;  %v9269_v0 = vadd.f32 %v3713_v30, %v1285_v23  ;;  %v4116_v4 = vadd.f32 %v4115_v39, %v10206_v43  ;;  %v8750_v9 = vpop.f32.mrb[19].mxu0  ;;  %v4156_v43 = vpop.permute.xlu1 %4155 }
 0x997   :  { %v4127_v34 = vadd.f32 %v4121_v8, %v10255_v20  ;;  %v4137_v38 = vsel %vm4129_vm13, %v4125_v28, %v4133_v2 }
 0x998   :  { %3719 = vst.msk [vmem:[#allocation2] sm:$0x1] %vm3718_vm14, %v9269_v0  ;;  %v4126_v40 = vadd.f32 %v4116_v4, %v10258_v5  ;;  %v4136_v22 = vsel %vm4128_vm15, %v4124_v29, %v4132_v55 }
 0x999   :  { %vm4131_vm3 = vcmp.gt.f32.partialorder %v4127_v34, 0.0  ;;  %v4135_v19 = vmul.f32 0.1, %v4127_v34  ;;  %v9177_v61 = vpack.c.bf16 %v4137_v38, %v4136_v22 }
 0x99a   :  { %vm4130_vm4 = vcmp.gt.f32.partialorder %v4126_v40, 0.0  ;;  %v4134_v6 = vmul.f32 0.1, %v4126_v40  ;;  %v4166_v29 = vpop.permute.xlu1 %4165 }
 0x99b   :  { %9178 = vmatprep.subr.bf16.mxu1 %v9177_v61  ;;  %v4139_v17 = vsel %vm4131_vm3, %v4127_v34, %v4135_v19 }
 0x99c   :  { %9180 = vmatpush3.bf16.msra.mxu1 %v9177_v61  ;;  %v4138_v27 = vsel %vm4130_vm4, %v4126_v40, %v4134_v6 }
 0x99d   :  { %v9181_v51 = vpack.c.bf16 %v4139_v17, %v4138_v27 }
 0x99f   :  { %9182 = vmatprep.subr.bf16.mxu1 %v9181_v51 }
 0x9a0   :  { %9184 = vmatpush3.bf16.msra.mxu1 %v9181_v51 }
 0x9a3   :  { %8796 = vmatmul.mubr.msk.f32.vlgmr.msra.gmra.mrb[26].mxu1 %vm341_vm2, %v10073_v58 }
 0x9a4   :  { %8798 = vmatprep.mubr.msk.f32.mxu1 %vm341_vm2, %v10075_v59 }
 0x9a7   :  { %8799 = vmatmul.mubr.msk.f32.gmra.mrb[28].mxu1 %vm341_vm2, %v10081_v60 }
 0x9a8   :  { %8809 = vmatprep.mubr.msk.f32.mxu1 %vm341_vm2, %v10085_v1 }
 0xa76   :  { %v8797_v20 = vpop.f32.mrb[26].mxu1 }
 0xa77   :  { %v4252_v5 = vadd.f32 %v8797_v20, %v4156_v43  ;;  %v4246_v28 = vpop.f32.mrb[27].mxu1 }
 0xa78   :  { %v4247_v23 = vadd.f32 %v4246_v28, %v10208_v44 }
 0xa79   :  { %vm4266_vm5 = vcmp.gt.f32.partialorder %v4252_v5, 0.0  ;;  %v4270_v16 = vmul.f32 0.1, %v4252_v5 }
 0xa7a   :  { %vm4265_vm6 = vcmp.gt.f32.partialorder %v4247_v23, 0.0  ;;  %v4269_v58 = vmul.f32 0.1, %v4247_v23  ;;  %v8800_v62 = vpop.f32.mrb[28].mxu1 }
 0xa7b   :  { %v4262_v2 = vadd.f32 %v8800_v62, %v4166_v29  ;;  %v4256_v59 = vpop.f32.mrb[29].mxu1  ;;  %v4274_v8 = vsel %vm4266_vm5, %v4252_v5, %v4270_v16 }
 0xa7c   :  { %v4257_v60 = vadd.f32 %v4256_v59, %v10210_v45  ;;  %v4273_v30 = vsel %vm4265_vm6, %v4247_v23, %v4269_v58  ;;  %v4293_v45 = vpop.permute.xlu1 %4292 }
 0xa7d   :  { %vm4268_vm7 = vcmp.gt.f32.partialorder %v4262_v2, 0.0  ;;  %v4272_v1 = vmul.f32 0.1, %v4262_v2  ;;  %v9185_v39 = vpack.c.bf16 %v4274_v8, %v4273_v30 }
 0xa7e   :  { %vm4267_vm8 = vcmp.gt.f32.partialorder %v4257_v60, 0.0  ;;  %v4271_v55 = vmul.f32 0.1, %v4257_v60 }
 0xa7f   :  { %9186 = vmatprep.subr.bf16.mxu1 %v9185_v39  ;;  %v4276_v0 = vsel %vm4268_vm7, %v4262_v2, %v4272_v1 }
 0xa80   :  { %9188 = vmatpush3.bf16.msra.mxu1 %v9185_v39  ;;  %v4275_v44 = vsel %vm4267_vm8, %v4257_v60, %v4271_v55  ;;  %v4303_v6 = vpop.permute.xlu1 %4302 }
 0xa81   :  { %v9189_v4 = vpack.c.bf16 %v4276_v0, %v4275_v44 }
 0xa83   :  { %9190 = vmatprep.subr.bf16.mxu1 %v9189_v4 }
 0xa84   :  { %9192 = vmatpush3.bf16.msra.mxu1 %v9189_v4 }
 0xa87   :  { %8810 = vmatmul.mubr.msk.f32.vlgmr.msra.gmra.mrb[30].mxu1 %vm341_vm2, %v10089_v32 }
 0xa88   :  { %8812 = vmatprep.mubr.msk.f32.mxu1 %vm341_vm2, %v10091_v33 }
 0xa8b   :  { %8813 = vmatmul.mubr.msk.f32.gmra.mrb[32].mxu1 %vm341_vm2, %v10097_v35 }
 0xa8c   :  { %8823 = vmatprep.mubr.msk.f32.mxu1 %vm341_vm2, %v10101_v36 }
 0xb5a   :  { %v8811_v9 = vpop.f32.mrb[30].mxu1 }
 0xb5b   :  { %v4389_v34 = vadd.f32 %v8811_v9, %v4293_v45  ;;  %v4383_v40 = vpop.f32.mrb[31].mxu1 }
 0xb5c   :  { %v4384_v19 = vadd.f32 %v4383_v40, %v10212_v52 }
 0xb5d   :  { %v4403_v61 = vadd.f32 %v4389_v34, %v4137_v38 }
 0xb5e   :  { %v4402_v51 = vadd.f32 %v4384_v19, %v4136_v22  ;;  %v8814_v43 = vpop.f32.mrb[32].mxu1 }
 0xb5f   :  { %vm4407_vm9 = vcmp.gt.f32.partialorder %v4403_v61, 0.0  ;;  %v4411_v32 = vmul.f32 0.1, %v4403_v61  ;;  %v4399_v20 = vadd.f32 %v8814_v43, %v4303_v6  ;;  %v4393_v33 = vpop.f32.mrb[33].mxu1 }
 0xb60   :  { %vm4406_vm10 = vcmp.gt.f32.partialorder %v4402_v51, 0.0  ;;  %v4410_v5 = vmul.f32 0.1, %v4402_v51  ;;  %v4394_v35 = vadd.f32 %v4393_v33, %v10214_v53  ;;  %v4434_v53 = vpop.permute.xlu1 %4433 }
 0xb61   :  { %v4405_v28 = vadd.f32 %v4399_v20, %v4139_v17  ;;  %v4415_v36 = vsel %vm4407_vm9, %v4403_v61, %v4411_v32 }
 0xb62   :  { %v4404_v23 = vadd.f32 %v4394_v35, %v4138_v27  ;;  %v4414_v16 = vsel %vm4406_vm10, %v4402_v51, %v4410_v5 }
 0xb63   :  { %vm4409_vm11 = vcmp.gt.f32.partialorder %v4405_v28, 0.0  ;;  %v4413_v29 = vmul.f32 0.1, %v4405_v28  ;;  %v9193_v58 = vpack.c.bf16 %v4415_v36, %v4414_v16 }
 0xb64   :  { %vm4408_vm12 = vcmp.gt.f32.partialorder %v4404_v23, 0.0  ;;  %v4412_v52 = vmul.f32 0.1, %v4404_v23  ;;  %v4444_v60 = vpop.permute.xlu1 %4443 }
 0xb65   :  { %9194 = vmatprep.subr.bf16.mxu1 %v9193_v58  ;;  %v4417_v38 = vsel %vm4409_vm11, %v4405_v28, %v4413_v29 }
 0xb66   :  { %9196 = vmatpush3.bf16.msra.mxu1 %v9193_v58  ;;  %v4416_v22 = vsel %vm4408_vm12, %v4404_v23, %v4412_v52 }
 0xb67   :  { %v9197_v62 = vpack.c.bf16 %v4417_v38, %v4416_v22 }
 0xb69   :  { %9198 = vmatprep.subr.bf16.mxu1 %v9197_v62 }
 0xb6a   :  { %9200 = vmatpush3.bf16.msra.mxu1 %v9197_v62 }
 0xb6d   :  { %8824 = vmatmul.mubr.msk.f32.vlgmr.msra.gmra.mrb[34].mxu1 %vm341_vm2, %v10121_v56 }
 0xb6e   :  { %8826 = vmatprep.mubr.msk.f32.mxu1 %vm341_vm2, %v10123_v12 }
 0xb71   :  { %8827 = vmatmul.mubr.msk.f32.gmra.mrb[36].mxu1 %vm341_vm2, %v10129_v13 }
 0xb72   :  { %8837 = vmatprep.mubr.msk.f32.mxu1 %vm341_vm2, %v10133_v14 }
 0xc40   :  { %v8825_v17 = vpop.f32.mrb[34].mxu1 }
 0xc41   :  { %v4530_v27 = vadd.f32 %v8825_v17, %v4434_v53  ;;  %v4524_v2 = vpop.f32.mrb[35].mxu1 }
 0xc42   :  { %v4525_v59 = vadd.f32 %v4524_v2, %v10216_v54 }
 0xc43   :  { %vm4544_vm13 = vcmp.gt.f32.partialorder %v4530_v27, 0.0  ;;  %v4548_v8 = vmul.f32 0.1, %v4530_v27 }
 0xc44   :  { %vm4543_vm15 = vcmp.gt.f32.partialorder %v4525_v59, 0.0  ;;  %v4547_v56 = vmul.f32 0.1, %v4525_v59  ;;  %v8828_v30 = vpop.f32.mrb[36].mxu1 }
 0xc45   :  { %v4540_v1 = vadd.f32 %v8828_v30, %v4444_v60  ;;  %v4534_v12 = vpop.f32.mrb[37].mxu1  ;;  %v4552_v39 = vsel %vm4544_vm13, %v4530_v27, %v4548_v8  ;;  %v10983_v8 = vld [vmem:[#allocation26_spill] sm:$0xff] }
 0xc46   :  { %v4535_v13 = vadd.f32 %v4534_v12, %v10218_v57  ;;  %v4551_v55 = vsel %vm4543_vm15, %v4525_v59, %v4547_v56  ;;  %v4571_v57 = vpop.permute.xlu1 %4570  ;;  %v10984_v56 = vld [vmem:[#allocation27_spill] sm:$0xff] }
 0xc47   :  { %vm4546_vm3 = vcmp.gt.f32.partialorder %v4540_v1, 0.0  ;;  %v4550_v14 = vmul.f32 0.1, %v4540_v1  ;;  %v9201_v0 = vpack.c.bf16 %v4552_v39, %v4551_v55  ;;  %v10986_v39 = vld [vmem:[#allocation29_spill] sm:$0xff]  ;;  %v10987_v55 = vld [vmem:[#allocation30_spill] sm:$0xff] }
 0xc48   :  { %vm4545_vm4 = vcmp.gt.f32.partialorder %v4535_v13, 0.0  ;;  %v4549_v44 = vmul.f32 0.1, %v4535_v13 }
 0xc49   :  { %9202 = vmatprep.subr.bf16.mxu1 %v9201_v0  ;;  %v4554_v4 = vsel %vm4546_vm3, %v4540_v1, %v4550_v14  ;;  %v10985_v1 = vld [vmem:[#allocation28_spill] sm:$0xff] }
 0xc4a   :  { %9204 = vmatpush3.bf16.msra.mxu1 %v9201_v0  ;;  %v4553_v54 = vsel %vm4545_vm4, %v4535_v13, %v4549_v44  ;;  %v4581_v6 = vpop.permute.xlu1 %4580  ;;  %v10988_v44 = vld [vmem:[#allocation31_spill] sm:$0xff] }
 0xc4b   :  { %v9205_v45 = vpack.c.bf16 %v4554_v4, %v4553_v54 }
 0xc4d   :  { %9206 = vmatprep.subr.bf16.mxu1 %v9205_v45 }
 0xc4e   :  { %9208 = vmatpush3.bf16.msra.mxu1 %v9205_v45  ;;  %v4707_v52 = vpop.permute.xlu1 %4706  ;;  %v10989_v45 = vld [vmem:[#allocation32_spill] sm:$0xff] }
 0xc51   :  { %8838 = vmatmul.mubr.msk.f32.vlgmr.msra.gmra.mrb[38].mxu1 %vm341_vm2, %v10137_v46 }
 0xc52   :  { %8840 = vmatprep.mubr.msk.f32.mxu1 %vm341_vm2, %v10139_v47  ;;  %v4712_v17 = vpop.permute.xlu1 %4711 }
 0xc55   :  { %8841 = vmatmul.mubr.msk.f32.gmra.mrb[40].mxu1 %vm341_vm2, %v10145_v48 }
 0xc56   :  { %8851 = vmatprep.mubr.msk.f32.mxu1 %vm341_vm2, %v10152_v50  ;;  %v4717_v0 = vpop.permute.xlu1 %4716 }
 0xd24   :  { %v8839_v9 = vpop.f32.mrb[38].mxu1 }
 0xd25   :  { %v4667_v34 = vadd.f32 %v8839_v9, %v4571_v57  ;;  %v4661_v40 = vpop.f32.mrb[39].mxu1  ;;  %v10990_v9 = vld [vmem:[#allocation33_spill] sm:$0xff] }
 0xd26   :  { %v4662_v19 = vadd.f32 %v4661_v40, %v10220_v3  ;;  %v10991_v40 = vld [vmem:[#allocation34_spill] sm:$0xff] }
 0xd27   :  { %v4681_v61 = vadd.f32 %v4667_v34, %v4415_v36 }
 0xd28   :  { %v4680_v51 = vadd.f32 %v4662_v19, %v4414_v16  ;;  %v8842_v43 = vpop.f32.mrb[40].mxu1 }
 0xd29   :  { %vm4685_vm5 = vcmp.gt.f32.partialorder %v4681_v61, 0.0  ;;  %v4689_v46 = vmul.f32 0.1, %v4681_v61  ;;  %v4677_v32 = vadd.f32 %v8842_v43, %v4581_v6  ;;  %v4671_v47 = vpop.f32.mrb[41].mxu1 }
 0xd2a   :  { %vm4684_vm6 = vcmp.gt.f32.partialorder %v4680_v51, 0.0  ;;  %v4688_v20 = vmul.f32 0.1, %v4680_v51  ;;  %v4672_v48 = vadd.f32 %v4671_v47, %v10222_v49  ;;  %v9416_v49 = vld [vmem:[%s10904_s7 + $0x10] sm:$0xff]  ;;  %v10995_v47 = vld [vmem:[#allocation38_spill] sm:$0xff] }
 0xd2b   :  { %v4683_v33 = vadd.f32 %v4677_v32, %v4417_v38  ;;  %v4693_v50 = vsel %vm4685_vm5, %v4681_v61, %v4689_v46  ;;  %v10992_v61 = vld [vmem:[#allocation35_spill] sm:$0xff]  ;;  %v10994_v46 = vld [vmem:[#allocation37_spill] sm:$0xff] }
 0xd2c   :  { %v4682_v5 = vadd.f32 %v4672_v48, %v4416_v22  ;;  %v4692_v35 = vsel %vm4684_vm6, %v4680_v51, %v4688_v20  ;;  %v10993_v51 = vld [vmem:[#allocation36_spill] sm:$0xff]  ;;  %v4722_v48 = vpop.permute.xlu1 %4721 }
 0xd2d   :  { %vm4687_vm7 = vcmp.gt.f32.partialorder %v4683_v33, 0.0  ;;  %v4691_v28 = vmul.f32 0.1, %v4683_v33  ;;  %v9209_v23 = vpack.c.bf16 %v4693_v50, %v4692_v35  ;;  %v10997_v35 = vld [vmem:[#allocation40_spill] sm:$0xff] }
 0xd2e   :  { %vm4686_vm8 = vcmp.gt.f32.partialorder %v4682_v5, 0.0  ;;  %v4690_v3 = vmul.f32 0.1, %v4682_v5 }
 0xd2f   :  { %9210 = vmatprep.subr.bf16.mxu1 %v9209_v23  ;;  %v4695_v36 = vsel %vm4687_vm7, %v4683_v33, %v4691_v28  ;;  %v10996_v33 = vld [vmem:[#allocation39_spill] sm:$0xff] }
 0xd30   :  { %9212 = vmatpush3.bf16.msra.mxu1 %v9209_v23  ;;  %v4694_v16 = vsel %vm4686_vm8, %v4682_v5, %v4690_v3  ;;  %v10998_v23 = vld [vmem:[#allocation41_spill] sm:$0xff] }
 0xd31   :  { %v9213_v29 = vpack.c.bf16 %v4695_v36, %v4694_v16  ;;  %v10999_v36 = vld [vmem:[#allocation42_spill] sm:$0xff] }
 0xd33   :  { %9214 = vmatprep.subr.bf16.mxu1 %v9213_v29 }
 0xd34   :  { %9216 = vmatpush3.bf16.msra.mxu1 %v9213_v29  ;;  %v11000_v29 = vld [vmem:[#allocation43_spill] sm:$0xff] }
 0xd35   :  { %8857 = vmatprep.subr.mxu1 %v10980_v7 }
 0xd37   :  { %8852 = vmatmul.mubr.msk.f32.vlgmr.msra.gmra.mrb[42].mxu1 %vm341_vm2, %v10167_v10 }
 0xd38   :  { %8854 = vmatprep.mubr.msk.f32.mxu1 %vm341_vm2, %v9416_v49  ;;  %8858 = vmatpush3.msra.mxu1 %v10194_v42 }
 0xd39   :  { %8862 = vmatprep.subr.mxu1 %v10980_v7 }
 0xd3b   :  { %8855 = vmatmul.mubr.msk.f32.gmra.mrb[44].mxu1 %vm341_vm2, %v10172_v11 }
 0xd3c   :  { %8859 = vmatprep.mubr.msk.f32.mxu1 %vm9643_vm0, %v10980_v7 }
 0xe0a   :  { %v8853_v58 = vpop.f32.mrb[42].mxu1 }
 0xe0b   :  { %v4802_v38 = vpop.f32.mrb[43].mxu1 }
 0xe0c   :  { %v4803_v10 = vadd.f32 %v4802_v38, %v4707_v52 }
 0xe0e   :  { %v4821_v22 = vmax.f32 %v4803_v10, 0.0  ;;  %v10655_v62 = vpop.f32.mrb[44].mxu1 }
 0xe0f   :  { %v10657_v53 = vpop.f32.mrb[45].mxu1  ;;  %v4818_v50 = vadd.f32 %v10655_v62, %v4722_v48  ;;  %v7232_v62 = vld [vmem:[#allocation11 + $0x8] sm:$0xff] }
 0xe10   :  { %8860 = vmatmul.mubr.msk.f32.vlgmr.msra.gmra.mrb[46].mxu1 %vm1287_vm1, %v4821_v22  ;;  %v4902_v11 = vrot.slane %v4821_v22, 1  ;;  %v4977_v42 = vrot.slane %v4821_v22, 2  ;;  %v4813_v4 = vadd.f32 %v10657_v53, %v4717_v0  ;;  %v7233_v53 = vld [vmem:[#allocation11 + $0x10] sm:$0xff] }
 0xe11   :  { %8863 = vmatpush3.msra.mxu1 %v10235_v21  ;;  %8864 = vmatprep.mubr.msk.f32.mxu1 %vm9643_vm0, %v10980_v7  ;;  %v5052_v21 = vrot.slane %v4821_v22, 3  ;;  %v4824_v5 = vmax.f32 %v4818_v50, 0.0 }
 0xe12   :  { %8867 = vmatprep.subr.mxu1 %v10980_v7  ;;  %v4823_v54 = vmax.f32 %v4813_v4, 0.0 }
 0xe13   :  { %v6702_v28 = vrot.slane %v4824_v5, 1  ;;  %v6777_v3 = vrot.slane %v4824_v5, 2  ;;  %v6852_v16 = vrot.slane %v4824_v5, 3  ;;  %v6927_v49 = vrot.slane %v4824_v5, 4 }
 0xe14   :  { %v6102_v57 = vrot.slane %v4823_v54, 1  ;;  %v6177_v34 = vrot.slane %v4823_v54, 2  ;;  %v6252_v19 = vrot.slane %v4823_v54, 3  ;;  %v6327_v6 = vrot.slane %v4823_v54, 4 }
 0xe15   :  { %v6402_v43 = vrot.slane %v4823_v54, 5  ;;  %v6477_v32 = vrot.slane %v4823_v54, 6  ;;  %v6552_v20 = vrot.slane %v4823_v54, 7  ;;  %v7002_v52 = vrot.slane %v4824_v5, 5 }
 0xe16   :  { %v7077_v38 = vrot.slane %v4824_v5, 6  ;;  %v7152_v10 = vrot.slane %v4824_v5, 7 }
 0xe18   :  { %8865 = vmatmul.mubr.msk.f32.vlgmr.msra.gmra.mrb[46].mxu1 %vm1287_vm1, %v4902_v11 }
 0xe19   :  { %8868 = vmatpush3.msra.mxu1 %v10253_v18  ;;  %8869 = vmatprep.mubr.msk.f32.mxu1 %vm9643_vm0, %v10980_v7  ;;  %v5127_v18 = vrot.slane %v4821_v22, 4 }
 0xe1a   :  { %8872 = vmatprep.subr.mxu1 %v10980_v7 }
 0xe20   :  { %8870 = vmatmul.mubr.msk.f32.vlgmr.msra.gmra.mrb[46].mxu1 %vm1287_vm1, %v4977_v42  ;;  %v7234_v42 = vld [vmem:[#allocation11 + $0x18] sm:$0xff] }
 0xe21   :  { %8873 = vmatpush3.msra.mxu1 %v10270_v24  ;;  %8874 = vmatprep.mubr.msk.f32.mxu1 %vm9643_vm0, %v10980_v7  ;;  %v5202_v24 = vrot.slane %v4821_v22, 5 }
 0xe22   :  { %8877 = vmatprep.subr.mxu1 %v10980_v7 }
 0xe28   :  { %8875 = vmatmul.mubr.msk.f32.vlgmr.msra.gmra.mrb[46].mxu1 %vm1287_vm1, %v5052_v21  ;;  %v9221_v21 = vpack.c.bf16 %v7234_v42, %v7233_v53  ;;  %v7677_v42 = vld [vmem:[#allocation14 + $0x50] sm:$0xff] }
 0xe29   :  { %8878 = vmatpush3.msra.mxu1 %v10289_v25  ;;  %8879 = vmatprep.mubr.msk.f32.mxu1 %vm9643_vm0, %v10980_v7  ;;  %v5277_v25 = vrot.slane %v4821_v22, 6 }
 0xe2a   :  { %8882 = vmatprep.subr.mxu1 %v10980_v7 }
 0xe30   :  { %8880 = vmatmul.mubr.msk.f32.vlgmr.msra.gmra.mrb[46].mxu1 %vm1287_vm1, %v5127_v18 }
 0xe31   :  { %8883 = vmatpush3.msra.mxu1 %v10300_v63  ;;  %8884 = vmatprep.mubr.msk.f32.mxu1 %vm9643_vm0, %v10980_v7  ;;  %v5352_v63 = vrot.slane %v4821_v22, 7  ;;  %v7231_v22 = vld [vmem:[#allocation11] sm:$0xff] }
 0xe32   :  { %8887 = vmatprep.subr.mxu1 %v10980_v7  ;;  %v9218_v11 = vpack.c.bf16 %v7232_v62, %v7231_v22 }
 0xe38   :  { %8885 = vmatmul.mubr.msk.f32.vlgmr.msra.gmra.mrb[46].mxu1 %vm1287_vm1, %v5202_v24 }
 0xe39   :  { %8888 = vmatpush3.msra.mxu1 %v10311_v26  ;;  %8889 = vmatprep.mubr.msk.f32.mxu1 %vm9643_vm0, %v10980_v7  ;;  %v4808_v26 = vadd.f32 %v8853_v58, %v4712_v17  ;;  %v11001_v58 = vld [vmem:[#allocation44_spill] sm:$0xff] }
 0xe3a   :  { %8892 = vmatprep.subr.mxu1 %v10980_v7  ;;  %v7319_v17 = vld [vmem:[#allocation14 + $0x8] sm:$0xff] }
 0xe3b   :  { %v4822_v27 = vmax.f32 %v4808_v26, 0.0 }
 0xe3d   :  { %v5502_v2 = vrot.slane %v4822_v27, 1  ;;  %v5577_v59 = vrot.slane %v4822_v27, 2  ;;  %v5652_v60 = vrot.slane %v4822_v27, 3  ;;  %v5727_v30 = vrot.slane %v4822_v27, 4 }
 0xe3e   :  { %v5802_v12 = vrot.slane %v4822_v27, 5  ;;  %v5877_v13 = vrot.slane %v4822_v27, 6  ;;  %v5952_v14 = vrot.slane %v4822_v27, 7 }
 0xe40   :  { %8890 = vmatmul.mubr.msk.f32.vlgmr.msra.gmra.mrb[46].mxu1 %vm1287_vm1, %v5277_v25 }
 0xe41   :  { %8893 = vmatpush3.msra.mxu1 %v10322_v31  ;;  %8894 = vmatprep.mubr.msk.f32.mxu1 %vm9643_vm0, %v10980_v7  ;;  %v10981_v31 = vld [vmem:[#allocation24_spill] sm:$0xff] }
 0xe42   :  { %8897 = vmatprep.subr.mxu1 %v10980_v7 }
 0xe48   :  { %8895 = vmatmul.mubr.msk.f32.vlgmr.msra.gmra.mrb[46].mxu1 %vm1287_vm1, %v5352_v63  ;;  %v7318_v63 = vld [vmem:[#allocation14] sm:$0xff] }
 0xe49   :  { %8898 = vmatpush3.msra.mxu1 %v10333_v37  ;;  %8899 = vmatprep.mubr.msk.f32.mxu1 %vm9643_vm0, %v10980_v7  ;;  %v10982_v37 = vld [vmem:[#allocation25_spill] sm:$0xff] }
 0xe4a   :  { %8902 = vmatprep.subr.mxu1 %v10980_v7 }
 0xe50   :  { %8900 = vmatmul.mubr.msk.f32.vlgmr.msra.gmra.mrb[46].mxu1 %vm1287_vm1, %v4822_v27 }
 0xe51   :  { %8903 = vmatpush3.msra.mxu1 %v10981_v31  ;;  %8904 = vmatprep.mubr.msk.f32.mxu1 %vm9643_vm0, %v10980_v7  ;;  %v9224_v31 = vpack.c.bf16 %v7319_v17, %v7318_v63 }
 0xe52   :  { %8907 = vmatprep.subr.mxu1 %v10980_v7 }
 0xe58   :  { %8905 = vmatmul.mubr.msk.f32.vlgmr.msra.gmra.mrb[46].mxu1 %vm1287_vm1, %v5502_v2 }
 0xe59   :  { %8908 = vmatpush3.msra.mxu1 %v10982_v37  ;;  %8909 = vmatprep.mubr.msk.f32.mxu1 %vm9643_vm0, %v10980_v7  ;;  %v7320_v37 = vld [vmem:[#allocation14 + $0x10] sm:$0xff] }
 0xe5a   :  { %8912 = vmatprep.subr.mxu1 %v10980_v7 }
 0xe60   :  { %8910 = vmatmul.mubr.msk.f32.vlgmr.msra.gmra.mrb[46].mxu1 %vm1287_vm1, %v5577_v59  ;;  %v7321_v59 = vld [vmem:[#allocation14 + $0x18] sm:$0xff] }
 0xe61   :  { %8913 = vmatpush3.msra.mxu1 %v10983_v8  ;;  %8914 = vmatprep.mubr.msk.f32.mxu1 %vm9643_vm0, %v10980_v7  ;;  %v9227_v8 = vpack.c.bf16 %v7321_v59, %v7320_v37  ;;  %v7767_v59 = vld [vmem:[%s10912_s15 + $0x18] sm:$0xff] }
 0xe62   :  { %8917 = vmatprep.subr.mxu1 %v10980_v7 }
 0xe68   :  { %8915 = vmatmul.mubr.msk.f32.vlgmr.msra.gmra.mrb[46].mxu1 %vm1287_vm1, %v5652_v60  ;;  %v8179_v60 = vld [vmem:[#allocation12] ss:$0 sm:$0xff] }
 0xe69   :  { %8918 = vmatpush3.msra.mxu1 %v10984_v56  ;;  %8919 = vmatprep.mubr.msk.f32.mxu1 %vm9643_vm0, %v10980_v7 }
 0xe6a   :  { %8922 = vmatprep.subr.mxu1 %v10980_v7 }
 0xe70   :  { %8920 = vmatmul.mubr.msk.f32.vlgmr.msra.gmra.mrb[46].mxu1 %vm1287_vm1, %v5727_v30 }
 0xe71   :  { %8923 = vmatpush3.msra.mxu1 %v10985_v1  ;;  %8924 = vmatprep.mubr.msk.f32.mxu1 %vm9643_vm0, %v10980_v7 }
 0xe72   :  { %8927 = vmatprep.subr.mxu1 %v10980_v7 }
 0xe78   :  { %8925 = vmatmul.mubr.msk.f32.vlgmr.msra.gmra.mrb[46].mxu1 %vm1287_vm1, %v5802_v12 }
 0xe79   :  { %8928 = vmatpush3.msra.mxu1 %v10986_v39  ;;  %8929 = vmatprep.mubr.msk.f32.mxu1 %vm9643_vm0, %v10980_v7 }
 0xe7a   :  { %8932 = vmatprep.subr.mxu1 %v10980_v7 }
 0xe80   :  { %8930 = vmatmul.mubr.msk.f32.vlgmr.msra.gmra.mrb[46].mxu1 %vm1287_vm1, %v5877_v13  ;;  %v7407_v13 = vld [vmem:[#allocation11 + $0x20] sm:$0xff] }
 0xe81   :  { %8933 = vmatpush3.msra.mxu1 %v10987_v55  ;;  %8934 = vmatprep.mubr.msk.f32.mxu1 %vm9643_vm0, %v10980_v7  ;;  %v7408_v55 = vld [vmem:[#allocation11 + $0x28] sm:$0xff] }
 0xe82   :  { %8937 = vmatprep.subr.mxu1 %v10980_v7  ;;  %v9230_v0 = vpack.c.bf16 %v7408_v55, %v7407_v13 }
 0xe88   :  { %8935 = vmatmul.mubr.msk.f32.vlgmr.msra.gmra.mrb[46].mxu1 %vm1287_vm1, %v5952_v14  ;;  %v7409_v14 = vld [vmem:[#allocation11 + $0x30] sm:$0xff] }
 0xe89   :  { %8938 = vmatpush3.msra.mxu1 %v10988_v44  ;;  %8939 = vmatprep.mubr.msk.f32.mxu1 %vm9643_vm0, %v10980_v7  ;;  %v7410_v44 = vld [vmem:[#allocation11 + $0x38] sm:$0xff] }
 0xe8a   :  { %8942 = vmatprep.subr.mxu1 %v10980_v7  ;;  %v9233_v4 = vpack.c.bf16 %v7410_v44, %v7409_v14  ;;  %v7853_v44 = vld [vmem:[%s10914_s17 + $0x10] sm:$0xff] }
 0xe90   :  { %8940 = vmatmul.mubr.msk.f32.vlgmr.msra.gmra.mrb[46].mxu1 %vm1287_vm1, %v4823_v54  ;;  %v8181_v54 = vld [vmem:[#allocation15] ss:$0 sm:$0xff] }
 0xe91   :  { %8943 = vmatpush3.msra.mxu1 %v10989_v45  ;;  %8944 = vmatprep.mubr.msk.f32.mxu1 %vm9643_vm0, %v10980_v7 }
 0xe92   :  { %8947 = vmatprep.subr.mxu1 %v10980_v7 }
 0xe98   :  { %8945 = vmatmul.mubr.msk.f32.vlgmr.msra.gmra.mrb[46].mxu1 %vm1287_vm1, %v6102_v57 }
 0xe99   :  { %8948 = vmatpush3.msra.mxu1 %v10990_v9  ;;  %8949 = vmatprep.mubr.msk.f32.mxu1 %vm9643_vm0, %v10980_v7 }
 0xe9a   :  { %8952 = vmatprep.subr.mxu1 %v10980_v7 }
 0xea0   :  { %8950 = vmatmul.mubr.msk.f32.vlgmr.msra.gmra.mrb[46].mxu1 %vm1287_vm1, %v6177_v34  ;;  %v7496_v34 = vld [vmem:[#allocation14 + $0x20] sm:$0xff] }
 0xea1   :  { %8953 = vmatpush3.msra.mxu1 %v10991_v40  ;;  %8954 = vmatprep.mubr.msk.f32.mxu1 %vm9643_vm0, %v10980_v7  ;;  %v7497_v40 = vld [vmem:[#allocation14 + $0x28] sm:$0xff] }
 0xea2   :  { %8957 = vmatprep.subr.mxu1 %v10980_v7 }
 0xea8   :  { %8955 = vmatmul.mubr.msk.f32.vlgmr.msra.gmra.mrb[46].mxu1 %vm1287_vm1, %v6252_v19 }
 0xea9   :  { %8958 = vmatpush3.msra.mxu1 %v10992_v61  ;;  %8959 = vmatprep.mubr.msk.f32.mxu1 %vm9643_vm0, %v10980_v7 }
 0xeaa   :  { %8962 = vmatprep.subr.mxu1 %v10980_v7 }
 0xeb0   :  { %8960 = vmatmul.mubr.msk.f32.vlgmr.msra.gmra.mrb[46].mxu1 %vm1287_vm1, %v6327_v6  ;;  %v9236_v6 = vpack.c.bf16 %v7497_v40, %v7496_v34  ;;  %v8193_v40 = vld [vmem:[%s11002_s23] ss:$0 sm:$0xff] }
 0xeb1   :  { %8963 = vmatpush3.msra.mxu1 %v10993_v51  ;;  %8964 = vmatprep.mubr.msk.f32.mxu1 %vm9643_vm0, %v10980_v7 }
 0xeb2   :  { %8967 = vmatprep.subr.mxu1 %v10980_v7 }
 0xeb8   :  { %8965 = vmatmul.mubr.msk.f32.vlgmr.msra.gmra.mrb[46].mxu1 %vm1287_vm1, %v6402_v43  ;;  %v7498_v43 = vld [vmem:[#allocation14 + $0x30] sm:$0xff] }
 0xeb9   :  { %8968 = vmatpush3.msra.mxu1 %v10994_v46  ;;  %8969 = vmatprep.mubr.msk.f32.mxu1 %vm9643_vm0, %v10980_v7  ;;  %v7499_v46 = vld [vmem:[#allocation14 + $0x38] sm:$0xff] }
 0xeba   :  { %8972 = vmatprep.subr.mxu1 %v10980_v7 }
 0xec0   :  { %8970 = vmatmul.mubr.msk.f32.vlgmr.msra.gmra.mrb[46].mxu1 %vm1287_vm1, %v6477_v32  ;;  %v9239_v32 = vpack.c.bf16 %v7499_v46, %v7498_v43 }
 0xec1   :  { %8973 = vmatpush3.msra.mxu1 %v10995_v47  ;;  %8974 = vmatprep.mubr.msk.f32.mxu1 %vm9643_vm0, %v10980_v7  ;;  %v8183_v47 = vld [vmem:[#allocation12 + $0x1] ss:$0 sm:$0xff] }
 0xec2   :  { %8977 = vmatprep.subr.mxu1 %v10980_v7 }
 0xec8   :  { %8975 = vmatmul.mubr.msk.f32.vlgmr.msra.gmra.mrb[46].mxu1 %vm1287_vm1, %v6552_v20 }
 0xec9   :  { %8978 = vmatpush3.msra.mxu1 %v10996_v33  ;;  %8979 = vmatprep.mubr.msk.f32.mxu1 %vm9643_vm0, %v10980_v7 }
 0xeca   :  { %8982 = vmatprep.subr.mxu1 %v10980_v7 }
 0xed0   :  { %8980 = vmatmul.mubr.msk.f32.vlgmr.msra.gmra.mrb[46].mxu1 %vm1287_vm1, %v4824_v5 }
 0xed1   :  { %8983 = vmatpush3.msra.mxu1 %v10997_v35  ;;  %8984 = vmatprep.mubr.msk.f32.mxu1 %vm9643_vm0, %v10980_v7  ;;  %v7586_v35 = vld [vmem:[#allocation11 + $0x40] sm:$0xff] }
 0xed2   :  { %8987 = vmatprep.subr.mxu1 %v10980_v7 }
 0xed8   :  { %8985 = vmatmul.mubr.msk.f32.vlgmr.msra.gmra.mrb[46].mxu1 %vm1287_vm1, %v6702_v28  ;;  %v7587_v28 = vld [vmem:[#allocation11 + $0x48] sm:$0xff] }
 0xed9   :  { %8988 = vmatpush3.msra.mxu1 %v10998_v23  ;;  %8989 = vmatprep.mubr.msk.f32.mxu1 %vm9643_vm0, %v10980_v7  ;;  %v7588_v23 = vld [vmem:[#allocation11 + $0x50] sm:$0xff] }
 0xeda   :  { %8992 = vmatprep.subr.mxu1 %v10980_v7 }
 0xee0   :  { %8990 = vmatmul.mubr.msk.f32.vlgmr.msra.gmra.mrb[46].mxu1 %vm1287_vm1, %v6777_v3  ;;  %v9242_v3 = vpack.c.bf16 %v7587_v28, %v7586_v35 }
 0xee1   :  { %8993 = vmatpush3.msra.mxu1 %v10999_v36  ;;  %8994 = vmatprep.mubr.msk.f32.mxu1 %vm9643_vm0, %v10980_v7  ;;  %v7589_v36 = vld [vmem:[#allocation11 + $0x58] sm:$0xff] }
 0xee2   :  { %8997 = vmatprep.subr.mxu1 %v10980_v7 }
 0xee8   :  { %8995 = vmatmul.mubr.msk.f32.vlgmr.msra.gmra.mrb[46].mxu1 %vm1287_vm1, %v6852_v16  ;;  %v9245_v16 = vpack.c.bf16 %v7589_v36, %v7588_v23 }
 0xee9   :  { %8998 = vmatpush3.msra.mxu1 %v11000_v29  ;;  %8999 = vmatprep.mubr.msk.f32.mxu1 %vm9643_vm0, %v10980_v7  ;;  %v8185_v29 = vld [vmem:[#allocation15 + $0x1] ss:$0 sm:$0xff] }
 0xeea   :  { %9002 = vmatprep.subr.mxu1 %v10980_v7 }
 0xef0   :  { %9000 = vmatmul.mubr.msk.f32.vlgmr.msra.gmra.mrb[46].mxu1 %vm1287_vm1, %v6927_v49 }
 0xef1   :  { %9003 = vmatpush3.msra.mxu1 %v11001_v58  ;;  %9004 = vmatprep.mubr.msk.f32.mxu1 %vm9643_vm0, %v10980_v7 }
 0xef2   :  { %9007 = vmatprep.subr.mxu1 %v10980_v7 }
 0xef8   :  { %9005 = vmatmul.mubr.msk.f32.vlgmr.msra.gmra.mrb[46].mxu1 %vm1287_vm1, %v7002_v52 }
 0xef9   :  { %9008 = vmatpush3.msra.mxu1 %v10565_v15  ;;  %9009 = vmatprep.mubr.msk.f32.mxu1 %vm9643_vm0, %v10980_v7  ;;  %v9644_v15 = vmov 0.0|0.0  }
 0xefa   :  { %9012 = vmatprep.subr.mxu1 %v10980_v7  ;;  %9217 = vmatprep.subr.bf16.mxu0 %v9644_v15 }
 0xefb   :  { %9219 = vmatpush3.bf16.msra.mxu0 %v9218_v11 }
 0xefc   :  { %9220 = vmatprep.subr.bf16.mxu0 %v9644_v15 }
 0xeff   :  { %9222 = vmatpush3.bf16.msra.mxu0 %v9221_v21  ;;  %v7678_v21 = vld [vmem:[#allocation14 + $0x58] sm:$0xff] }
 0xf00   :  { %9010 = vmatmul.mubr.msk.f32.vlgmr.msra.gmra.mrb[46].mxu1 %vm1287_vm1, %v7077_v38  ;;  %9223 = vmatprep.subr.bf16.mxu0 %v9644_v15  ;;  %v7675_v38 = vld [vmem:[#allocation14 + $0x40] sm:$0xff] }
 0xf01   :  { %9013 = vmatpush3.msra.mxu1 %v10577_v41  ;;  %9014 = vmatprep.mubr.msk.f32.mxu1 %vm9643_vm0, %v10980_v7  ;;  %v4825_v41 = vld [vmem:[#allocation9] sm:$0x1] }
 0xf08   :  { %9015 = vmatmul.mubr.msk.f32.vlgmr.msra.gmra.mrb[46].mxu1 %vm1287_vm1, %v7152_v10  ;;  %v7676_v10 = vld [vmem:[#allocation14 + $0x48] sm:$0xff] }
 0xf09   :  { %v9248_v53 = vpack.c.bf16 %v7676_v10, %v7675_v38 }
 0xfdb   :  { %v7221_v18 = vpop.f32.mrb[46].mxu1 }
 0xfdc   :  { %v9270_v24 = vadd.f32 %v7221_v18, %v4825_v41  ;;  %v9016_v25 = vpop.f32.mrb[47].mxu1  ;;  %v9251_v41 = vpack.c.bf16 %v7678_v21, %v7677_v42  ;;  %v8187_v18 = vld [vmem:[#allocation12 + $0x2] ss:$0 sm:$0xff] }
 0xfde   :  { %7226 = vst.msk [vmem:[#allocation2 + $0x1] sm:$0x1] %vm3718_vm14, %v9270_v24 }
 0xfe5   :  { %v7227_v26 = vld [vmem:[#allocation2] sm:$0x3] }
 0xfe6   :  { %vm7228_vm1 = vcmp.gt.f32.partialorder %v7227_v26, 0.0  ;;  %v7229_v27 = vmul.f32 0.1, %v7227_v26 }
 0xfe8   :  { %v7230_v2 = vsel %vm7228_vm1, %v7227_v26, %v7229_v27  ;;  %v7764_v27 = vld [vmem:[%s10912_s15] sm:$0xff] }
 0xfe9   :  { %9026 = vmatmul.mubr.msk.f32.vlgmr.msra.gmra.mrb[20].mxu0 %vm341_vm2, %v7230_v2 }
 0xfea   :  { %9225 = vmatpush3.bf16.msra.mxu0 %v9224_v31  ;;  %9036 = vmatprep.mubr.msk.f32.mxu0 %vm9643_vm0, %v10980_v7  ;;  %v7765_v31 = vld [vmem:[%s10912_s15 + $0x8] sm:$0xff] }
 0xfeb   :  { %9226 = vmatprep.subr.bf16.mxu0 %v9644_v15  ;;  %v9254_v37 = vpack.c.bf16 %v7765_v31, %v7764_v27 }
 0xfee   :  { %9228 = vmatpush3.bf16.msra.mxu0 %v9227_v8 }
 0xfef   :  { %9229 = vmatprep.subr.bf16.mxu0 %v9644_v15 }
0x10bc   :  { %v7311_v56 = vpop.f32.mrb[20].mxu0 }
0x10bd   :  { %v7312_v30 = vadd.f32 %v8179_v60, %v7311_v56  ;;  %v9027_v1 = vpop.f32.mrb[21].mxu0  ;;  %v8189_v60 = vld [vmem:[#allocation15 + $0x2] ss:$0 sm:$0xff] }
0x10bf   :  { %vm7315_vm14 = vcmp.gt.f32.partialorder %v7312_v30, 0.0  ;;  %v7316_v12 = vmul.f32 0.1, %v7312_v30 }
0x10c1   :  { %v7317_v39 = vsel %vm7315_vm14, %v7312_v30, %v7316_v12  ;;  %v7851_v12 = vld [vmem:[%s10914_s17] sm:$0xff] }
0x10c2   :  { %9037 = vmatmul.mubr.msk.f32.vlgmr.msra.gmra.mrb[22].mxu0 %vm341_vm2, %v7317_v39  ;;  %v7852_v39 = vld [vmem:[%s10914_s17 + $0x8] sm:$0xff] }
0x10c3   :  { %9047 = vmatprep.mubr.msk.f32.mxu0 %vm9643_vm0, %v10980_v7  ;;  %9231 = vmatpush3.bf16.msra.mxu0 %v9230_v0  ;;  %v9260_v14 = vpack.c.bf16 %v7852_v39, %v7851_v12 }
0x10c4   :  { %9232 = vmatprep.subr.bf16.mxu0 %v9644_v15 }
0x10c7   :  { %9234 = vmatpush3.bf16.msra.mxu0 %v9233_v4  ;;  %v7854_v4 = vld [vmem:[%s10914_s17 + $0x18] sm:$0xff]  ;;  %s7942_s17 = sshll.u32 %s9645_s25, 4  ;;  %s7943_s17 = int_to_ptr.vmem [resolvable:$true] %s7942_s17 }
0x10c8   :  { %9235 = vmatprep.subr.bf16.mxu0 %v9644_v15  ;;  %p9598_p9 = scmp.lt.s32.totalorder %s7943_s17, %s7943_s17 }
0x1195   :  { %v7398_v45 = vpop.f32.mrb[22].mxu0 }
0x1196   :  { %v7399_v57 = vadd.f32 %v8181_v54, %v7398_v45  ;;  %v9038_v9 = vpop.f32.mrb[23].mxu0  ;;  %v9263_v54 = vpack.c.bf16 %v7854_v4, %v7853_v44  ;;  %v8191_v45 = vld [vmem:[%s10913_s16] ss:$0 sm:$0xff]  ;;  %s9593_s16 = scalar_lea.vmem %s7943_s17, 32 }
0x1197   :  { %p9594_p8 = scmp.ne.s32.totalorder %s7943_s17, %s9593_s16  ;;  %p9599_p10 = scmp.lt.s32.totalorder %s9593_s16, %s9593_s16 }
0x1198   :  { %v7402_v19 = vadd.f32 %v7399_v57, %v7230_v2  ;;  %v7766_v2 = vld [vmem:[%s10912_s15 + $0x10] sm:$0xff] }
0x1199   :  { %v9257_v8 = vpack.c.bf16 %v7767_v59, %v7766_v2  ;;  %p9600_p11 = por %p9599_p10, %p9598_p9 }
0x119a   :  { %vm7403_vm9 = vcmp.gt.f32.partialorder %v7402_v19, 0.0  ;;  %v7404_v61 = vmul.f32 0.1, %v7402_v19 }
0x119b   :  { %p9601_p12 = pnand %p9600_p11, %p9594_p8 }
0x119c   :  { %v7405_v51 = vsel %vm7403_vm9, %v7402_v19, %v7404_v61 }
0x119d   :  { %9048 = vmatmul.mubr.msk.f32.vlgmr.msra.gmra.mrb[24].mxu0 %vm341_vm2, %v7405_v51 }
0x119e   :  { %9237 = vmatpush3.bf16.msra.mxu0 %v9236_v6  ;;  %9058 = vmatprep.mubr.msk.f32.mxu0 %vm9643_vm0, %v10980_v7 }
0x119f   :  { %9238 = vmatprep.subr.bf16.mxu0 %v9644_v15 }
0x11a2   :  { %9240 = vmatpush3.bf16.msra.mxu0 %v9239_v32 }
0x11a3   :  { %9241 = vmatprep.subr.bf16.mxu0 %v9644_v15 }
0x1270   :  { %v7488_v20 = vpop.f32.mrb[24].mxu0 }
0x1271   :  { %v7489_v48 = vadd.f32 %v8183_v47, %v7488_v20  ;;  %v9049_v33 = vpop.f32.mrb[25].mxu0 }
0x1273   :  { %vm7492_vm10 = vcmp.gt.f32.partialorder %v7489_v48, 0.0  ;;  %v7493_v50 = vmul.f32 0.1, %v7489_v48 }
0x1275   :  { %v7494_v5 = vsel %vm7492_vm10, %v7489_v48, %v7493_v50 }
0x1276   :  { %9059 = vmatmul.mubr.msk.f32.vlgmr.msra.gmra.mrb[26].mxu0 %vm341_vm2, %v7494_v5 }
0x1277   :  { %9069 = vmatprep.mubr.msk.f32.mxu0 %vm9643_vm0, %v10980_v7  ;;  %9243 = vmatpush3.bf16.msra.mxu0 %v9242_v3 }
0x1278   :  { %9244 = vmatprep.subr.bf16.mxu0 %v9644_v15 }
0x127b   :  { %9246 = vmatpush3.bf16.msra.mxu0 %v9245_v16 }
0x127c   :  { %9247 = vmatprep.subr.bf16.mxu0 %v9644_v15 }
0x1349   :  { %v7577_v49 = vpop.f32.mrb[26].mxu0 }
0x134a   :  { %v7578_v58 = vadd.f32 %v8185_v29, %v7577_v49  ;;  %v9060_v52 = vpop.f32.mrb[27].mxu0 }
0x134c   :  { %v7581_v22 = vadd.f32 %v7578_v58, %v7405_v51 }
0x134e   :  { %vm7582_vm11 = vcmp.gt.f32.partialorder %v7581_v22, 0.0  ;;  %v7583_v62 = vmul.f32 0.1, %v7581_v22 }
0x1350   :  { %v7584_v11 = vsel %vm7582_vm11, %v7581_v22, %v7583_v62 }
0x1351   :  { %9070 = vmatmul.mubr.msk.f32.vlgmr.msra.gmra.mrb[28].mxu0 %vm341_vm2, %v7584_v11 }
0x1352   :  { %9249 = vmatpush3.bf16.msra.mxu0 %v9248_v53  ;;  %9080 = vmatprep.mubr.msk.f32.mxu0 %vm9643_vm0, %v10980_v7 }
0x1353   :  { %9250 = vmatprep.subr.bf16.mxu0 %v9644_v15 }
0x1356   :  { %9252 = vmatpush3.bf16.msra.mxu0 %v9251_v41 }
0x1357   :  { %9253 = vmatprep.subr.bf16.mxu0 %v9644_v15 }
0x1424   :  { %v7667_v24 = vpop.f32.mrb[28].mxu0 }
0x1425   :  { %v7668_v25 = vadd.f32 %v8187_v18, %v7667_v24  ;;  %v9071_v63 = vpop.f32.mrb[29].mxu0 }
0x1427   :  { %vm7671_vm12 = vcmp.gt.f32.partialorder %v7668_v25, 0.0  ;;  %v7672_v17 = vmul.f32 0.1, %v7668_v25 }
0x1429   :  { %v7673_v26 = vsel %vm7671_vm12, %v7668_v25, %v7672_v17 }
0x142a   :  { %9081 = vmatmul.mubr.msk.f32.vlgmr.msra.gmra.mrb[30].mxu0 %vm341_vm2, %v7673_v26 }
0x142b   :  { %9091 = vmatprep.mubr.msk.f32.mxu0 %vm9643_vm0, %v10980_v7  ;;  %9255 = vmatpush3.bf16.msra.mxu0 %v9254_v37 }
0x142c   :  { %9256 = vmatprep.subr.bf16.mxu0 %v9644_v15 }
0x142f   :  { %9258 = vmatpush3.bf16.msra.mxu0 %v9257_v8 }
0x1430   :  { %9259 = vmatprep.subr.bf16.mxu0 %v9644_v15 }
0x14fd   :  { %v7756_v56 = vpop.f32.mrb[30].mxu0 }
0x14fe   :  { %v7757_v30 = vadd.f32 %v8189_v60, %v7756_v56  ;;  %v9082_v1 = vpop.f32.mrb[31].mxu0 }
0x1500   :  { %v7760_v13 = vadd.f32 %v7757_v30, %v7584_v11 }
0x1502   :  { %vm7761_vm13 = vcmp.gt.f32.partialorder %v7760_v13, 0.0  ;;  %v7762_v55 = vmul.f32 0.1, %v7760_v13 }
0x1504   :  { %v7763_v0 = vsel %vm7761_vm13, %v7760_v13, %v7762_v55 }
0x1505   :  { %9092 = vmatmul.mubr.msk.f32.vlgmr.msra.gmra.mrb[32].mxu0 %vm341_vm2, %v7763_v0 }
0x1506   :  { %9261 = vmatpush3.bf16.msra.mxu0 %v9260_v14  ;;  %9102 = vmatprep.mubr.msk.f32.mxu0 %vm9643_vm0, %v10980_v7 }
0x1507   :  { %9262 = vmatprep.subr.bf16.mxu0 %v9644_v15 }
0x150a   :  { %9264 = vmatpush3.bf16.msra.mxu0 %v9263_v54 }
0x15d8   :  { %v7844_v57 = vpop.f32.mrb[32].mxu0 }
0x15d9   :  { %v7845_v9 = vadd.f32 %v8191_v45, %v7844_v57  ;;  %v9093_v34 = vpop.f32.mrb[33].mxu0 }
0x15db   :  { %vm7848_vm0 = vcmp.gt.f32.partialorder %v7845_v9, 0.0  ;;  %v7849_v7 = vmul.f32 0.1, %v7845_v9 }
0x15dd   :  { %v7850_v15 = vsel %vm7848_vm0, %v7845_v9, %v7849_v7 }
0x15de   :  { %9103 = vmatmul.mubr.msk.f32.vlgmr.msra.gmra.mrb[34].mxu0 %vm341_vm2, %v7850_v15 }
0x16b1   :  { %v7931_v19 = vpop.f32.mrb[34].mxu0 }
0x16b2   :  { %v7932_v61 = vadd.f32 %v8193_v40, %v7931_v19  ;;  %v9104_v6 = vpop.f32.mrb[35].mxu0 }
0x16b4   :  { %7935 = vst [vmem:[#allocation17] sm:$0x3] %v7932_v61 }
0x16b5   :  { %9604 = shalt.err (!%p9601_p12)
}
0x16b6   :  { %s11003_s26 = sld [smem:[#allocation50_spill]] }
0x16bc   :  { %s9605_s4 = scalar_lea.hbm %s11003_s26, 32 }
0x16bd   :  { %p9606_p13 = scmp.ne.s32.totalorder %s11003_s26, %s9605_s4  ;;  %p9609_p0 = scmp.lt.u32.totalorder %s9605_s4, %s11003_s26 }
0x16bf   :  { %p9611_p1 = pnand %p9609_p0, %p9606_p13 }
0x16c1   :  { %9614 = shalt.err (!%p9611_p1)
}
0x16c2   :  { %7945 = dma.vmem_to_hbm [thread:$0]  %s7943_s17, 32, %s11003_s26, [#allocation5]  }
0x16c3   :  { %9625 = dma.done.wait [#allocation5], 32  }
0x16c4   :  { %9626 = vsyncadd [#allocation5], 4294967264 }
0x16c5   :  { %7949 = vsyncpa [#allocation4], 1 }
0x16c6   :  { %7950 = vsyncpa [#allocation7], 1 }
0x16c7   :  { %7951 = vsyncpa [#allocation10], 1 }
0x16c8   :  { %7952 = vsyncpa [#allocation13], 1 }
0x16c9   :  { %7953 = vsyncpa [#allocation16], 1 }
0x16ca   :  { %7954 = vsyncpa [#allocation5], 1 }

</bundles_post_ra>
